<compile_context>
chip_gen: v5e
topology: v5e:2x2
jax: 0.10.0
libtpu: 0.0.40
codegen_flags: <defaults>
</compile_context>

<pallas_src>
import functools

import jax
import jax.numpy as jnp
from jax import lax
from jax.experimental import pallas as pl
from jax.experimental.pallas import tpu as pltpu

EPS = 1e-5  # nn.BatchNorm2d default eps
_VMEM_LIMIT = 32 * 1024 * 1024  # conservative: fits v5e/v6e/v7x scoped VMEM


def _pick_row_tile(m, target=256):
    """Largest divisor of m that is <= target and a multiple of 8 (else m)."""
    t = min(m, target)
    t -= t % 8
    while t >= 8:
        if m % t == 0:
            return t
        t -= 8
    return m


# --------------------------- kernels ---------------------------------------
def _conv1x1_stats_kernel(x_ref, sc_ref, sh_ref, w_ref, o_ref, s_ref, ss_ref,
                          *, fuse_bn_relu):
    """[optional BN(scale,shift)+ReLU] -> 1x1 conv (matmul) -> partial sum/sumsq."""
    h = x_ref[...].astype(jnp.float32)
    if fuse_bn_relu:
        h = jnp.maximum(h * sc_ref[...] + sh_ref[...], 0.0)
    o = jnp.dot(h.astype(jnp.bfloat16), w_ref[...],
                preferred_element_type=jnp.float32)
    o_ref[...] = o
    # one-pass stats: per-channel sum and sum of squares for this tile
    s_ref[...] = jnp.sum(o, axis=0, keepdims=True)[None]
    ss_ref[...] = jnp.sum(o * o, axis=0, keepdims=True)[None]


def _conv3x3_stats_kernel(y_ref, sc_ref, sh_ref, w_ref, o_ref, s_ref, ss_ref,
                          pad_ref, acc_ref):
    """BN+ReLU -> 3x3 conv (stride 1, pad 1) on one image -> partial sum/sumsq."""
    _, H, W, P = y_ref.shape
    h = jnp.maximum(y_ref[0] * sc_ref[...] + sh_ref[...], 0.0)   # (H, W, P) f32

    # write once into a zero-padded VMEM scratch; read the 9 taps off the ref
    pad_ref[...] = jnp.zeros_like(pad_ref)
    pad_ref[1:H + 1, 1:W + 1, :] = h

    acc_ref[...] = jnp.zeros_like(acc_ref)
    for dy in range(3):
        for dx in range(3):
            tap = pad_ref[dy:dy + H, dx:dx + W, :].reshape(H * W, P)
            acc_ref[...] += jnp.dot(tap.astype(jnp.bfloat16),
                                    w_ref[dy * 3 + dx],
                                    preferred_element_type=jnp.float32)
    o = acc_ref[...]
    o_ref[...] = o.reshape(1, H, W, P)
    s_ref[...] = jnp.sum(o, axis=0, keepdims=True)[None]
    ss_ref[...] = jnp.sum(o * o, axis=0, keepdims=True)[None]


def _bn_add_relu_kernel(y_ref, sc_ref, sh_ref, idn_ref, o_ref):
    """BN3 -> +identity -> ReLU (identity re-read from HBM here, not held live)."""
    o = y_ref[...] * sc_ref[...] + sh_ref[...] + idn_ref[...].astype(jnp.float32)
    o_ref[...] = jnp.maximum(o, 0.0).astype(o_ref.dtype)


# --------------------------- wrapper ----------------------------------------
def _finalize_bn(s_part, ss_part, count, gamma, beta):
    """Reduce per-tile partial stats -> per-channel scale/shift (training BN)."""
    s = jnp.sum(s_part, axis=0)              # (1, C)
    ss = jnp.sum(ss_part, axis=0)            # (1, C)
    mean = s / count
    var = ss / count - mean * mean           # biased variance (one-pass)
    scale = gamma.reshape(1, -1) * lax.rsqrt(var + EPS)
    shift = beta.reshape(1, -1) - mean * scale
    return scale, shift


@jax.jit
def bottleneck_forward(x, w1, g1, b1, w2, g2, b2, w3, g3, b3):
    N, H, W, Cin = x.shape
    P = w1.shape[1]
    Cout = w3.shape[1]
    assert Cout == Cin, "identity shortcut requires inplanes == planes * expansion"
    M = N * H * W
    TM = _pick_row_tile(M)
    G = M // TM

    x2d = x.reshape(M, Cin).astype(jnp.float32)
    w1b = w1.astype(jnp.bfloat16)                       # (Cin, P)
    w2b = w2.reshape(9, P, P).astype(jnp.bfloat16)      # HWIO -> (9, P, P)
    w3b = w3.astype(jnp.bfloat16)                       # (P, Cout)

    cp = pltpu.CompilerParams(dimension_semantics=("parallel",),
                              vmem_limit_bytes=_VMEM_LIMIT)

    # ---- pass A: conv1 (1x1) + partial BN1 stats ----
    ones_c = jnp.ones((1, Cin), jnp.float32)
    zeros_c = jnp.zeros((1, Cin), jnp.float32)
    y1, s1, ss1 = pl.pallas_call(
        functools.partial(_conv1x1_stats_kernel, fuse_bn_relu=False),
        grid=(G,),
        in_specs=[pl.BlockSpec((TM, Cin), lambda i: (i, 0)),
                  pl.BlockSpec((1, Cin), lambda i: (0, 0)),
                  pl.BlockSpec((1, Cin), lambda i: (0, 0)),
                  pl.BlockSpec((Cin, P), lambda i: (0, 0))],
        out_specs=(pl.BlockSpec((TM, P), lambda i: (i, 0)),
                   pl.BlockSpec((1, 1, P), lambda i: (i, 0, 0)),
                   pl.BlockSpec((1, 1, P), lambda i: (i, 0, 0))),
        out_shape=(jax.ShapeDtypeStruct((M, P), jnp.float32),
                   jax.ShapeDtypeStruct((G, 1, P), jnp.float32),
                   jax.ShapeDtypeStruct((G, 1, P), jnp.float32)),
        compiler_params=cp,
        cost_estimate=pl.CostEstimate(flops=2 * M * Cin * P, transcendentals=0,
                                      bytes_accessed=4 * M * (Cin + P) + 2 * Cin * P),
    )(x2d, ones_c, zeros_c, w1b)
    scale1, shift1 = _finalize_bn(s1, ss1, M, g1, b1)

    # ---- pass B: BN1+ReLU + conv2 (3x3, pad 1) + partial BN2 stats ----
    y1_4d = y1.reshape(N, H, W, P)
    y2, s2, ss2 = pl.pallas_call(
        _conv3x3_stats_kernel,
        grid=(N,),
        in_specs=[pl.BlockSpec((1, H, W, P), lambda n: (n, 0, 0, 0)),
                  pl.BlockSpec((1, P), lambda n: (0, 0)),
                  pl.BlockSpec((1, P), lambda n: (0, 0)),
                  pl.BlockSpec((9, P, P), lambda n: (0, 0, 0))],
        out_specs=(pl.BlockSpec((1, H, W, P), lambda n: (n, 0, 0, 0)),
                   pl.BlockSpec((1, 1, P), lambda n: (n, 0, 0)),
                   pl.BlockSpec((1, 1, P), lambda n: (n, 0, 0))),
        out_shape=(jax.ShapeDtypeStruct((N, H, W, P), jnp.float32),
                   jax.ShapeDtypeStruct((N, 1, P), jnp.float32),
                   jax.ShapeDtypeStruct((N, 1, P), jnp.float32)),
        scratch_shapes=[pltpu.VMEM((H + 2, W + 2, P), jnp.float32),
                        pltpu.VMEM((H * W, P), jnp.float32)],
        compiler_params=cp,
        cost_estimate=pl.CostEstimate(flops=2 * M * 9 * P * P, transcendentals=0,
                                      bytes_accessed=8 * M * P + 2 * 9 * P * P),
    )(y1_4d, scale1, shift1, w2b)
    scale2, shift2 = _finalize_bn(s2, ss2, M, g2, b2)

    # ---- pass C: BN2+ReLU + conv3 (1x1) + partial BN3 stats ----
    y2_2d = y2.reshape(M, P)
    y3, s3, ss3 = pl.pallas_call(
        functools.partial(_conv1x1_stats_kernel, fuse_bn_relu=True),
        grid=(G,),
        in_specs=[pl.BlockSpec((TM, P), lambda i: (i, 0)),
                  pl.BlockSpec((1, P), lambda i: (0, 0)),
                  pl.BlockSpec((1, P), lambda i: (0, 0)),
                  pl.BlockSpec((P, Cout), lambda i: (0, 0))],
        out_specs=(pl.BlockSpec((TM, Cout), lambda i: (i, 0)),
                   pl.BlockSpec((1, 1, Cout), lambda i: (i, 0, 0)),
                   pl.BlockSpec((1, 1, Cout), lambda i: (i, 0, 0))),
        out_shape=(jax.ShapeDtypeStruct((M, Cout), jnp.float32),
                   jax.ShapeDtypeStruct((G, 1, Cout), jnp.float32),
                   jax.ShapeDtypeStruct((G, 1, Cout), jnp.float32)),
        compiler_params=cp,
        cost_estimate=pl.CostEstimate(flops=2 * M * P * Cout, transcendentals=0,
                                      bytes_accessed=4 * M * (P + Cout) + 2 * P * Cout),
    )(y2_2d, scale2, shift2, w3b)
    scale3, shift3 = _finalize_bn(s3, ss3, M, g3, b3)

    # ---- pass D: BN3 + residual add + ReLU (lane-dense Cout=Cin output) ----
    out = pl.pallas_call(
        _bn_add_relu_kernel,
        grid=(G,),
        in_specs=[pl.BlockSpec((TM, Cout), lambda i: (i, 0)),
                  pl.BlockSpec((1, Cout), lambda i: (0, 0)),
                  pl.BlockSpec((1, Cout), lambda i: (0, 0)),
                  pl.BlockSpec((TM, Cout), lambda i: (i, 0))],
        out_specs=pl.BlockSpec((TM, Cout), lambda i: (i, 0)),
        out_shape=jax.ShapeDtypeStruct((M, Cout), x.dtype),
        compiler_params=cp,
        cost_estimate=pl.CostEstimate(flops=3 * M * Cout, transcendentals=0,
                                      bytes_accessed=12 * M * Cout),
    )(y3, scale3, shift3, x2d)
    return out.reshape(N, H, W, Cout)


# ---------------- pure-JAX reference (same bf16 MXU-input rounding) ----------
def _conv_nhwc(x, w_hwio, padding):
    dn = lax.conv_dimension_numbers(x.shape, w_hwio.shape, ('NHWC', 'HWIO', 'NHWC'))
    return lax.conv_general_dilated(
        x.astype(jnp.bfloat16), w_hwio.astype(jnp.bfloat16),
        window_strides=(1, 1), padding=padding, dimension_numbers=dn,
        preferred_element_type=jnp.float32)


def _bn_train(x, g, b):
    m = jnp.mean(x, axis=(0, 1, 2), keepdims=True)
    v = jnp.mean(jnp.square(x - m), axis=(0, 1, 2), keepdims=True)
    return (x - m) * lax.rsqrt(v + EPS) * g.reshape(1, 1, 1, -1) + b.reshape(1, 1, 1, -1)


def reference(x, w1, g1, b1, w2, g2, b2, w3, g3, b3):
    h = _conv_nhwc(x, w1.reshape(1, 1, *w1.shape), 'VALID')
    h = jnp.maximum(_bn_train(h, g1, b1), 0.0)
    h = _conv_nhwc(h, w2, 'SAME')
    h = jnp.maximum(_bn_train(h, g2, b2), 0.0)
    h = _conv_nhwc(h, w3.reshape(1, 1, *w3.shape), 'VALID')
    h = _bn_train(h, g3, b3)
    return jnp.maximum(h + x, 0.0)


if __name__ == "__main__":
    key = jax.random.PRNGKey(0)
    N, H, W = 2, 16, 16
    planes = 32
    inplanes = planes * 4   # expansion=4, downsample=None -> identity add works

    keys = jax.random.split(key, 10)
    x = jax.random.normal(keys[0], (N, H, W, inplanes), jnp.float32)
    w1 = jax.random.normal(keys[1], (inplanes, planes), jnp.float32) / (inplanes ** 0.5)
    g1 = 1.0 + 0.1 * jax.random.normal(keys[2], (planes,), jnp.float32)
    b1 = 0.1 * jax.random.normal(keys[3], (planes,), jnp.float32)
    w2 = jax.random.normal(keys[4], (3, 3, planes, planes), jnp.float32) / ((9 * planes) ** 0.5)
    g2 = 1.0 + 0.1 * jax.random.normal(keys[5], (planes,), jnp.float32)
    b2 = 0.1 * jax.random.normal(keys[6], (planes,), jnp.float32)
    w3 = jax.random.normal(keys[7], (planes, inplanes), jnp.float32) / (planes ** 0.5)
    g3 = 1.0 + 0.1 * jax.random.normal(keys[8], (inplanes,), jnp.float32)
    b3 = 0.1 * jax.random.normal(keys[9], (inplanes,), jnp.float32)

    out = bottleneck_forward(x, w1, g1, b1, w2, g2, b2, w3, g3, b3)
    out = jax.block_until_ready(out)

    ref = reference(x, w1, g1, b1, w2, g2, b2, w3, g3, b3)
    err = float(jnp.max(jnp.abs(out - ref)))
    assert jnp.allclose(out, ref, atol=2e-2, rtol=2e-2), f"max abs err {err}"
    print("KERNEL_OK")
</pallas_src>

<mosaic_0001>
module attributes {stable_mosaic.version = 11 : i64} {
  func.func @_conv1x1_stats_kernel(%arg0: i32, %arg1: memref<256x128xf32, #tpu.memory_space<vmem>>, %arg2: memref<1x128xf32, #tpu.memory_space<vmem>>, %arg3: memref<1x128xf32, #tpu.memory_space<vmem>>, %arg4: memref<128x32xbf16, #tpu.memory_space<vmem>>, %arg5: memref<256x32xf32, #tpu.memory_space<vmem>>, %arg6: memref<1x1x32xf32, #tpu.memory_space<vmem>>, %arg7: memref<1x1x32xf32, #tpu.memory_space<vmem>>) attributes {dimension_semantics = [#tpu.dimension_semantics<parallel>], iteration_bounds = array<i64: 2>, scalar_prefetch = 0 : i64, scratch_operands = 0 : i64, tpu.core_type = #tpu.core_type<tc>, window_params = [{transform_indices = @transform_0, window_bounds = array<i64: 256, 128>}, {pipeline_mode = #tpu.pipeline_mode<synchronous>, transform_indices = @transform_1, window_bounds = array<i64: 1, 128>}, {pipeline_mode = #tpu.pipeline_mode<synchronous>, transform_indices = @transform_2, window_bounds = array<i64: 1, 128>}, {pipeline_mode = #tpu.pipeline_mode<synchronous>, transform_indices = @transform_3, window_bounds = array<i64: 128, 32>}, {transform_indices = @transform_4, window_bounds = array<i64: 256, 32>}, {transform_indices = @transform_5, window_bounds = array<i64: 1, 1, 32>}, {transform_indices = @transform_6, window_bounds = array<i64: 1, 1, 32>}]} {
    %c0 = arith.constant 0 : index
    %c0_0 = arith.constant 0 : index
    %0 = vector.load %arg1[%c0, %c0_0] : memref<256x128xf32, #tpu.memory_space<vmem>>, vector<256x128xf32>
    %1 = arith.truncf %0 : vector<256x128xf32> to vector<256x128xbf16>
    %c0_1 = arith.constant 0 : index
    %c0_2 = arith.constant 0 : index
    %2 = vector.load %arg4[%c0_1, %c0_2] : memref<128x32xbf16, #tpu.memory_space<vmem>>, vector<128x32xbf16>
    %cst = arith.constant dense<0.000000e+00> : vector<256x32xf32>
    %3 = tpu.matmul %1, %2, %cst {dimension_numbers = #tpu.dot_dimension_numbers<[1], [0], [0], [1], [0, 0, 1, 1], [], []>} : vector<256x128xbf16>, vector<128x32xbf16>, vector<256x32xf32> -> vector<256x32xf32>
    %c0_3 = arith.constant 0 : index
    %c0_4 = arith.constant 0 : index
    %4 = vector.load %arg5[%c0_3, %c0_4] : memref<256x32xf32, #tpu.memory_space<vmem>>, vector<256x32xf32>
    tpu.vector_store %arg5[%c0_3, %c0_4], %3 {strides = array<i32>} : memref<256x32xf32, #tpu.memory_space<vmem>>, vector<256x32xf32>,
    %cst_5 = arith.constant dense<0.000000e+00> : vector<32xf32>
    %5 = vector.multi_reduction <add>, %3, %cst_5 [0] : vector<256x32xf32> to vector<32xf32>
    %6 = vector.shape_cast %5 : vector<32xf32> to vector<1x32xf32>
    %7 = vector.shape_cast %6 : vector<1x32xf32> to vector<1x1x32xf32>
    %c0_6 = arith.constant 0 : index
    %c0_7 = arith.constant 0 : index
    %c0_8 = arith.constant 0 : index
    %8 = vector.load %arg6[%c0_6, %c0_7, %c0_8] : memref<1x1x32xf32, #tpu.memory_space<vmem>>, vector<1x1x32xf32>
    tpu.vector_store %arg6[%c0_6, %c0_7, %c0_8], %7 {strides = array<i32>} : memref<1x1x32xf32, #tpu.memory_space<vmem>>, vector<1x1x32xf32>,
    %9 = arith.mulf %3, %3 : vector<256x32xf32>
    %cst_9 = arith.constant dense<0.000000e+00> : vector<32xf32>
    %10 = vector.multi_reduction <add>, %9, %cst_9 [0] : vector<256x32xf32> to vector<32xf32>
    %11 = vector.shape_cast %10 : vector<32xf32> to vector<1x32xf32>
    %12 = vector.shape_cast %11 : vector<1x32xf32> to vector<1x1x32xf32>
    %c0_10 = arith.constant 0 : index
    %c0_11 = arith.constant 0 : index
    %c0_12 = arith.constant 0 : index
    %13 = vector.load %arg7[%c0_10, %c0_11, %c0_12] : memref<1x1x32xf32, #tpu.memory_space<vmem>>, vector<1x1x32xf32>
    tpu.vector_store %arg7[%c0_10, %c0_11, %c0_12], %12 {strides = array<i32>} : memref<1x1x32xf32, #tpu.memory_space<vmem>>, vector<1x1x32xf32>,
    return
  }
  func.func @transform_0(%arg0: i32) -> (i32, i32) {
    %c0_i32 = arith.constant 0 : i32
    %c0_i32_0 = arith.constant 0 : i32
    return %arg0, %c0_i32 : i32, i32
  }
  func.func @transform_1(%arg0: i32) -> (i32, i32) {
    %c0_i32 = arith.constant 0 : i32
    %c0_i32_0 = arith.constant 0 : i32
    %c0_i32_1 = arith.constant 0 : i32
    return %c0_i32, %c0_i32_0 : i32, i32
  }
  func.func @transform_2(%arg0: i32) -> (i32, i32) {
    %c0_i32 = arith.constant 0 : i32
    %c0_i32_0 = arith.constant 0 : i32
    %c0_i32_1 = arith.constant 0 : i32
    return %c0_i32, %c0_i32_0 : i32, i32
  }
  func.func @transform_3(%arg0: i32) -> (i32, i32) {
    %c0_i32 = arith.constant 0 : i32
    %c0_i32_0 = arith.constant 0 : i32
    %c0_i32_1 = arith.constant 0 : i32
    return %c0_i32, %c0_i32_0 : i32, i32
  }
  func.func @transform_4(%arg0: i32) -> (i32, i32) {
    %c0_i32 = arith.constant 0 : i32
    %c0_i32_0 = arith.constant 0 : i32
    return %arg0, %c0_i32 : i32, i32
  }
  func.func @transform_5(%arg0: i32) -> (i32, i32, i32) {
    %c0_i32 = arith.constant 0 : i32
    %c0_i32_0 = arith.constant 0 : i32
    %c0_i32_1 = arith.constant 0 : i32
    return %arg0, %c0_i32, %c0_i32_0 : i32, i32, i32
  }
  func.func @transform_6(%arg0: i32) -> (i32, i32, i32) {
    %c0_i32 = arith.constant 0 : i32
    %c0_i32_0 = arith.constant 0 : i32
    %c0_i32_1 = arith.constant 0 : i32
    return %arg0, %c0_i32, %c0_i32_0 : i32, i32, i32
  }
}

module attributes {stable_mosaic.version = 11 : i64} {
  func.func @_conv1x1_stats_kernel(%arg0: i32, %arg1: memref<256x32xf32, #tpu.memory_space<vmem>>, %arg2: memref<1x32xf32, #tpu.memory_space<vmem>>, %arg3: memref<1x32xf32, #tpu.memory_space<vmem>>, %arg4: memref<32x128xbf16, #tpu.memory_space<vmem>>, %arg5: memref<256x128xf32, #tpu.memory_space<vmem>>, %arg6: memref<1x1x128xf32, #tpu.memory_space<vmem>>, %arg7: memref<1x1x128xf32, #tpu.memory_space<vmem>>) attributes {dimension_semantics = [#tpu.dimension_semantics<parallel>], iteration_bounds = array<i64: 2>, scalar_prefetch = 0 : i64, scratch_operands = 0 : i64, tpu.core_type = #tpu.core_type<tc>, window_params = [{transform_indices = @transform_0, window_bounds = array<i64: 256, 32>}, {pipeline_mode = #tpu.pipeline_mode<synchronous>, transform_indices = @transform_1, window_bounds = array<i64: 1, 32>}, {pipeline_mode = #tpu.pipeline_mode<synchronous>, transform_indices = @transform_2, window_bounds = array<i64: 1, 32>}, {pipeline_mode = #tpu.pipeline_mode<synchronous>, transform_indices = @transform_3, window_bounds = array<i64: 32, 128>}, {transform_indices = @transform_4, window_bounds = array<i64: 256, 128>}, {transform_indices = @transform_5, window_bounds = array<i64: 1, 1, 128>}, {transform_indices = @transform_6, window_bounds = array<i64: 1, 1, 128>}]} {
    %c0 = arith.constant 0 : index
    %c0_0 = arith.constant 0 : index
    %0 = vector.load %arg1[%c0, %c0_0] : memref<256x32xf32, #tpu.memory_space<vmem>>, vector<256x32xf32>
    %c0_1 = arith.constant 0 : index
    %c0_2 = arith.constant 0 : index
    %1 = vector.load %arg2[%c0_1, %c0_2] : memref<1x32xf32, #tpu.memory_space<vmem>>, vector<1x32xf32>
    %2 = vector.broadcast %1 : vector<1x32xf32> to vector<256x32xf32>
    %3 = arith.mulf %0, %2 : vector<256x32xf32>
    %c0_3 = arith.constant 0 : index
    %c0_4 = arith.constant 0 : index
    %4 = vector.load %arg3[%c0_3, %c0_4] : memref<1x32xf32, #tpu.memory_space<vmem>>, vector<1x32xf32>
    %5 = vector.broadcast %4 : vector<1x32xf32> to vector<256x32xf32>
    %6 = arith.addf %3, %5 : vector<256x32xf32>
    %cst = arith.constant 0.000000e+00 : f32
    %7 = vector.broadcast %cst : f32 to vector<256x32xf32>
    %8 = arith.maximumf %6, %7 : vector<256x32xf32>
    %9 = arith.truncf %8 : vector<256x32xf32> to vector<256x32xbf16>
    %c0_5 = arith.constant 0 : index
    %c0_6 = arith.constant 0 : index
    %10 = vector.load %arg4[%c0_5, %c0_6] : memref<32x128xbf16, #tpu.memory_space<vmem>>, vector<32x128xbf16>
    %cst_7 = arith.constant dense<0.000000e+00> : vector<256x128xf32>
    %11 = tpu.matmul %9, %10, %cst_7 {dimension_numbers = #tpu.dot_dimension_numbers<[1], [0], [0], [1], [0, 0, 1, 1], [], []>} : vector<256x32xbf16>, vector<32x128xbf16>, vector<256x128xf32> -> vector<256x128xf32>
    %c0_8 = arith.constant 0 : index
    %c0_9 = arith.constant 0 : index
    %12 = vector.load %arg5[%c0_8, %c0_9] : memref<256x128xf32, #tpu.memory_space<vmem>>, vector<256x128xf32>
    tpu.vector_store %arg5[%c0_8, %c0_9], %11 {strides = array<i32>} : memref<256x128xf32, #tpu.memory_space<vmem>>, vector<256x128xf32>,
    %cst_10 = arith.constant dense<0.000000e+00> : vector<128xf32>
    %13 = vector.multi_reduction <add>, %11, %cst_10 [0] : vector<256x128xf32> to vector<128xf32>
    %14 = vector.shape_cast %13 : vector<128xf32> to vector<1x128xf32>
    %15 = vector.shape_cast %14 : vector<1x128xf32> to vector<1x1x128xf32>
    %c0_11 = arith.constant 0 : index
    %c0_12 = arith.constant 0 : index
    %c0_13 = arith.constant 0 : index
    %16 = vector.load %arg6[%c0_11, %c0_12, %c0_13] : memref<1x1x128xf32, #tpu.memory_space<vmem>>, vector<1x1x128xf32>
    tpu.vector_store %arg6[%c0_11, %c0_12, %c0_13], %15 {strides = array<i32>} : memref<1x1x128xf32, #tpu.memory_space<vmem>>, vector<1x1x128xf32>,
    %17 = arith.mulf %11, %11 : vector<256x128xf32>
    %cst_14 = arith.constant dense<0.000000e+00> : vector<128xf32>
    %18 = vector.multi_reduction <add>, %17, %cst_14 [0] : vector<256x128xf32> to vector<128xf32>
    %19 = vector.shape_cast %18 : vector<128xf32> to vector<1x128xf32>
    %20 = vector.shape_cast %19 : vector<1x128xf32> to vector<1x1x128xf32>
    %c0_15 = arith.constant 0 : index
    %c0_16 = arith.constant 0 : index
    %c0_17 = arith.constant 0 : index
    %21 = vector.load %arg7[%c0_15, %c0_16, %c0_17] : memref<1x1x128xf32, #tpu.memory_space<vmem>>, vector<1x1x128xf32>
    tpu.vector_store %arg7[%c0_15, %c0_16, %c0_17], %20 {strides = array<i32>} : memref<1x1x128xf32, #tpu.memory_space<vmem>>, vector<1x1x128xf32>,
    return
  }
  func.func @transform_0(%arg0: i32) -> (i32, i32) {
    %c0_i32 = arith.constant 0 : i32
    %c0_i32_0 = arith.constant 0 : i32
    return %arg0, %c0_i32 : i32, i32
  }
  func.func @transform_1(%arg0: i32) -> (i32, i32) {
    %c0_i32 = arith.constant 0 : i32
    %c0_i32_0 = arith.constant 0 : i32
    %c0_i32_1 = arith.constant 0 : i32
    return %c0_i32, %c0_i32_0 : i32, i32
  }
  func.func @transform_2(%arg0: i32) -> (i32, i32) {
    %c0_i32 = arith.constant 0 : i32
    %c0_i32_0 = arith.constant 0 : i32
    %c0_i32_1 = arith.constant 0 : i32
    return %c0_i32, %c0_i32_0 : i32, i32
  }
  func.func @transform_3(%arg0: i32) -> (i32, i32) {
    %c0_i32 = arith.constant 0 : i32
    %c0_i32_0 = arith.constant 0 : i32
    %c0_i32_1 = arith.constant 0 : i32
    return %c0_i32, %c0_i32_0 : i32, i32
  }
  func.func @transform_4(%arg0: i32) -> (i32, i32) {
    %c0_i32 = arith.constant 0 : i32
    %c0_i32_0 = arith.constant 0 : i32
    return %arg0, %c0_i32 : i32, i32
  }
  func.func @transform_5(%arg0: i32) -> (i32, i32, i32) {
    %c0_i32 = arith.constant 0 : i32
    %c0_i32_0 = arith.constant 0 : i32
    %c0_i32_1 = arith.constant 0 : i32
    return %arg0, %c0_i32, %c0_i32_0 : i32, i32, i32
  }
  func.func @transform_6(%arg0: i32) -> (i32, i32, i32) {
    %c0_i32 = arith.constant 0 : i32
    %c0_i32_0 = arith.constant 0 : i32
    %c0_i32_1 = arith.constant 0 : i32
    return %arg0, %c0_i32, %c0_i32_0 : i32, i32, i32
  }
}

module attributes {stable_mosaic.version = 11 : i64} {
  func.func @_conv3x3_stats_kernel(%arg0: i32, %arg1: memref<1x16x16x32xf32, #tpu.memory_space<vmem>>, %arg2: memref<1x32xf32, #tpu.memory_space<vmem>>, %arg3: memref<1x32xf32, #tpu.memory_space<vmem>>, %arg4: memref<9x32x32xbf16, #tpu.memory_space<vmem>>, %arg5: memref<1x16x16x32xf32, #tpu.memory_space<vmem>>, %arg6: memref<1x1x32xf32, #tpu.memory_space<vmem>>, %arg7: memref<1x1x32xf32, #tpu.memory_space<vmem>>, %arg8: memref<18x18x32xf32, #tpu.memory_space<vmem>>, %arg9: memref<256x32xf32, #tpu.memory_space<vmem>>) attributes {dimension_semantics = [#tpu.dimension_semantics<parallel>], iteration_bounds = array<i64: 2>, scalar_prefetch = 0 : i64, scratch_operands = 2 : i64, tpu.core_type = #tpu.core_type<tc>, window_params = [{transform_indices = @transform_0, window_bounds = array<i64: 1, 16, 16, 32>}, {pipeline_mode = #tpu.pipeline_mode<synchronous>, transform_indices = @transform_1, window_bounds = array<i64: 1, 32>}, {pipeline_mode = #tpu.pipeline_mode<synchronous>, transform_indices = @transform_2, window_bounds = array<i64: 1, 32>}, {pipeline_mode = #tpu.pipeline_mode<synchronous>, transform_indices = @transform_3, window_bounds = array<i64: 9, 32, 32>}, {transform_indices = @transform_4, window_bounds = array<i64: 1, 16, 16, 32>}, {transform_indices = @transform_5, window_bounds = array<i64: 1, 1, 32>}, {transform_indices = @transform_6, window_bounds = array<i64: 1, 1, 32>}]} {
    %c0 = arith.constant 0 : index
    %c0_0 = arith.constant 0 : index
    %c0_1 = arith.constant 0 : index
    %c0_2 = arith.constant 0 : index
    %0 = vector.load %arg1[%c0, %c0_0, %c0_1, %c0_2] : memref<1x16x16x32xf32, #tpu.memory_space<vmem>>, vector<1x16x16x32xf32>
    %1 = vector.shape_cast %0 : vector<1x16x16x32xf32> to vector<16x16x32xf32>
    %c0_3 = arith.constant 0 : index
    %c0_4 = arith.constant 0 : index
    %2 = vector.load %arg2[%c0_3, %c0_4] : memref<1x32xf32, #tpu.memory_space<vmem>>, vector<1x32xf32>
    %3 = vector.shape_cast %2 : vector<1x32xf32> to vector<1x1x32xf32>
    %4 = vector.broadcast %3 : vector<1x1x32xf32> to vector<16x16x32xf32>
    %5 = arith.mulf %1, %4 : vector<16x16x32xf32>
    %c0_5 = arith.constant 0 : index
    %c0_6 = arith.constant 0 : index
    %6 = vector.load %arg3[%c0_5, %c0_6] : memref<1x32xf32, #tpu.memory_space<vmem>>, vector<1x32xf32>
    %7 = vector.shape_cast %6 : vector<1x32xf32> to vector<1x1x32xf32>
    %8 = vector.broadcast %7 : vector<1x1x32xf32> to vector<16x16x32xf32>
    %9 = arith.addf %5, %8 : vector<16x16x32xf32>
    %cst = arith.constant 0.000000e+00 : f32
    %10 = vector.broadcast %cst : f32 to vector<16x16x32xf32>
    %11 = arith.maximumf %9, %10 : vector<16x16x32xf32>
    %cst_7 = arith.constant 0.000000e+00 : f32
    %12 = vector.broadcast %cst_7 : f32 to vector<18x18x32xf32>
    %c0_8 = arith.constant 0 : index
    %c0_9 = arith.constant 0 : index
    %c0_10 = arith.constant 0 : index
    %13 = vector.load %arg8[%c0_8, %c0_9, %c0_10] : memref<18x18x32xf32, #tpu.memory_space<vmem>>, vector<18x18x32xf32>
    tpu.vector_store %arg8[%c0_8, %c0_9, %c0_10], %12 {strides = array<i32>} : memref<18x18x32xf32, #tpu.memory_space<vmem>>, vector<18x18x32xf32>,
    %c1 = arith.constant 1 : index
    %c1_11 = arith.constant 1 : index
    %c0_12 = arith.constant 0 : index
    %14 = vector.load %arg8[%c1, %c1_11, %c0_12] : memref<18x18x32xf32, #tpu.memory_space<vmem>>, vector<16x16x32xf32>
    tpu.vector_store %arg8[%c1, %c1_11, %c0_12], %11 {strides = array<i32>} : memref<18x18x32xf32, #tpu.memory_space<vmem>>, vector<16x16x32xf32>,
    %cst_13 = arith.constant 0.000000e+00 : f32
    %15 = vector.broadcast %cst_13 : f32 to vector<256x32xf32>
    %c0_14 = arith.constant 0 : index
    %c0_15 = arith.constant 0 : index
    %16 = vector.load %arg9[%c0_14, %c0_15] : memref<256x32xf32, #tpu.memory_space<vmem>>, vector<256x32xf32>
    tpu.vector_store %arg9[%c0_14, %c0_15], %15 {strides = array<i32>} : memref<256x32xf32, #tpu.memory_space<vmem>>, vector<256x32xf32>,
    %c0_16 = arith.constant 0 : index
    %c0_17 = arith.constant 0 : index
    %c0_18 = arith.constant 0 : index
    %17 = vector.load %arg8[%c0_16, %c0_17, %c0_18] : memref<18x18x32xf32, #tpu.memory_space<vmem>>, vector<16x16x32xf32>
    %18 = vector.shape_cast %17 : vector<16x16x32xf32> to vector<256x32xf32>
    %c0_19 = arith.constant 0 : index
    %c0_20 = arith.constant 0 : index
    %19 = vector.load %arg9[%c0_19, %c0_20] : memref<256x32xf32, #tpu.memory_space<vmem>>, vector<256x32xf32>
    %20 = arith.truncf %18 : vector<256x32xf32> to vector<256x32xbf16>
    %c0_21 = arith.constant 0 : index
    %c0_22 = arith.constant 0 : index
    %c0_23 = arith.constant 0 : index
    %21 = vector.load %arg4[%c0_21, %c0_22, %c0_23] : memref<9x32x32xbf16, #tpu.memory_space<vmem>>, vector<1x32x32xbf16>
    %22 = vector.shape_cast %21 : vector<1x32x32xbf16> to vector<32x32xbf16>
    %cst_24 = arith.constant dense<0.000000e+00> : vector<256x32xf32>
    %23 = tpu.matmul %20, %22, %cst_24 {dimension_numbers = #tpu.dot_dimension_numbers<[1], [0], [0], [1], [0, 0, 1, 1], [], []>} : vector<256x32xbf16>, vector<32x32xbf16>, vector<256x32xf32> -> vector<256x32xf32>
    %24 = arith.addf %19, %23 : vector<256x32xf32>
    %c0_25 = arith.constant 0 : index
    %c0_26 = arith.constant 0 : index
    %25 = vector.load %arg9[%c0_25, %c0_26] : memref<256x32xf32, #tpu.memory_space<vmem>>, vector<256x32xf32>
    tpu.vector_store %arg9[%c0_25, %c0_26], %24 {strides = array<i32>} : memref<256x32xf32, #tpu.memory_space<vmem>>, vector<256x32xf32>,
    %c0_27 = arith.constant 0 : index
    %c1_28 = arith.constant 1 : index
    %c0_29 = arith.constant 0 : index
    %26 = vector.load %arg8[%c0_27, %c1_28, %c0_29] : memref<18x18x32xf32, #tpu.memory_space<vmem>>, vector<16x16x32xf32>
    %27 = vector.shape_cast %26 : vector<16x16x32xf32> to vector<256x32xf32>
    %c0_30 = arith.constant 0 : index
    %c0_31 = arith.constant 0 : index
    %28 = vector.load %arg9[%c0_30, %c0_31] : memref<256x32xf32, #tpu.memory_space<vmem>>, vector<256x32xf32>
    %29 = arith.truncf %27 : vector<256x32xf32> to vector<256x32xbf16>
    %c1_32 = arith.constant 1 : index
    %c0_33 = arith.constant 0 : index
    %c0_34 = arith.constant 0 : index
    %30 = vector.load %arg4[%c1_32, %c0_33, %c0_34] : memref<9x32x32xbf16, #tpu.memory_space<vmem>>, vector<1x32x32xbf16>
    %31 = vector.shape_cast %30 : vector<1x32x32xbf16> to vector<32x32xbf16>
    %cst_35 = arith.constant dense<0.000000e+00> : vector<256x32xf32>
    %32 = tpu.matmul %29, %31, %cst_35 {dimension_numbers = #tpu.dot_dimension_numbers<[1], [0], [0], [1], [0, 0, 1, 1], [], []>} : vector<256x32xbf16>, vector<32x32xbf16>, vector<256x32xf32> -> vector<256x32xf32>
    %33 = arith.addf %28, %32 : vector<256x32xf32>
    %c0_36 = arith.constant 0 : index
    %c0_37 = arith.constant 0 : index
    %34 = vector.load %arg9[%c0_36, %c0_37] : memref<256x32xf32, #tpu.memory_space<vmem>>, vector<256x32xf32>
    tpu.vector_store %arg9[%c0_36, %c0_37], %33 {strides = array<i32>} : memref<256x32xf32, #tpu.memory_space<vmem>>, vector<256x32xf32>,
    %c0_38 = arith.constant 0 : index
    %c2 = arith.constant 2 : index
    %c0_39 = arith.constant 0 : index
    %35 = vector.load %arg8[%c0_38, %c2, %c0_39] : memref<18x18x32xf32, #tpu.memory_space<vmem>>, vector<16x16x32xf32>
    %36 = vector.shape_cast %35 : vector<16x16x32xf32> to vector<256x32xf32>
    %c0_40 = arith.constant 0 : index
    %c0_41 = arith.constant 0 : index
    %37 = vector.load %arg9[%c0_40, %c0_41] : memref<256x32xf32, #tpu.memory_space<vmem>>, vector<256x32xf32>
    %38 = arith.truncf %36 : vector<256x32xf32> to vector<256x32xbf16>
    %c2_42 = arith.constant 2 : index
    %c0_43 = arith.constant 0 : index
    %c0_44 = arith.constant 0 : index
    %39 = vector.load %arg4[%c2_42, %c0_43, %c0_44] : memref<9x32x32xbf16, #tpu.memory_space<vmem>>, vector<1x32x32xbf16>
    %40 = vector.shape_cast %39 : vector<1x32x32xbf16> to vector<32x32xbf16>
    %cst_45 = arith.constant dense<0.000000e+00> : vector<256x32xf32>
    %41 = tpu.matmul %38, %40, %cst_45 {dimension_numbers = #tpu.dot_dimension_numbers<[1], [0], [0], [1], [0, 0, 1, 1], [], []>} : vector<256x32xbf16>, vector<32x32xbf16>, vector<256x32xf32> -> vector<256x32xf32>
    %42 = arith.addf %37, %41 : vector<256x32xf32>
    %c0_46 = arith.constant 0 : index
    %c0_47 = arith.constant 0 : index
    %43 = vector.load %arg9[%c0_46, %c0_47] : memref<256x32xf32, #tpu.memory_space<vmem>>, vector<256x32xf32>
    tpu.vector_store %arg9[%c0_46, %c0_47], %42 {strides = array<i32>} : memref<256x32xf32, #tpu.memory_space<vmem>>, vector<256x32xf32>,
    %c1_48 = arith.constant 1 : index
    %c0_49 = arith.constant 0 : index
    %c0_50 = arith.constant 0 : index
    %44 = vector.load %arg8[%c1_48, %c0_49, %c0_50] : memref<18x18x32xf32, #tpu.memory_space<vmem>>, vector<16x16x32xf32>
    %45 = vector.shape_cast %44 : vector<16x16x32xf32> to vector<256x32xf32>
    %c0_51 = arith.constant 0 : index
    %c0_52 = arith.constant 0 : index
    %46 = vector.load %arg9[%c0_51, %c0_52] : memref<256x32xf32, #tpu.memory_space<vmem>>, vector<256x32xf32>
    %47 = arith.truncf %45 : vector<256x32xf32> to vector<256x32xbf16>
    %c3 = arith.constant 3 : index
    %c0_53 = arith.constant 0 : index
    %c0_54 = arith.constant 0 : index
    %48 = vector.load %arg4[%c3, %c0_53, %c0_54] : memref<9x32x32xbf16, #tpu.memory_space<vmem>>, vector<1x32x32xbf16>
    %49 = vector.shape_cast %48 : vector<1x32x32xbf16> to vector<32x32xbf16>
    %cst_55 = arith.constant dense<0.000000e+00> : vector<256x32xf32>
    %50 = tpu.matmul %47, %49, %cst_55 {dimension_numbers = #tpu.dot_dimension_numbers<[1], [0], [0], [1], [0, 0, 1, 1], [], []>} : vector<256x32xbf16>, vector<32x32xbf16>, vector<256x32xf32> -> vector<256x32xf32>
    %51 = arith.addf %46, %50 : vector<256x32xf32>
    %c0_56 = arith.constant 0 : index
    %c0_57 = arith.constant 0 : index
    %52 = vector.load %arg9[%c0_56, %c0_57] : memref<256x32xf32, #tpu.memory_space<vmem>>, vector<256x32xf32>
    tpu.vector_store %arg9[%c0_56, %c0_57], %51 {strides = array<i32>} : memref<256x32xf32, #tpu.memory_space<vmem>>, vector<256x32xf32>,
    %c1_58 = arith.constant 1 : index
    %c1_59 = arith.constant 1 : index
    %c0_60 = arith.constant 0 : index
    %53 = vector.load %arg8[%c1_58, %c1_59, %c0_60] : memref<18x18x32xf32, #tpu.memory_space<vmem>>, vector<16x16x32xf32>
    %54 = vector.shape_cast %53 : vector<16x16x32xf32> to vector<256x32xf32>
    %c0_61 = arith.constant 0 : index
    %c0_62 = arith.constant 0 : index
    %55 = vector.load %arg9[%c0_61, %c0_62] : memref<256x32xf32, #tpu.memory_space<vmem>>, vector<256x32xf32>
    %56 = arith.truncf %54 : vector<256x32xf32> to vector<256x32xbf16>
    %c4 = arith.constant 4 : index
    %c0_63 = arith.constant 0 : index
    %c0_64 = arith.constant 0 : index
    %57 = vector.load %arg4[%c4, %c0_63, %c0_64] : memref<9x32x32xbf16, #tpu.memory_space<vmem>>, vector<1x32x32xbf16>
    %58 = vector.shape_cast %57 : vector<1x32x32xbf16> to vector<32x32xbf16>
    %cst_65 = arith.constant dense<0.000000e+00> : vector<256x32xf32>
    %59 = tpu.matmul %56, %58, %cst_65 {dimension_numbers = #tpu.dot_dimension_numbers<[1], [0], [0], [1], [0, 0, 1, 1], [], []>} : vector<256x32xbf16>, vector<32x32xbf16>, vector<256x32xf32> -> vector<256x32xf32>
    %60 = arith.addf %55, %59 : vector<256x32xf32>
    %c0_66 = arith.constant 0 : index
    %c0_67 = arith.constant 0 : index
    %61 = vector.load %arg9[%c0_66, %c0_67] : memref<256x32xf32, #tpu.memory_space<vmem>>, vector<256x32xf32>
    tpu.vector_store %arg9[%c0_66, %c0_67], %60 {strides = array<i32>} : memref<256x32xf32, #tpu.memory_space<vmem>>, vector<256x32xf32>,
    %c1_68 = arith.constant 1 : index
    %c2_69 = arith.constant 2 : index
    %c0_70 = arith.constant 0 : index
    %62 = vector.load %arg8[%c1_68, %c2_69, %c0_70] : memref<18x18x32xf32, #tpu.memory_space<vmem>>, vector<16x16x32xf32>
    %63 = vector.shape_cast %62 : vector<16x16x32xf32> to vector<256x32xf32>
    %c0_71 = arith.constant 0 : index
    %c0_72 = arith.constant 0 : index
    %64 = vector.load %arg9[%c0_71, %c0_72] : memref<256x32xf32, #tpu.memory_space<vmem>>, vector<256x32xf32>
    %65 = arith.truncf %63 : vector<256x32xf32> to vector<256x32xbf16>
    %c5 = arith.constant 5 : index
    %c0_73 = arith.constant 0 : index
    %c0_74 = arith.constant 0 : index
    %66 = vector.load %arg4[%c5, %c0_73, %c0_74] : memref<9x32x32xbf16, #tpu.memory_space<vmem>>, vector<1x32x32xbf16>
    %67 = vector.shape_cast %66 : vector<1x32x32xbf16> to vector<32x32xbf16>
    %cst_75 = arith.constant dense<0.000000e+00> : vector<256x32xf32>
    %68 = tpu.matmul %65, %67, %cst_75 {dimension_numbers = #tpu.dot_dimension_numbers<[1], [0], [0], [1], [0, 0, 1, 1], [], []>} : vector<256x32xbf16>, vector<32x32xbf16>, vector<256x32xf32> -> vector<256x32xf32>
    %69 = arith.addf %64, %68 : vector<256x32xf32>
    %c0_76 = arith.constant 0 : index
    %c0_77 = arith.constant 0 : index
    %70 = vector.load %arg9[%c0_76, %c0_77] : memref<256x32xf32, #tpu.memory_space<vmem>>, vector<256x32xf32>
    tpu.vector_store %arg9[%c0_76, %c0_77], %69 {strides = array<i32>} : memref<256x32xf32, #tpu.memory_space<vmem>>, vector<256x32xf32>,
    %c2_78 = arith.constant 2 : index
    %c0_79 = arith.constant 0 : index
    %c0_80 = arith.constant 0 : index
    %71 = vector.load %arg8[%c2_78, %c0_79, %c0_80] : memref<18x18x32xf32, #tpu.memory_space<vmem>>, vector<16x16x32xf32>
    %72 = vector.shape_cast %71 : vector<16x16x32xf32> to vector<256x32xf32>
    %c0_81 = arith.constant 0 : index
    %c0_82 = arith.constant 0 : index
    %73 = vector.load %arg9[%c0_81, %c0_82] : memref<256x32xf32, #tpu.memory_space<vmem>>, vector<256x32xf32>
    %74 = arith.truncf %72 : vector<256x32xf32> to vector<256x32xbf16>
    %c6 = arith.constant 6 : index
    %c0_83 = arith.constant 0 : index
    %c0_84 = arith.constant 0 : index
    %75 = vector.load %arg4[%c6, %c0_83, %c0_84] : memref<9x32x32xbf16, #tpu.memory_space<vmem>>, vector<1x32x32xbf16>
    %76 = vector.shape_cast %75 : vector<1x32x32xbf16> to vector<32x32xbf16>
    %cst_85 = arith.constant dense<0.000000e+00> : vector<256x32xf32>
    %77 = tpu.matmul %74, %76, %cst_85 {dimension_numbers = #tpu.dot_dimension_numbers<[1], [0], [0], [1], [0, 0, 1, 1], [], []>} : vector<256x32xbf16>, vector<32x32xbf16>, vector<256x32xf32> -> vector<256x32xf32>
    %78 = arith.addf %73, %77 : vector<256x32xf32>
    %c0_86 = arith.constant 0 : index
    %c0_87 = arith.constant 0 : index
    %79 = vector.load %arg9[%c0_86, %c0_87] : memref<256x32xf32, #tpu.memory_space<vmem>>, vector<256x32xf32>
    tpu.vector_store %arg9[%c0_86, %c0_87], %78 {strides = array<i32>} : memref<256x32xf32, #tpu.memory_space<vmem>>, vector<256x32xf32>,
    %c2_88 = arith.constant 2 : index
    %c1_89 = arith.constant 1 : index
    %c0_90 = arith.constant 0 : index
    %80 = vector.load %arg8[%c2_88, %c1_89, %c0_90] : memref<18x18x32xf32, #tpu.memory_space<vmem>>, vector<16x16x32xf32>
    %81 = vector.shape_cast %80 : vector<16x16x32xf32> to vector<256x32xf32>
    %c0_91 = arith.constant 0 : index
    %c0_92 = arith.constant 0 : index
    %82 = vector.load %arg9[%c0_91, %c0_92] : memref<256x32xf32, #tpu.memory_space<vmem>>, vector<256x32xf32>
    %83 = arith.truncf %81 : vector<256x32xf32> to vector<256x32xbf16>
    %c7 = arith.constant 7 : index
    %c0_93 = arith.constant 0 : index
    %c0_94 = arith.constant 0 : index
    %84 = vector.load %arg4[%c7, %c0_93, %c0_94] : memref<9x32x32xbf16, #tpu.memory_space<vmem>>, vector<1x32x32xbf16>
    %85 = vector.shape_cast %84 : vector<1x32x32xbf16> to vector<32x32xbf16>
    %cst_95 = arith.constant dense<0.000000e+00> : vector<256x32xf32>
    %86 = tpu.matmul %83, %85, %cst_95 {dimension_numbers = #tpu.dot_dimension_numbers<[1], [0], [0], [1], [0, 0, 1, 1], [], []>} : vector<256x32xbf16>, vector<32x32xbf16>, vector<256x32xf32> -> vector<256x32xf32>
    %87 = arith.addf %82, %86 : vector<256x32xf32>
    %c0_96 = arith.constant 0 : index
    %c0_97 = arith.constant 0 : index
    %88 = vector.load %arg9[%c0_96, %c0_97] : memref<256x32xf32, #tpu.memory_space<vmem>>, vector<256x32xf32>
    tpu.vector_store %arg9[%c0_96, %c0_97], %87 {strides = array<i32>} : memref<256x32xf32, #tpu.memory_space<vmem>>, vector<256x32xf32>,
    %c2_98 = arith.constant 2 : index
    %c2_99 = arith.constant 2 : index
    %c0_100 = arith.constant 0 : index
    %89 = vector.load %arg8[%c2_98, %c2_99, %c0_100] : memref<18x18x32xf32, #tpu.memory_space<vmem>>, vector<16x16x32xf32>
    %90 = vector.shape_cast %89 : vector<16x16x32xf32> to vector<256x32xf32>
    %c0_101 = arith.constant 0 : index
    %c0_102 = arith.constant 0 : index
    %91 = vector.load %arg9[%c0_101, %c0_102] : memref<256x32xf32, #tpu.memory_space<vmem>>, vector<256x32xf32>
    %92 = arith.truncf %90 : vector<256x32xf32> to vector<256x32xbf16>
    %c8 = arith.constant 8 : index
    %c0_103 = arith.constant 0 : index
    %c0_104 = arith.constant 0 : index
    %93 = vector.load %arg4[%c8, %c0_103, %c0_104] : memref<9x32x32xbf16, #tpu.memory_space<vmem>>, vector<1x32x32xbf16>
    %94 = vector.shape_cast %93 : vector<1x32x32xbf16> to vector<32x32xbf16>
    %cst_105 = arith.constant dense<0.000000e+00> : vector<256x32xf32>
    %95 = tpu.matmul %92, %94, %cst_105 {dimension_numbers = #tpu.dot_dimension_numbers<[1], [0], [0], [1], [0, 0, 1, 1], [], []>} : vector<256x32xbf16>, vector<32x32xbf16>, vector<256x32xf32> -> vector<256x32xf32>
    %96 = arith.addf %91, %95 : vector<256x32xf32>
    %c0_106 = arith.constant 0 : index
    %c0_107 = arith.constant 0 : index
    %97 = vector.load %arg9[%c0_106, %c0_107] : memref<256x32xf32, #tpu.memory_space<vmem>>, vector<256x32xf32>
    tpu.vector_store %arg9[%c0_106, %c0_107], %96 {strides = array<i32>} : memref<256x32xf32, #tpu.memory_space<vmem>>, vector<256x32xf32>,
    %c0_108 = arith.constant 0 : index
    %c0_109 = arith.constant 0 : index
    %98 = vector.load %arg9[%c0_108, %c0_109] : memref<256x32xf32, #tpu.memory_space<vmem>>, vector<256x32xf32>
    %99 = vector.shape_cast %98 : vector<256x32xf32> to vector<1x16x16x32xf32>
    %c0_110 = arith.constant 0 : index
    %c0_111 = arith.constant 0 : index
    %c0_112 = arith.constant 0 : index
    %c0_113 = arith.constant 0 : index
    %100 = vector.load %arg5[%c0_110, %c0_111, %c0_112, %c0_113] : memref<1x16x16x32xf32, #tpu.memory_space<vmem>>, vector<1x16x16x32xf32>
    tpu.vector_store %arg5[%c0_110, %c0_111, %c0_112, %c0_113], %99 {strides = array<i32>} : memref<1x16x16x32xf32, #tpu.memory_space<vmem>>, vector<1x16x16x32xf32>,
    %cst_114 = arith.constant dense<0.000000e+00> : vector<32xf32>
    %101 = vector.multi_reduction <add>, %98, %cst_114 [0] : vector<256x32xf32> to vector<32xf32>
    %102 = vector.shape_cast %101 : vector<32xf32> to vector<1x32xf32>
    %103 = vector.shape_cast %102 : vector<1x32xf32> to vector<1x1x32xf32>
    %c0_115 = arith.constant 0 : index
    %c0_116 = arith.constant 0 : index
    %c0_117 = arith.constant 0 : index
    %104 = vector.load %arg6[%c0_115, %c0_116, %c0_117] : memref<1x1x32xf32, #tpu.memory_space<vmem>>, vector<1x1x32xf32>
    tpu.vector_store %arg6[%c0_115, %c0_116, %c0_117], %103 {strides = array<i32>} : memref<1x1x32xf32, #tpu.memory_space<vmem>>, vector<1x1x32xf32>,
    %105 = arith.mulf %98, %98 : vector<256x32xf32>
    %cst_118 = arith.constant dense<0.000000e+00> : vector<32xf32>
    %106 = vector.multi_reduction <add>, %105, %cst_118 [0] : vector<256x32xf32> to vector<32xf32>
    %107 = vector.shape_cast %106 : vector<32xf32> to vector<1x32xf32>
    %108 = vector.shape_cast %107 : vector<1x32xf32> to vector<1x1x32xf32>
    %c0_119 = arith.constant 0 : index
    %c0_120 = arith.constant 0 : index
    %c0_121 = arith.constant 0 : index
    %109 = vector.load %arg7[%c0_119, %c0_120, %c0_121] : memref<1x1x32xf32, #tpu.memory_space<vmem>>, vector<1x1x32xf32>
    tpu.vector_store %arg7[%c0_119, %c0_120, %c0_121], %108 {strides = array<i32>} : memref<1x1x32xf32, #tpu.memory_space<vmem>>, vector<1x1x32xf32>,
    return
  }
  func.func @transform_0(%arg0: i32) -> (i32, i32, i32, i32) {
    %c0_i32 = arith.constant 0 : i32
    %c0_i32_0 = arith.constant 0 : i32
    %c0_i32_1 = arith.constant 0 : i32
    %c0_i32_2 = arith.constant 0 : i32
    return %arg0, %c0_i32, %c0_i32_0, %c0_i32_1 : i32, i32, i32, i32
  }
  func.func @transform_1(%arg0: i32) -> (i32, i32) {
    %c0_i32 = arith.constant 0 : i32
    %c0_i32_0 = arith.constant 0 : i32
    %c0_i32_1 = arith.constant 0 : i32
    return %c0_i32, %c0_i32_0 : i32, i32
  }
  func.func @transform_2(%arg0: i32) -> (i32, i32) {
    %c0_i32 = arith.constant 0 : i32
    %c0_i32_0 = arith.constant 0 : i32
    %c0_i32_1 = arith.constant 0 : i32
    return %c0_i32, %c0_i32_0 : i32, i32
  }
  func.func @transform_3(%arg0: i32) -> (i32, i32, i32) {
    %c0_i32 = arith.constant 0 : i32
    %c0_i32_0 = arith.constant 0 : i32
    %c0_i32_1 = arith.constant 0 : i32
    %c0_i32_2 = arith.constant 0 : i32
    return %c0_i32, %c0_i32_0, %c0_i32_1 : i32, i32, i32
  }
  func.func @transform_4(%arg0: i32) -> (i32, i32, i32, i32) {
    %c0_i32 = arith.constant 0 : i32
    %c0_i32_0 = arith.constant 0 : i32
    %c0_i32_1 = arith.constant 0 : i32
    %c0_i32_2 = arith.constant 0 : i32
    return %arg0, %c0_i32, %c0_i32_0, %c0_i32_1 : i32, i32, i32, i32
  }
  func.func @transform_5(%arg0: i32) -> (i32, i32, i32) {
    %c0_i32 = arith.constant 0 : i32
    %c0_i32_0 = arith.constant 0 : i32
    %c0_i32_1 = arith.constant 0 : i32
    return %arg0, %c0_i32, %c0_i32_0 : i32, i32, i32
  }
  func.func @transform_6(%arg0: i32) -> (i32, i32, i32) {
    %c0_i32 = arith.constant 0 : i32
    %c0_i32_0 = arith.constant 0 : i32
    %c0_i32_1 = arith.constant 0 : i32
    return %arg0, %c0_i32, %c0_i32_0 : i32, i32, i32
  }
}

module attributes {stable_mosaic.version = 11 : i64} {
  func.func @_bn_add_relu_kernel(%arg0: i32, %arg1: memref<256x128xf32, #tpu.memory_space<vmem>>, %arg2: memref<1x128xf32, #tpu.memory_space<vmem>>, %arg3: memref<1x128xf32, #tpu.memory_space<vmem>>, %arg4: memref<256x128xf32, #tpu.memory_space<vmem>>, %arg5: memref<256x128xf32, #tpu.memory_space<vmem>>) attributes {dimension_semantics = [#tpu.dimension_semantics<parallel>], iteration_bounds = array<i64: 2>, scalar_prefetch = 0 : i64, scratch_operands = 0 : i64, tpu.core_type = #tpu.core_type<tc>, window_params = [{transform_indices = @transform_0, window_bounds = array<i64: 256, 128>}, {pipeline_mode = #tpu.pipeline_mode<synchronous>, transform_indices = @transform_1, window_bounds = array<i64: 1, 128>}, {pipeline_mode = #tpu.pipeline_mode<synchronous>, transform_indices = @transform_2, window_bounds = array<i64: 1, 128>}, {transform_indices = @transform_3, window_bounds = array<i64: 256, 128>}, {transform_indices = @transform_4, window_bounds = array<i64: 256, 128>}]} {
    %c0 = arith.constant 0 : index
    %c0_0 = arith.constant 0 : index
    %0 = vector.load %arg1[%c0, %c0_0] : memref<256x128xf32, #tpu.memory_space<vmem>>, vector<256x128xf32>
    %c0_1 = arith.constant 0 : index
    %c0_2 = arith.constant 0 : index
    %1 = vector.load %arg2[%c0_1, %c0_2] : memref<1x128xf32, #tpu.memory_space<vmem>>, vector<1x128xf32>
    %2 = vector.broadcast %1 : vector<1x128xf32> to vector<256x128xf32>
    %3 = arith.mulf %0, %2 : vector<256x128xf32>
    %c0_3 = arith.constant 0 : index
    %c0_4 = arith.constant 0 : index
    %4 = vector.load %arg3[%c0_3, %c0_4] : memref<1x128xf32, #tpu.memory_space<vmem>>, vector<1x128xf32>
    %5 = vector.broadcast %4 : vector<1x128xf32> to vector<256x128xf32>
    %6 = arith.addf %3, %5 : vector<256x128xf32>
    %c0_5 = arith.constant 0 : index
    %c0_6 = arith.constant 0 : index
    %7 = vector.load %arg4[%c0_5, %c0_6] : memref<256x128xf32, #tpu.memory_space<vmem>>, vector<256x128xf32>
    %8 = arith.addf %6, %7 : vector<256x128xf32>
    %cst = arith.constant 0.000000e+00 : f32
    %9 = vector.broadcast %cst : f32 to vector<256x128xf32>
    %10 = arith.maximumf %8, %9 : vector<256x128xf32>
    %c0_7 = arith.constant 0 : index
    %c0_8 = arith.constant 0 : index
    %11 = vector.load %arg5[%c0_7, %c0_8] : memref<256x128xf32, #tpu.memory_space<vmem>>, vector<256x128xf32>
    tpu.vector_store %arg5[%c0_7, %c0_8], %10 {strides = array<i32>} : memref<256x128xf32, #tpu.memory_space<vmem>>, vector<256x128xf32>,
    return
  }
  func.func @transform_0(%arg0: i32) -> (i32, i32) {
    %c0_i32 = arith.constant 0 : i32
    %c0_i32_0 = arith.constant 0 : i32
    return %arg0, %c0_i32 : i32, i32
  }
  func.func @transform_1(%arg0: i32) -> (i32, i32) {
    %c0_i32 = arith.constant 0 : i32
    %c0_i32_0 = arith.constant 0 : i32
    %c0_i32_1 = arith.constant 0 : i32
    return %c0_i32, %c0_i32_0 : i32, i32
  }
  func.func @transform_2(%arg0: i32) -> (i32, i32) {
    %c0_i32 = arith.constant 0 : i32
    %c0_i32_0 = arith.constant 0 : i32
    %c0_i32_1 = arith.constant 0 : i32
    return %c0_i32, %c0_i32_0 : i32, i32
  }
  func.func @transform_3(%arg0: i32) -> (i32, i32) {
    %c0_i32 = arith.constant 0 : i32
    %c0_i32_0 = arith.constant 0 : i32
    return %arg0, %c0_i32 : i32, i32
  }
  func.func @transform_4(%arg0: i32) -> (i32, i32) {
    %c0_i32 = arith.constant 0 : i32
    %c0_i32_0 = arith.constant 0 : i32
    return %arg0, %c0_i32 : i32, i32
  }
}

</mosaic_0001>

<bundles_post_ra>
// kernel: bottleneck_forward.4
= control target key start
LH: loop header
LB: loop body
LE: loop exit
PB: predicated region body
PF: predicated region fallthrough
CT: control target
= control target key end

     0   :  { %12 = vsyncpa [#allocation3], 0  ;;  %s1464_s0 = inlined_call_operand.hbm [shape: f32[512,128], index: 0, kind: input, shape index: {}]   ;;  %s1465_s1 = inlined_call_operand.vmem [shape: f32[1,128], index: 1, kind: input, shape index: {}]   ;;  %s1466_s2 = inlined_call_operand.vmem [shape: f32[1,128], index: 2, kind: input, shape index: {}]   ;;  %s1467_s3 = inlined_call_operand.vmem [shape: bf16[128,32], index: 3, kind: input, shape index: {}]   ;;  %s1468_s4 = inlined_call_operand.vmem [shape: f32[512,32], index: 4, kind: output, shape index: {0}]   ;;  %s1469_s5 = inlined_call_operand.vmem [shape: f32[2,1,32], index: 5, kind: output, shape index: {1}]   ;;  %s1470_s6 = inlined_call_operand.vmem [shape: f32[2,1,32], index: 6, kind: output, shape index: {2}]  }
   0x1   :  { %14 = vsyncpa [#allocation3 + $0x1], 0  ;;  %s1039_s21 = smov 0   ;;  %s1041_s1 = smov 0  }
   0x2   :  { %s1043_s22 = smov 0   ;;  %s1045_s2 = smov 0  }
   0x3 LB: > { %s1058_s23 = sadd.s32 4294967295, %s1000_s2   ;;  %s1061_s24 = sadd.s32 1, %s1000_s2   ;;  %s1000_s2 = sphi %s1045_s2, %s1477_s2   ;;  %s996_s22 = sphi %s1043_s22, %s1476_s22   ;;  %s992_s1 = sphi %s1041_s1, %s1475_s1   ;;  %s988_s21 = sphi %s1039_s21, %s1474_s21  }
   0x4   : > { %s24_s25 = ssub.s32 %s1000_s2, %s1061_s24  ;;  %s27_s26 = sadd.s32 1, %s996_s22 }
   0x5   : > { %p25_p0 = scmp.eq.s32.totalorder %s24_s25, 0  ;;  %p34_p1 = scmp.ne.s32.totalorder %s996_s22, %s992_s1 }
   0x6   : > { %p35_p2 = scmp.eq.s32.totalorder %s1000_s2, 0  ;;  %p40_p3 = scmp.ne.s32.totalorder %s992_s1, %s988_s21 }
   0x7   : > { %s1071_s27 = scalar_select %p25_p0, %s996_s22, %s27_s26  }
   0x8   : > { %p1073_p4 = por %p35_p2, %p34_p1  ;;  %p41_p5 = scmp.eq.s32.totalorder %s1058_s23, 0 }
   0x9   : > { %p901_p6 = scmp.lt.s32.totalorder %s1000_s2, 2  ;;  %s214_s30 = sand.u32 1, %s996_s22  }
   0xa   : > { %p1079_p7 = por %p41_p5, %p40_p3  ;;  %s821_s7 = sshll.u32 %s214_s30, 8 }
   0xb   : > { %s862_s8 = sshll.u32 %s1000_s2, 8  ;;  %s218_s12 = scalar_lea.vmem [#allocation2], %s821_s7 }
   0xc   : > { %s223_s11 = scalar_lea.hbm %s1464_s0, %s862_s8  ;;  %s226_s13 = sshll.u32 %s218_s12, 4  ;;  %s227_s13 = int_to_ptr.vmem [resolvable:$true] %s226_s13 }
   0xd   : > { %s224_s14 = sshll.u32 %s223_s11, 4  ;;  %p1090_p8 = pnand %p901_p6, %p1073_p4  ;;  %s225_s14 = int_to_ptr.hbm [resolvable:$true] %s224_s14 }
   0xe   : > { %p824_p9 = scmp.ge.s32.totalorder %s1000_s2, 1  ;;  %s215_s16 = scalar_lea.sflag [#allocation3], %s214_s30 }
   0xf   : > { %s936_s17 = sshra.s32 %s225_s14, 4  ;;  %p940_p11 = pneg %p1090_p8  ;;  %s937_s17 = int_to_ptr.hbm [resolvable:$true] %s936_s17 }
  0x10   : > { %s938_s18 = scalar_lea.hbm %s937_s17, 256  ;;  %s943_s21 = scalar_lea.hbm %s1464_s0, 512 }
  0x11   : > { %p939_p10 = scmp.ne.s32.totalorder %s937_s17, %s938_s18  ;;  %p944_p0 = scmp.lt.s32.totalorder %s937_s17, %s1464_s0 }
  0x12   : > { %p945_p1 = scmp.lt.s32.totalorder %s943_s21, %s938_s18 }
  0x13   : > { %p941_p12 = pnand %p940_p11, %p939_p10 }
  0x14   : > { %p946_p2 = por %p945_p1, %p944_p0 }
  0x15   : > { %p942_p13 = pneg %p941_p12 }
  0x17   : > { %p947_p3 = pnand %p946_p2, %p942_p13 }
  0x19   : > { %950 = shalt.err (!%p947_p3)
}
  0x1a   : > { %s1002_s28 = smov 128   ;;  %s1003_s30 = smov 8  }
  0x1b   : > { %900 = dma.hbm_to_vmem [thread:$0]  (!%p1090_p8), %s225_s14, 4096, %s227_s13, %s215_s16, %s1002_s28, %s1002_s28, %s1003_s30  }
  0x1c   : > { %p234_p4 = scmp.lt.s32.totalorder %s1000_s2, 3 }
  0x1e   : > { %p235_p5 = pnand %p824_p9, %p234_p4 }
  0x1f   : > { %s240_s7 = sand.u32 (!%p235_p5), 1, %s992_s1  }
  0x20   : > { %238 = sbr.rel (%p235_p5) target bundleno = 318 (0x13e), region = 36  ;;  %s825_s8 = sshll.u32 (!%p235_p5), %s240_s7, 8 }
  0x21   : > { %s241_s9 = scalar_lea.sflag (!%p235_p5), [#allocation3], %s240_s7  ;;  %s1109_s10 = scalar_lea.vmem (!%p235_p5), [#allocation2], %s825_s8 }
  0x25   : > { %983 = dma.done.wait (%p1079_p7), %s241_s9, 4096  }
  0x26   : > { %985 = vsyncadd (%p1079_p7), %s241_s9, 4294963200  ;;  %v870_v0 = vld [vmem:[%s1467_s3 + $0x38] sm:$0xff]  ;;  %v869_v1 = vld [vmem:[%s1467_s3 + $0x30] sm:$0xff]  ;;  %s826_s30 = sshll.u32 %s1058_s23, 5  ;;  %vm494_vm0 = vcmask 261120   ;;  %p287_p7 = scmp.lt.s32.totalorder %s1058_s23, 1 }
  0x27   : > { %405 = vmatpush.bf16.msra.mxu0 %v870_v0  ;;  %871 = vmatpush.bf16.msra.mxu1 %v870_v0  ;;  %v868_v2 = vld [vmem:[%s1467_s3 + $0x28] sm:$0xff]  ;;  %v867_v3 = vld [vmem:[%s1467_s3 + $0x20] sm:$0xff]  ;;  %v866_v4 = vld [vmem:[%s1467_s3 + $0x18] sm:$0xff]  ;;  %p282_p6 = scmp.lt.s32.totalorder %s826_s30, 63  ;;  %vm596_vm1 = vcmask 253952  }
  0x28   : > { %872 = vmatpush.bf16.msra.mxu2 %v870_v0  ;;  %873 = vmatpush.bf16.msra.mxu3 %v870_v0  ;;  %v865_v5 = vld [vmem:[%s1467_s3 + $0x10] sm:$0xff]  ;;  %v864_v6 = vld [vmem:[%s1467_s3 + $0x8] sm:$0xff]  ;;  %v863_v7 = vld [vmem:[%s1467_s3] sm:$0xff]  ;;  %s1481_s23 = smov (!%p287_p7, %s1058_s23), 1 }
  0x29   : > { %v293_v8 = vld [vmem:[%s1109_s10] sm:$0xff]  ;;  %v294_v9 = vld [vmem:[%s1109_s10 + $0x8] sm:$0xff]  ;;  %v295_v20 = vld [vmem:[%s1109_s10 + $0x10] sm:$0xff]  ;;  %s1479_s30 = smov (!%p282_p6, %s826_s30), 63  ;;  %s289_s2 = scalar_lea.vmem %s1469_s5, %s1481_s23 }
  0x2a   : > { %v301_v10 = vld [vmem:[%s1109_s10 + $0x40] sm:$0xff]  ;;  %v302_v11 = vld [vmem:[%s1109_s10 + $0x48] sm:$0xff]  ;;  %v325_v14 = vpack.c.bf16 %v294_v9, %v293_v8  ;;  %v296_v21 = vld [vmem:[%s1109_s10 + $0x18] sm:$0xff]  ;;  %s827_s7 = sshll.u32 %s1479_s30, 3  ;;  %s292_s15 = scalar_lea.vmem %s1470_s6, %s1481_s23 }
  0x2b   : > { %406 = vmatpush.bf16.msra.mxu0 %v869_v1  ;;  %874 = vmatpush.bf16.msra.mxu1 %v869_v1  ;;  %v309_v12 = vld [vmem:[%s1109_s10 + $0x80] sm:$0xff]  ;;  %v310_v13 = vld [vmem:[%s1109_s10 + $0x88] sm:$0xff]  ;;  %v329_v15 = vpack.c.bf16 %v302_v11, %v301_v10  ;;  %v303_v22 = vld [vmem:[%s1109_s10 + $0x50] sm:$0xff]  ;;  %v326_v26 = vpack.c.bf16 %v296_v21, %v295_v20  ;;  %s1175_s11 = scalar_lea.vmem %s1468_s4, %s827_s7 }
  0x2c   : > { %875 = vmatpush.bf16.msra.mxu2 %v869_v1  ;;  %876 = vmatpush.bf16.msra.mxu3 %v869_v1  ;;  %v333_v16 = vpack.c.bf16 %v310_v13, %v309_v12  ;;  %v317_v17 = vld [vmem:[%s1109_s10 + $0xc0] sm:$0xff]  ;;  %v318_v18 = vld [vmem:[%s1109_s10 + $0xc8] sm:$0xff]  ;;  %v304_v23 = vld [vmem:[%s1109_s10 + $0x58] sm:$0xff] }
  0x2d   : > { %v337_v19 = vpack.c.bf16 %v318_v18, %v317_v17  ;;  %v311_v24 = vld [vmem:[%s1109_s10 + $0x90] sm:$0xff]  ;;  %v312_v25 = vld [vmem:[%s1109_s10 + $0x98] sm:$0xff]  ;;  %v330_v27 = vpack.c.bf16 %v304_v23, %v303_v22  ;;  %v297_v32 = vld [vmem:[%s1109_s10 + $0x20] sm:$0xff] }
  0x2e   : > { %v334_v28 = vpack.c.bf16 %v312_v25, %v311_v24  ;;  %v319_v29 = vld [vmem:[%s1109_s10 + $0xd0] sm:$0xff]  ;;  %v320_v30 = vld [vmem:[%s1109_s10 + $0xd8] sm:$0xff]  ;;  %v298_v33 = vld [vmem:[%s1109_s10 + $0x28] sm:$0xff] }
  0x2f   : > { %407 = vmatpush.bf16.msra.mxu0 %v868_v2  ;;  %877 = vmatpush.bf16.msra.mxu1 %v868_v2  ;;  %v338_v31 = vpack.c.bf16 %v320_v30, %v319_v29  ;;  %v305_v34 = vld [vmem:[%s1109_s10 + $0x60] sm:$0xff]  ;;  %v306_v35 = vld [vmem:[%s1109_s10 + $0x68] sm:$0xff]  ;;  %v327_v38 = vpack.c.bf16 %v298_v33, %v297_v32  ;;  %v299_v44 = vld [vmem:[%s1109_s10 + $0x30] sm:$0xff] }
  0x30   : > { %878 = vmatpush.bf16.msra.mxu2 %v868_v2  ;;  %879 = vmatpush.bf16.msra.mxu3 %v868_v2  ;;  %v313_v36 = vld [vmem:[%s1109_s10 + $0xa0] sm:$0xff]  ;;  %v314_v37 = vld [vmem:[%s1109_s10 + $0xa8] sm:$0xff]  ;;  %v331_v39 = vpack.c.bf16 %v306_v35, %v305_v34  ;;  %v300_v45 = vld [vmem:[%s1109_s10 + $0x38] sm:$0xff] }
  0x31   : > { %v321_v40 = vld [vmem:[%s1109_s10 + $0xe0] sm:$0xff]  ;;  %v322_v41 = vld [vmem:[%s1109_s10 + $0xe8] sm:$0xff]  ;;  %v335_v42 = vpack.c.bf16 %v314_v37, %v313_v36  ;;  %v307_v46 = vld [vmem:[%s1109_s10 + $0x70] sm:$0xff]  ;;  %v328_v50 = vpack.c.bf16 %v300_v45, %v299_v44 }
  0x32   : > { %v339_v43 = vpack.c.bf16 %v322_v41, %v321_v40  ;;  %v308_v47 = vld [vmem:[%s1109_s10 + $0x78] sm:$0xff]  ;;  %v315_v48 = vld [vmem:[%s1109_s10 + $0xb0] sm:$0xff] }
  0x33   : > { %408 = vmatpush.bf16.msra.mxu0 %v867_v3  ;;  %880 = vmatpush.bf16.msra.mxu1 %v867_v3  ;;  %v316_v49 = vld [vmem:[%s1109_s10 + $0xb8] sm:$0xff]  ;;  %v332_v51 = vpack.c.bf16 %v308_v47, %v307_v46  ;;  %v323_v52 = vld [vmem:[%s1109_s10 + $0xf0] sm:$0xff] }
  0x34   : > { %881 = vmatpush.bf16.msra.mxu2 %v867_v3  ;;  %882 = vmatpush.bf16.msra.mxu3 %v867_v3  ;;  %v324_v53 = vld [vmem:[%s1109_s10 + $0xf8] sm:$0xff]  ;;  %v336_v54 = vpack.c.bf16 %v316_v49, %v315_v48 }
  0x35   : > { %v340_v55 = vpack.c.bf16 %v324_v53, %v323_v52 }
  0x37   : > { %409 = vmatpush.bf16.msra.mxu0 %v866_v4  ;;  %883 = vmatpush.bf16.msra.mxu1 %v866_v4 }
  0x38   : > { %884 = vmatpush.bf16.msra.mxu2 %v866_v4  ;;  %885 = vmatpush.bf16.msra.mxu3 %v866_v4 }
  0x3b   : > { %410 = vmatpush.bf16.msra.mxu0 %v865_v5  ;;  %886 = vmatpush.bf16.msra.mxu1 %v865_v5 }
  0x3c   : > { %887 = vmatpush.bf16.msra.mxu2 %v865_v5  ;;  %888 = vmatpush.bf16.msra.mxu3 %v865_v5 }
  0x3f   : > { %411 = vmatpush.bf16.msra.mxu0 %v864_v6  ;;  %889 = vmatpush.bf16.msra.mxu1 %v864_v6 }
  0x40   : > { %890 = vmatpush.bf16.msra.mxu2 %v864_v6  ;;  %891 = vmatpush.bf16.msra.mxu3 %v864_v6 }
  0x43   : > { %412 = vmatpush.bf16.msra.mxu0 %v863_v7  ;;  %892 = vmatpush.bf16.msra.mxu1 %v863_v7 }
  0x44   : > { %893 = vmatpush.bf16.msra.mxu2 %v863_v7  ;;  %894 = vmatpush.bf16.msra.mxu3 %v863_v7 }
  0x46   : > { %413 = vmatmul.bf16.vlgmr.msra.gmra.mxu0 %v325_v14  ;;  %433 = vmatmul.bf16.vlgmr.msra.gmra.mxu1 %v329_v15 }
  0x47   : > { %453 = vmatmul.bf16.vlgmr.msra.gmra.mxu2 %v333_v16  ;;  %473 = vmatmul.bf16.vlgmr.msra.gmra.mxu3 %v337_v19 }
  0x56   : > { %418 = vmatmul.bf16.gmra.mxu0 %v326_v26  ;;  %438 = vmatmul.bf16.gmra.mxu1 %v330_v27 }
  0x57   : > { %458 = vmatmul.bf16.gmra.mxu2 %v334_v28  ;;  %478 = vmatmul.bf16.gmra.mxu3 %v338_v31 }
  0x66   : > { %423 = vmatmul.bf16.gmra.mxu0 %v327_v38  ;;  %443 = vmatmul.bf16.gmra.mxu1 %v331_v39 }
  0x67   : > { %463 = vmatmul.bf16.gmra.mxu2 %v335_v42  ;;  %483 = vmatmul.bf16.gmra.mxu3 %v339_v43 }
  0x76   : > { %428 = vmatmul.bf16.gmra.mxu0 %v328_v50  ;;  %448 = vmatmul.bf16.gmra.mxu1 %v332_v51 }
  0x77   : > { %468 = vmatmul.bf16.gmra.mxu2 %v336_v54  ;;  %488 = vmatmul.bf16.gmra.mxu3 %v340_v55 }
  0xc3   : > { %v414_v56 = vpop.f32.mrf.mxu0  ;;  %v1177_v57 = vpop.f32.mrf.mxu1 }
  0xc4   : > { %495 = vst.msk [vmem:[%s1175_s11] sm:$0xff] %vm494_vm0, %v414_v56  ;;  %v598_v15 = vmul.f32 %v414_v56, %v414_v56  ;;  %v527_v18 = vsel %vm494_vm0, %v414_v56, 0.0  ;;  %v606_v53 = vmul.f32 %v1177_v57, %v1177_v57 }
  0xc5   : > { %503 = vst.msk [vmem:[%s1175_s11 + $0x40] sm:$0xff] %vm494_vm0, %v1177_v57 }
  0xc6   : > { %v630_v23 = vsel %vm494_vm0, %v598_v15, 0.0 }
  0xca   : > { %v1184_v58 = vpop.f32.mrf.mxu2  ;;  %v1193_v61 = vpop.f32.mrf.mxu3 }
  0xcb   : > { %v416_v59 = vpop.f32.mrf.mxu0  ;;  %v1186_v60 = vpop.f32.mrf.mxu1  ;;  %511 = vst.msk [vmem:[%s1175_s11 + $0x80] sm:$0xff] %vm494_vm0, %v1184_v58 }
  0xcc   : > { %496 = vst.msk [vmem:[%s1175_s11 + $0x8] sm:$0xff] %vm494_vm0, %v416_v59  ;;  %v599_v13 = vmul.f32 %v416_v59, %v416_v59  ;;  %v528_v16 = vsel %vm494_vm0, %v416_v59, 0.0 }
  0xcd   : > { %504 = vst.msk [vmem:[%s1175_s11 + $0x48] sm:$0xff] %vm494_vm0, %v1186_v60  ;;  %v529_v22 = vadd.f32 %v528_v16, %v527_v18  ;;  %v645_v16 = vsel %vm494_vm0, %v606_v53, 0.0 }
  0xce   : > { %519 = vst.msk [vmem:[%s1175_s11 + $0xc0] sm:$0xff] %vm494_vm0, %v1193_v61  ;;  %v631_v19 = vsel %vm494_vm0, %v599_v13, 0.0 }
  0xcf   : > { %v632_v28 = vadd.f32 %v631_v19, %v630_v23 }
  0xd2   : > { %v1201_v62 = vpop.f32.mrf.mxu2  ;;  %v1210_v1 = vpop.f32.mrf.mxu3 }
  0xd3   : > { %v419_v63 = vpop.f32.mrf.mxu0  ;;  %v1203_v0 = vpop.f32.mrf.mxu1  ;;  %512 = vst.msk [vmem:[%s1175_s11 + $0x88] sm:$0xff] %vm494_vm0, %v1201_v62  ;;  %v615_v53 = vmul.f32 %v1201_v62, %v1201_v62 }
  0xd4   : > { %497 = vst.msk [vmem:[%s1175_s11 + $0x10] sm:$0xff] %vm494_vm0, %v419_v63  ;;  %v600_v17 = vmul.f32 %v419_v63, %v419_v63  ;;  %v530_v20 = vsel %vm494_vm0, %v419_v63, 0.0  ;;  %v608_v18 = vmul.f32 %v1203_v0, %v1203_v0 }
  0xd5   : > { %505 = vst.msk [vmem:[%s1175_s11 + $0x50] sm:$0xff] %vm494_vm0, %v1203_v0  ;;  %v531_v29 = vadd.f32 %v530_v20, %v529_v22 }
  0xd6   : > { %520 = vst.msk [vmem:[%s1175_s11 + $0xc8] sm:$0xff] %vm494_vm0, %v1210_v1  ;;  %v633_v24 = vsel %vm494_vm0, %v600_v17, 0.0  ;;  %v544_v17 = vsel %vm494_vm0, %v1186_v60, 0.0 }
  0xd7   : > { %v634_v36 = vadd.f32 %v633_v24, %v632_v28 }
  0xda   : > { %v1218_v2 = vpop.f32.mrf.mxu2  ;;  %v1227_v5 = vpop.f32.mrf.mxu3 }
  0xdb   : > { %v421_v3 = vpop.f32.mrf.mxu0  ;;  %v1220_v4 = vpop.f32.mrf.mxu1  ;;  %513 = vst.msk [vmem:[%s1175_s11 + $0x90] sm:$0xff] %vm494_vm0, %v1218_v2 }
  0xdc   : > { %498 = vst.msk [vmem:[%s1175_s11 + $0x18] sm:$0xff] %vm494_vm0, %v421_v3  ;;  %v601_v21 = vmul.f32 %v421_v3, %v421_v3  ;;  %v532_v25 = vsel %vm494_vm0, %v421_v3, 0.0  ;;  %v542_v3 = vsel %vm494_vm0, %v1177_v57, 0.0  ;;  %v609_v22 = vmul.f32 %v1220_v4, %v1220_v4 }
  0xdd   : > { %506 = vst.msk [vmem:[%s1175_s11 + $0x58] sm:$0xff] %vm494_vm0, %v1220_v4  ;;  %v533_v37 = vadd.f32 %v532_v25, %v531_v29 }
  0xde   : > { %521 = vst.msk [vmem:[%s1175_s11 + $0xd0] sm:$0xff] %vm494_vm0, %v1227_v5  ;;  %v635_v32 = vsel %vm494_vm0, %v601_v21, 0.0  ;;  %v546_v21 = vsel %vm494_vm0, %v1203_v0, 0.0 }
  0xdf   : > { %v636_v41 = vadd.f32 %v635_v32, %v634_v36  ;;  %v651_v32 = vsel %vm494_vm0, %v609_v22, 0.0 }
  0xe2   : > { %v1235_v6 = vpop.f32.mrf.mxu2  ;;  %v1244_v9 = vpop.f32.mrf.mxu3 }
  0xe3   : > { %v424_v7 = vpop.f32.mrf.mxu0  ;;  %v1237_v8 = vpop.f32.mrf.mxu1  ;;  %514 = vst.msk [vmem:[%s1175_s11 + $0x98] sm:$0xff] %vm494_vm0, %v1235_v6 }
  0xe4   : > { %499 = vst.msk [vmem:[%s1175_s11 + $0x20] sm:$0xff] %vm494_vm0, %v424_v7  ;;  %v602_v26 = vmul.f32 %v424_v7, %v424_v7  ;;  %v534_v33 = vsel %vm494_vm0, %v424_v7, 0.0  ;;  %v607_v7 = vmul.f32 %v1186_v60, %v1186_v60  ;;  %v649_v60 = vsel %vm494_vm0, %v608_v18, 0.0 }
  0xe5   : > { %507 = vst.msk [vmem:[%s1175_s11 + $0x60] sm:$0xff] %vm494_vm0, %v1237_v8  ;;  %v535_v42 = vadd.f32 %v534_v33, %v533_v37  ;;  %v610_v28 = vmul.f32 %v1237_v8, %v1237_v8  ;;  %v550_v33 = vsel %vm494_vm0, %v1237_v8, 0.0 }
  0xe6   : > { %522 = vst.msk [vmem:[%s1175_s11 + $0xd8] sm:$0xff] %vm494_vm0, %v1244_v9  ;;  %v637_v38 = vsel %vm494_vm0, %v602_v26, 0.0  ;;  %v647_v20 = vsel %vm494_vm0, %v607_v7, 0.0  ;;  %v548_v26 = vsel %vm494_vm0, %v1220_v4, 0.0 }
  0xe7   : > { %v638_v45 = vadd.f32 %v637_v38, %v636_v41  ;;  %v653_v37 = vsel %vm494_vm0, %v610_v28, 0.0 }
  0xea   : > { %v1252_v10 = vpop.f32.mrf.mxu2  ;;  %v1261_v14 = vpop.f32.mrf.mxu3 }
  0xeb   : > { %v426_v11 = vpop.f32.mrf.mxu0  ;;  %v1254_v12 = vpop.f32.mrf.mxu1  ;;  %515 = vst.msk [vmem:[%s1175_s11 + $0xa0] sm:$0xff] %vm494_vm0, %v1252_v10  ;;  %v618_v18 = vmul.f32 %v1252_v10, %v1252_v10 }
  0xec   : > { %500 = vst.msk [vmem:[%s1175_s11 + $0x28] sm:$0xff] %vm494_vm0, %v426_v11  ;;  %v603_v34 = vmul.f32 %v426_v11, %v426_v11  ;;  %v536_v39 = vsel %vm494_vm0, %v426_v11, 0.0  ;;  %v552_v38 = vsel %vm494_vm0, %v1254_v12, 0.0 }
  0xed   : > { %508 = vst.msk [vmem:[%s1175_s11 + $0x68] sm:$0xff] %vm494_vm0, %v1254_v12  ;;  %v537_v46 = vadd.f32 %v536_v39, %v535_v42 }
  0xee   : > { %523 = vst.msk [vmem:[%s1175_s11 + $0xe0] sm:$0xff] %vm494_vm0, %v1261_v14  ;;  %v639_v43 = vsel %vm494_vm0, %v603_v34, 0.0  ;;  %v611_v34 = vmul.f32 %v1254_v12, %v1254_v12 }
  0xef   : > { %v640_v49 = vadd.f32 %v639_v43, %v638_v45 }
  0xf0   : > { %v655_v42 = vsel %vm494_vm0, %v611_v34, 0.0  ;;  %v622_v34 = vmul.f32 %v1193_v61, %v1193_v61 }
  0xf2   : > { %v1276_v27 = vpop.f32.mrf.mxu2  ;;  %v1287_v35 = vpop.f32.mrf.mxu3 }
  0xf3   : > { %v429_v30 = vpop.f32.mrf.mxu0  ;;  %v1278_v31 = vpop.f32.mrf.mxu1  ;;  %516 = vst.msk [vmem:[%s1175_s11 + $0xa8] sm:$0xff] %vm494_vm0, %v1276_v27 }
  0xf4   : > { %501 = vst.msk [vmem:[%s1175_s11 + $0x30] sm:$0xff] %vm494_vm0, %v429_v30  ;;  %v604_v40 = vmul.f32 %v429_v30, %v429_v30  ;;  %v538_v44 = vsel %vm494_vm0, %v429_v30, 0.0  ;;  %v612_v39 = vmul.f32 %v1278_v31, %v1278_v31  ;;  %v554_v8 = vsel %vm494_vm0, %v1278_v31, 0.0 }
  0xf5   : > { %509 = vst.msk [vmem:[%s1175_s11 + $0x70] sm:$0xff] %vm494_vm0, %v1278_v31  ;;  %v539_v50 = vadd.f32 %v538_v44, %v537_v46  ;;  %v614_v46 = vmul.f32 %v1184_v58, %v1184_v58 }
  0xf6   : > { %524 = vst.msk [vmem:[%s1175_s11 + $0xe8] sm:$0xff] %vm494_vm0, %v1287_v35  ;;  %v641_v47 = vsel %vm494_vm0, %v604_v40, 0.0 }
  0xf7   : > { %v642_v59 = vadd.f32 %v641_v47, %v640_v49  ;;  %v657_v47 = vsel %vm494_vm0, %v612_v39, 0.0 }
  0xfa   : > { %v1300_v48 = vpop.f32.mrf.mxu2  ;;  %v1310_v56 = vpop.f32.mrf.mxu3 }
  0xfb   : > { %v431_v51 = vpop.f32.mrf.mxu0  ;;  %v451_v52 = vpop.f32.mrf.mxu1  ;;  %517 = vst.msk [vmem:[%s1175_s11 + $0xb0] sm:$0xff] %vm494_vm0, %v1300_v48 }
  0xfc   : > { %502 = vst.msk [vmem:[%s1175_s11 + $0x38] sm:$0xff] %vm494_vm0, %v431_v51  ;;  %v540_v54 = vsel %vm494_vm0, %v431_v51, 0.0  ;;  %v605_v55 = vmul.f32 %v431_v51, %v431_v51  ;;  %v613_v43 = vmul.f32 %v451_v52, %v451_v52  ;;  %v556_v12 = vsel %vm494_vm0, %v451_v52, 0.0 }
  0xfd   : > { %v541_v63 = vadd.f32 %v540_v54, %v539_v50  ;;  %510 = vst.msk [vmem:[%s1175_s11 + $0x78] sm:$0xff] %vm494_vm0, %v451_v52  ;;  %v558_v51 = vsel %vm494_vm0, %v1184_v58, 0.0  ;;  %v616_v52 = vmul.f32 %v1218_v2, %v1218_v2  ;;  %v562_v58 = vsel %vm494_vm0, %v1218_v2, 0.0 }
  0xfe   : > { %v643_v11 = vsel %vm494_vm0, %v605_v55, 0.0  ;;  %525 = vst.msk [vmem:[%s1175_s11 + $0xf0] sm:$0xff] %vm494_vm0, %v1310_v56  ;;  %v659_v31 = vsel %vm494_vm0, %v613_v43, 0.0  ;;  %v566_v2 = vsel %vm494_vm0, %v1252_v10, 0.0  ;;  %v570_v10 = vsel %vm494_vm0, %v1300_v48, 0.0 }
  0xff   : > { %v543_v13 = vadd.f32 %v542_v3, %v541_v63  ;;  %v644_v15 = vadd.f32 %v643_v11, %v642_v59  ;;  %v661_v59 = vsel %vm494_vm0, %v614_v46, 0.0  ;;  %v560_v63 = vsel %vm494_vm0, %v1201_v62, 0.0 }
 0x100   : > { %v663_v11 = vsel %vm494_vm0, %v615_v53, 0.0  ;;  %v564_v62 = vsel %vm494_vm0, %v1235_v6, 0.0  ;;  %v625_v46 = vmul.f32 %v1244_v9, %v1244_v9 }
 0x101   : > { %v545_v57 = vadd.f32 %v544_v17, %v543_v13  ;;  %v646_v19 = vadd.f32 %v645_v16, %v644_v15  ;;  %v617_v13 = vmul.f32 %v1235_v6, %v1235_v6  ;;  %v665_v17 = vsel %vm494_vm0, %v616_v52, 0.0 }
 0x102   : > { %v1332_v23 = vpop.f32.mrf.mxu2  ;;  %v1342_v29 = vpop.f32.mrf.mxu3  ;;  %v568_v6 = vsel %vm494_vm0, %v1276_v27, 0.0  ;;  %v628_v52 = vmul.f32 %v1310_v56, %v1310_v56 }
 0x103   : > { %v547_v24 = vadd.f32 %v546_v21, %v545_v57  ;;  %v648_v25 = vadd.f32 %v647_v20, %v646_v19  ;;  %518 = vst.msk [vmem:[%s1175_s11 + $0xb8] sm:$0xff] %vm494_vm0, %v1332_v23  ;;  %v667_v20 = vsel %vm494_vm0, %v617_v13, 0.0  ;;  %v619_v21 = vmul.f32 %v1276_v27, %v1276_v27 }
 0x104   : > { %526 = vst.msk [vmem:[%s1175_s11 + $0xf8] sm:$0xff] %vm494_vm0, %v1342_v29 }
 0x105   : > { %v650_v0 = vadd.f32 %v649_v60, %v648_v25  ;;  %v549_v30 = vadd.f32 %v548_v26, %v547_v24  ;;  %v669_v25 = vsel %vm494_vm0, %v618_v18, 0.0  ;;  %v620_v60 = vmul.f32 %v1300_v48, %v1300_v48 }
 0x106   : > { %v623_v48 = vmul.f32 %v1210_v1, %v1210_v1 }
 0x107   : > { %v551_v36 = vadd.f32 %v550_v33, %v549_v30  ;;  %v652_v4 = vadd.f32 %v651_v32, %v650_v0  ;;  %v671_v0 = vsel %vm494_vm0, %v619_v21, 0.0  ;;  %v621_v30 = vmul.f32 %v1332_v23, %v1332_v23 }
 0x108   : > { %v673_v27 = vsel %vm494_vm0, %v620_v60, 0.0 }
 0x109   : > { %v553_v40 = vadd.f32 %v552_v38, %v551_v36  ;;  %v654_v41 = vadd.f32 %v653_v37, %v652_v4  ;;  %v572_v36 = vsel %vm494_vm0, %v1332_v23, 0.0  ;;  %v574_v38 = vsel %vm494_vm0, %v1193_v61, 0.0 }
 0x10a   : > { %v675_v39 = vsel %vm494_vm0, %v621_v30, 0.0  ;;  %v624_v23 = vmul.f32 %v1227_v5, %v1227_v5  ;;  %v578_v61 = vsel %vm494_vm0, %v1227_v5, 0.0  ;;  %v582_v5 = vsel %vm494_vm0, %v1261_v14, 0.0 }
 0x10b   : > { %v555_v44 = vadd.f32 %v554_v8, %v553_v40  ;;  %v656_v45 = vadd.f32 %v655_v42, %v654_v41  ;;  %v677_v42 = vsel %vm494_vm0, %v622_v34, 0.0  ;;  %v576_v8 = vsel %vm494_vm0, %v1210_v1, 0.0 }
 0x10c   : > { %v580_v1 = vsel %vm494_vm0, %v1244_v9, 0.0  ;;  %v584_v9 = vsel %vm494_vm0, %v1287_v35, 0.0 }
 0x10d   : > { %v658_v49 = vadd.f32 %v657_v47, %v656_v45  ;;  %v557_v50 = vadd.f32 %v556_v12, %v555_v44  ;;  %v679_v45 = vsel %vm494_vm0, %v623_v48, 0.0 }
 0x10f   : > { %v559_v54 = vadd.f32 %v558_v51, %v557_v50  ;;  %v660_v55 = vadd.f32 %v659_v31, %v658_v49  ;;  %v681_v49 = vsel %vm494_vm0, %v624_v23, 0.0  ;;  %v626_v50 = vmul.f32 %v1261_v14, %v1261_v14 }
 0x110   : > { %v683_v31 = vsel %vm494_vm0, %v625_v46, 0.0  ;;  %v586_v14 = vsel %vm494_vm0, %v1310_v56, 0.0 }
 0x111   : > { %v561_v3 = vadd.f32 %v560_v63, %v559_v54  ;;  %v662_v7 = vadd.f32 %v661_v59, %v660_v55  ;;  %v627_v54 = vmul.f32 %v1287_v35, %v1287_v35  ;;  %v685_v63 = vsel %vm494_vm0, %v626_v50, 0.0 }
 0x112   : > { %v588_v35 = vsel %vm494_vm0, %v1342_v29, 0.0 }
 0x113   : > { %v563_v15 = vadd.f32 %v562_v58, %v561_v3  ;;  %v664_v16 = vadd.f32 %v663_v11, %v662_v7  ;;  %v687_v11 = vsel %vm494_vm0, %v627_v54, 0.0  ;;  %v629_v58 = vmul.f32 %v1342_v29, %v1342_v29 }
 0x115   : > { %v666_v57 = vadd.f32 %v665_v17, %v664_v16  ;;  %v565_v19 = vadd.f32 %v564_v62, %v563_v15  ;;  %v689_v16 = vsel %vm494_vm0, %v628_v52, 0.0  ;;  %v691_v18 = vsel %vm494_vm0, %v629_v58, 0.0 }
 0x117   : > { %v567_v22 = vadd.f32 %v566_v2, %v565_v19  ;;  %v668_v24 = vadd.f32 %v667_v20, %v666_v57 }
 0x119   : > { %v569_v26 = vadd.f32 %v568_v6, %v567_v22  ;;  %v670_v28 = vadd.f32 %v669_v25, %v668_v24 }
 0x11b   : > { %v672_v32 = vadd.f32 %v671_v0, %v670_v28  ;;  %v571_v33 = vadd.f32 %v570_v10, %v569_v26 }
 0x11d   : > { %v674_v4 = vadd.f32 %v673_v27, %v672_v32  ;;  %v573_v37 = vadd.f32 %v572_v36, %v571_v33 }
 0x11f   : > { %v575_v40 = vadd.f32 %v574_v38, %v573_v37  ;;  %v676_v41 = vadd.f32 %v675_v39, %v674_v4 }
 0x121   : > { %v577_v43 = vadd.f32 %v576_v8, %v575_v40  ;;  %v678_v44 = vadd.f32 %v677_v42, %v676_v41 }
 0x123   : > { %v579_v47 = vadd.f32 %v578_v61, %v577_v43  ;;  %v680_v12 = vadd.f32 %v679_v45, %v678_v44 }
 0x125   : > { %v682_v51 = vadd.f32 %v681_v49, %v680_v12  ;;  %v581_v53 = vadd.f32 %v580_v1, %v579_v47 }
 0x127   : > { %v583_v55 = vadd.f32 %v582_v5, %v581_v53  ;;  %v684_v59 = vadd.f32 %v683_v31, %v682_v51 }
 0x129   : > { %v585_v3 = vadd.f32 %v584_v9, %v583_v55  ;;  %v686_v7 = vadd.f32 %v685_v63, %v684_v59 }
 0x12b   : > { %v688_v13 = vadd.f32 %v687_v11, %v686_v7  ;;  %v587_v15 = vadd.f32 %v586_v14, %v585_v3 }
 0x12d   : > { %v690_v17 = vadd.f32 %v689_v16, %v688_v13  ;;  %v589_v62 = vadd.f32 %v588_v35, %v587_v15 }
 0x12f   : > { %v590_v57 = vrot.slane %v589_v62, 4  ;;  %v692_v19 = vadd.f32 %v691_v18, %v690_v17 }
 0x131   : > { %v591_v20 = vadd.f32 %v590_v57, %v589_v62  ;;  %v693_v56 = vrot.slane %v692_v19, 4 }
 0x133   : > { %v592_v2 = vrot.slane %v591_v20, 2  ;;  %v694_v21 = vadd.f32 %v693_v56, %v692_v19 }
 0x135   : > { %v593_v22 = vadd.f32 %v592_v2, %v591_v20  ;;  %v695_v24 = vrot.slane %v694_v21, 2 }
 0x137   : > { %v594_v25 = vrot.slane %v593_v22, 1  ;;  %v696_v6 = vadd.f32 %v695_v24, %v694_v21 }
 0x139   : > { %v595_v29 = vadd.f32 %v594_v25, %v593_v22  ;;  %v697_v60 = vrot.slane %v696_v6, 1 }
 0x13b   : > { %597 = vst.msk [vmem:[%s289_s2] sm:$0x1] %vm596_vm1, %v595_v29  ;;  %v698_v26 = vadd.f32 %v697_v60, %v696_v6 }
 0x13d   : > { %699 = vst.msk [vmem:[%s292_s15] sm:$0x1] %vm596_vm1, %v698_v26 }
 0x13e PF: > { %p17_p8 = scmp.ge.s32.totalorder %s1061_s24, 4   ;;  %s1474_s21 = smov %s992_s1 }
 0x13f   : > { %s1475_s1 = smov %s996_s22  ;;  %s1476_s22 = smov %s1071_s27 }
 0x140   : > { %s1477_s2 = smov %s1061_s24  ;;  %19 = sbr.rel (!%p17_p8) target bundleno = 3 (0x3), region = 100 }
 0x145   :  { %746 = vsyncpa [#allocation3], 1 }
 0x146   :  { %748 = vsyncpa [#allocation3 + $0x1], 1 }

// kernel: bottleneck_forward.7
= control target key start
LH: loop header
LB: loop body
LE: loop exit
PB: predicated region body
PF: predicated region fallthrough
CT: control target
= control target key end

     0   :  { %9 = vsyncpa [#allocation3], 0  ;;  %s963_s0 = inlined_call_operand.vmem [shape: f32[512,128], index: 0, kind: input, shape index: {}]   ;;  %s964_s1 = inlined_call_operand.vmem [shape: f32[1,128], index: 1, kind: input, shape index: {}]   ;;  %s965_s2 = inlined_call_operand.vmem [shape: f32[1,128], index: 2, kind: input, shape index: {}]   ;;  %s966_s3 = inlined_call_operand.vmem [shape: f32[512,128], index: 3, kind: input, shape index: {}]   ;;  %s967_s4 = inlined_call_operand.hbm [shape: f32[512,128], index: 4, kind: output, shape index: {}]  }
   0x1   :  { %11 = vsyncpa [#allocation3 + $0x1], 0  ;;  %s692_s15 = smov 0   ;;  %s694_s16 = smov 0  }
   0x2   :  { %s696_s17 = smov 0   ;;  %s698_s18 = smov 0  }
   0x3 LB: > { %s713_s19 = sadd.s32 4294967295, %s663_s18   ;;  %s543_s20 = sadd.s32 4294967294, %s663_s18   ;;  %s663_s18 = sphi %s698_s18, %s973_s18   ;;  %s659_s17 = sphi %s696_s17, %s972_s17   ;;  %s655_s16 = sphi %s694_s16, %s971_s16   ;;  %s651_s15 = sphi %s692_s15, %s970_s15  }
   0x4   : > { %s717_s21 = sadd.s32 1, %s663_s18   ;;  %s118_s22 = sadd.s32 1, %s659_s17 }
   0x5   : > { %s115_s23 = ssub.s32 %s663_s18, %s717_s21  ;;  %p128_p0 = scmp.ne.s32.totalorder %s659_s17, %s655_s16 }
   0x6   : > { %p116_p1 = scmp.eq.s32.totalorder %s115_s23, 0  ;;  %p129_p2 = scmp.eq.s32.totalorder %s713_s19, 1 }
   0x7   : > { %p134_p3 = scmp.ne.s32.totalorder %s655_s16, %s651_s15  ;;  %p135_p4 = scmp.eq.s32.totalorder %s543_s20, 1 }
   0x8   : > { %s728_s24 = scalar_select %p116_p1, %s659_s17, %s118_s22  }
   0x9   : > { %p730_p5 = por %p129_p2, %p128_p0  ;;  %p734_p6 = por %p135_p4, %p134_p3 }
   0xa   : > { %p546_p7 = scmp.ge.s32.totalorder %s663_s18, 1  ;;  %p177_p8 = scmp.lt.s32.totalorder %s663_s18, 3 }
   0xc   : > { %p178_p9 = pnand %p546_p7, %p177_p8 }
   0xd   : > { %s548_s27 = sshll.u32 (!%p178_p9), %s713_s19, 5  ;;  %s205_s13 = sand.u32 (!%p178_p9), 1, %s655_s16  }
   0xe   : > { %181 = sbr.rel (%p178_p9) target bundleno = 66 (0x42), region = 36  ;;  %p209_p10 = scmp.lt.s32.totalorder (!%p178_p9), %s548_s27, 63 }
   0xf   : > { %s774_s14 = sshll.u32 (!%p178_p9), %s205_s13, 8  ;;  %s557_s22 = sshll.u32 (!%p178_p9), %s713_s19, 8 }
  0x10   : > { %s804_s20 = scalar_lea.vmem (!%p178_p9), [#allocation2], %s774_s14  ;;  %s621_s9 = scalar_lea.hbm (!%p178_p9), %s967_s4, 512 }
  0x11   : > { %s466_s28 = sshll.u32 (!%p178_p9), %s804_s20, 4  ;;  %s467_s28 = int_to_ptr.vmem [resolvable:$true] %s466_s28 }
  0x13   : > { %s975_s27 = smov (!%p209_p10, %s548_s27), 63  ;;  %v744_v0 = vld [vmem:[%s964_s1] ss:$0 sm:$0xff] }
  0x14   : > { %s549_s30 = sshll.u32 %s975_s27, 3  ;;  %v759_v1 = vld [vmem:[%s965_s2] ss:$0 sm:$0xff]  ;;  %s465_s27 = scalar_lea.hbm %s967_s4, %s557_s22 }
  0x15   : > { %s749_s7 = scalar_lea.vmem %s963_s0, %s549_s30  ;;  %s754_s10 = scalar_lea.vmem %s966_s3, %s549_s30 }
  0x16   : > { %v221_v2 = vld [vmem:[%s749_s7] sm:$0xff]  ;;  %v222_v3 = vld [vmem:[%s749_s7 + $0x8] sm:$0xff]  ;;  %v223_v7 = vld [vmem:[%s749_s7 + $0x10] sm:$0xff]  ;;  %s468_s29 = sshll.u32 %s465_s27, 4  ;;  %s454_s30 = scalar_lea.sflag [#allocation3], %s205_s13  ;;  %s469_s29 = int_to_ptr.hbm [resolvable:$true] %s468_s29 }
  0x17   : > { %v257_v4 = vmul.f32 %v744_v0, %v221_v2  ;;  %v325_v5 = vld [vmem:[%s754_s10] sm:$0xff]  ;;  %v258_v6 = vmul.f32 %v744_v0, %v222_v3  ;;  %v326_v8 = vld [vmem:[%s754_s10 + $0x8] sm:$0xff]  ;;  %v259_v9 = vmul.f32 %v744_v0, %v223_v7  ;;  %v224_v10 = vld [vmem:[%s749_s7 + $0x18] sm:$0xff]  ;;  %s615_s5 = sshra.s32 %s469_s29, 4  ;;  %s616_s5 = int_to_ptr.hbm [resolvable:$true] %s615_s5 }
  0x18   : > { %v225_v11 = vld [vmem:[%s749_s7 + $0x20] sm:$0xff]  ;;  %v327_v14 = vld [vmem:[%s754_s10 + $0x10] sm:$0xff]  ;;  %v260_v15 = vmul.f32 %v744_v0, %v224_v10  ;;  %v328_v16 = vld [vmem:[%s754_s10 + $0x18] sm:$0xff]  ;;  %s617_s6 = scalar_lea.hbm %s616_s5, 256  ;;  %p622_p0 = scmp.lt.s32.totalorder %s616_s5, %s967_s4 }
  0x19   : > { %v293_v12 = vadd.f32 %v759_v1, %v257_v4  ;;  %v294_v13 = vadd.f32 %v759_v1, %v258_v6  ;;  %v261_v17 = vmul.f32 %v744_v0, %v225_v11  ;;  %v226_v18 = vld [vmem:[%s749_s7 + $0x28] sm:$0xff]  ;;  %v295_v19 = vadd.f32 %v759_v1, %v259_v9  ;;  %v329_v20 = vld [vmem:[%s754_s10 + $0x20] sm:$0xff]  ;;  %v227_v22 = vld [vmem:[%s749_s7 + $0x30] sm:$0xff]  ;;  %p618_p11 = scmp.ne.s32.totalorder %s616_s5, %s617_s6  ;;  %p623_p1 = scmp.lt.s32.totalorder %s621_s9, %s617_s6 }
  0x1a   : > { %v262_v21 = vmul.f32 %v744_v0, %v226_v18  ;;  %v228_v23 = vld [vmem:[%s749_s7 + $0x38] sm:$0xff]  ;;  %v296_v26 = vadd.f32 %v759_v1, %v260_v15  ;;  %v330_v28 = vld [vmem:[%s754_s10 + $0x28] sm:$0xff]  ;;  %v263_v31 = vmul.f32 %v744_v0, %v227_v22  ;;  %v229_v33 = vld [vmem:[%s749_s7 + $0x40] sm:$0xff] }
  0x1b   : > { %v357_v24 = vadd.f32 %v325_v5, %v293_v12  ;;  %v358_v25 = vadd.f32 %v326_v8, %v294_v13  ;;  %v297_v27 = vadd.f32 %v759_v1, %v261_v17  ;;  %v359_v29 = vadd.f32 %v327_v14, %v295_v19  ;;  %v230_v34 = vld [vmem:[%s749_s7 + $0x48] sm:$0xff]  ;;  %v331_v39 = vld [vmem:[%s754_s10 + $0x30] sm:$0xff]  ;;  %v332_v40 = vld [vmem:[%s754_s10 + $0x38] sm:$0xff]  ;;  %p619_p12 = pnand %p618_p11, %p730_p5  ;;  %p624_p2 = por %p623_p1, %p622_p0 }
  0x1c   : > { %v298_v30 = vadd.f32 %v759_v1, %v262_v21  ;;  %v264_v32 = vmul.f32 %v744_v0, %v228_v23  ;;  %v360_v37 = vadd.f32 %v328_v16, %v296_v26  ;;  %v231_v41 = vld [vmem:[%s749_s7 + $0x50] sm:$0xff]  ;;  %v299_v44 = vadd.f32 %v759_v1, %v263_v31  ;;  %v232_v46 = vld [vmem:[%s749_s7 + $0x58] sm:$0xff]  ;;  %v233_v47 = vld [vmem:[%s749_s7 + $0x60] sm:$0xff] }
  0x1d   : > { %v389_v35 = vmax.f32 %v357_v24, 0.0  ;;  %v390_v36 = vmax.f32 %v358_v25, 0.0  ;;  %v361_v38 = vadd.f32 %v329_v20, %v297_v27  ;;  %v391_v42 = vmax.f32 %v359_v29, 0.0  ;;  %v234_v52 = vld [vmem:[%s749_s7 + $0x68] sm:$0xff]  ;;  %v333_v56 = vld [vmem:[%s754_s10 + $0x40] sm:$0xff]  ;;  %v335_v61 = vld [vmem:[%s754_s10 + $0x50] sm:$0xff]  ;;  %p620_p13 = pneg %p619_p12 }
  0x1e   : > { %v362_v43 = vadd.f32 %v330_v28, %v298_v30  ;;  %v300_v45 = vadd.f32 %v759_v1, %v264_v32  ;;  %v392_v48 = vmax.f32 %v360_v37, 0.0  ;;  %v265_v50 = vmul.f32 %v744_v0, %v229_v33  ;;  %v334_v57 = vld [vmem:[%s754_s10 + $0x48] sm:$0xff]  ;;  %v235_v2 = vld [vmem:[%s749_s7 + $0x70] sm:$0xff]  ;;  %v236_v3 = vld [vmem:[%s749_s7 + $0x78] sm:$0xff] }
  0x1f   : > { %421 = vst [vmem:[%s804_s20] sm:$0xff] %v389_v35  ;;  %v393_v49 = vmax.f32 %v361_v38, 0.0  ;;  %v266_v51 = vmul.f32 %v744_v0, %v230_v34  ;;  %v363_v54 = vadd.f32 %v331_v39, %v299_v44  ;;  %v267_v58 = vmul.f32 %v744_v0, %v231_v41  ;;  %v336_v7 = vld [vmem:[%s754_s10 + $0x58] sm:$0xff]  ;;  %v337_v8 = vld [vmem:[%s754_s10 + $0x60] sm:$0xff]  ;;  %v338_v14 = vld [vmem:[%s754_s10 + $0x68] sm:$0xff]  ;;  %p625_p3 = pnand %p624_p2, %p620_p13 }
  0x20   : > { %422 = vst [vmem:[%s804_s20 + $0x8] sm:$0xff] %v390_v36  ;;  %v394_v53 = vmax.f32 %v362_v43, 0.0  ;;  %v364_v55 = vadd.f32 %v332_v40, %v300_v45  ;;  %v301_v59 = vadd.f32 %v759_v1, %v265_v50  ;;  %v268_v62 = vmul.f32 %v744_v0, %v232_v46  ;;  %v237_v19 = vld [vmem:[%s749_s7 + $0x80] sm:$0xff]  ;;  %v238_v20 = vld [vmem:[%s749_s7 + $0x88] sm:$0xff]  ;;  %v339_v25 = vld [vmem:[%s754_s10 + $0x70] sm:$0xff] }
  0x21   : > { %423 = vst [vmem:[%s804_s20 + $0x10] sm:$0xff] %v391_v42  ;;  %v302_v60 = vadd.f32 %v759_v1, %v266_v51  ;;  %v269_v63 = vmul.f32 %v744_v0, %v233_v47  ;;  %v395_v4 = vmax.f32 %v363_v54, 0.0  ;;  %v303_v6 = vadd.f32 %v759_v1, %v267_v58  ;;  %v340_v26 = vld [vmem:[%s754_s10 + $0x78] sm:$0xff]  ;;  %v239_v27 = vld [vmem:[%s749_s7 + $0x90] sm:$0xff]  ;;  %v241_v33 = vld [vmem:[%s749_s7 + $0xa0] sm:$0xff] }
  0x22   : > { %424 = vst [vmem:[%s804_s20 + $0x18] sm:$0xff] %v392_v48  ;;  %v396_v5 = vmax.f32 %v364_v55, 0.0  ;;  %v270_v9 = vmul.f32 %v744_v0, %v234_v52  ;;  %v365_v10 = vadd.f32 %v333_v56, %v301_v59  ;;  %v304_v12 = vadd.f32 %v759_v1, %v268_v62  ;;  %v240_v32 = vld [vmem:[%s749_s7 + $0x98] sm:$0xff]  ;;  %v242_v38 = vld [vmem:[%s749_s7 + $0xa8] sm:$0xff]  ;;  %v341_v42 = vld [vmem:[%s754_s10 + $0x80] sm:$0xff] }
  0x23   : > { %425 = vst [vmem:[%s804_s20 + $0x20] sm:$0xff] %v393_v49  ;;  %v366_v11 = vadd.f32 %v334_v57, %v302_v60  ;;  %v305_v13 = vadd.f32 %v759_v1, %v269_v63  ;;  %v367_v15 = vadd.f32 %v335_v61, %v303_v6  ;;  %v271_v17 = vmul.f32 %v744_v0, %v235_v2  ;;  %v342_v43 = vld [vmem:[%s754_s10 + $0x88] sm:$0xff]  ;;  %v343_v47 = vld [vmem:[%s754_s10 + $0x90] sm:$0xff]  ;;  %v244_v51 = vld [vmem:[%s749_s7 + $0xb8] sm:$0xff] }
  0x24   : > { %426 = vst [vmem:[%s804_s20 + $0x28] sm:$0xff] %v394_v53  ;;  %v306_v16 = vadd.f32 %v759_v1, %v270_v9  ;;  %v272_v18 = vmul.f32 %v744_v0, %v236_v3  ;;  %v397_v21 = vmax.f32 %v365_v10, 0.0  ;;  %v368_v23 = vadd.f32 %v336_v7, %v304_v12  ;;  %v243_v50 = vld [vmem:[%s749_s7 + $0xb0] sm:$0xff]  ;;  %v344_v55 = vld [vmem:[%s754_s10 + $0x98] sm:$0xff]  ;;  %v345_v56 = vld [vmem:[%s754_s10 + $0xa0] sm:$0xff] }
  0x25   : > { %427 = vst [vmem:[%s804_s20 + $0x30] sm:$0xff] %v395_v4  ;;  %v398_v22 = vmax.f32 %v366_v11, 0.0  ;;  %v369_v24 = vadd.f32 %v337_v8, %v305_v13  ;;  %v399_v28 = vmax.f32 %v367_v15, 0.0  ;;  %v307_v30 = vadd.f32 %v759_v1, %v271_v17  ;;  %v346_v62 = vld [vmem:[%s754_s10 + $0xa8] sm:$0xff]  ;;  %v347_v11 = vld [vmem:[%s754_s10 + $0xb0] sm:$0xff]  ;;  %v348_v12 = vld [vmem:[%s754_s10 + $0xb8] sm:$0xff] }
  0x26   : > { %428 = vst [vmem:[%s804_s20 + $0x38] sm:$0xff] %v396_v5  ;;  %v370_v29 = vadd.f32 %v338_v14, %v306_v16  ;;  %v308_v31 = vadd.f32 %v759_v1, %v272_v18  ;;  %v400_v34 = vmax.f32 %v368_v23, 0.0  ;;  %v273_v36 = vmul.f32 %v744_v0, %v237_v19  ;;  %v245_v5 = vld [vmem:[%s749_s7 + $0xc0] sm:$0xff]  ;;  %v246_v6 = vld [vmem:[%s749_s7 + $0xc8] sm:$0xff]  ;;  %v247_v13 = vld [vmem:[%s749_s7 + $0xd0] sm:$0xff] }
  0x27   : > { %429 = vst [vmem:[%s804_s20 + $0x40] sm:$0xff] %v397_v21  ;;  %v401_v35 = vmax.f32 %v369_v24, 0.0  ;;  %v274_v37 = vmul.f32 %v744_v0, %v238_v20  ;;  %v371_v40 = vadd.f32 %v339_v25, %v307_v30  ;;  %v275_v44 = vmul.f32 %v744_v0, %v239_v27  ;;  %v248_v18 = vld [vmem:[%s749_s7 + $0xd8] sm:$0xff]  ;;  %v249_v19 = vld [vmem:[%s749_s7 + $0xe0] sm:$0xff]  ;;  %v250_v24 = vld [vmem:[%s749_s7 + $0xe8] sm:$0xff] }
  0x28   : > { %430 = vst [vmem:[%s804_s20 + $0x48] sm:$0xff] %v398_v22  ;;  %v402_v39 = vmax.f32 %v370_v29, 0.0  ;;  %v372_v41 = vadd.f32 %v340_v26, %v308_v31  ;;  %v309_v45 = vadd.f32 %v759_v1, %v273_v36  ;;  %v276_v48 = vmul.f32 %v744_v0, %v240_v32  ;;  %v350_v29 = vld [vmem:[%s754_s10 + $0xc8] sm:$0xff]  ;;  %v251_v36 = vld [vmem:[%s749_s7 + $0xf0] sm:$0xff] }
  0x29   : > { %431 = vst [vmem:[%s804_s20 + $0x50] sm:$0xff] %v399_v28  ;;  %v310_v46 = vadd.f32 %v759_v1, %v274_v37  ;;  %v277_v49 = vmul.f32 %v744_v0, %v241_v33  ;;  %v403_v52 = vmax.f32 %v371_v40, 0.0  ;;  %v311_v54 = vadd.f32 %v759_v1, %v275_v44  ;;  %v349_v28 = vld [vmem:[%s754_s10 + $0xc0] sm:$0xff]  ;;  %v351_v33 = vld [vmem:[%s754_s10 + $0xd0] sm:$0xff]  ;;  %v252_v37 = vld [vmem:[%s749_s7 + $0xf8] sm:$0xff] }
  0x2a   : > { %432 = vst [vmem:[%s804_s20 + $0x58] sm:$0xff] %v400_v34  ;;  %v404_v53 = vmax.f32 %v372_v41, 0.0  ;;  %v278_v57 = vmul.f32 %v744_v0, %v242_v38  ;;  %v373_v58 = vadd.f32 %v341_v42, %v309_v45  ;;  %v312_v60 = vadd.f32 %v759_v1, %v276_v48  ;;  %v352_v41 = vld [vmem:[%s754_s10 + $0xd8] sm:$0xff]  ;;  %v353_v42 = vld [vmem:[%s754_s10 + $0xe0] sm:$0xff]  ;;  %v354_v48 = vld [vmem:[%s754_s10 + $0xe8] sm:$0xff] }
  0x2b   : > { %433 = vst [vmem:[%s804_s20 + $0x60] sm:$0xff] %v401_v35  ;;  %v374_v59 = vadd.f32 %v342_v43, %v310_v46  ;;  %v313_v61 = vadd.f32 %v759_v1, %v277_v49  ;;  %v375_v63 = vadd.f32 %v343_v47, %v311_v54  ;;  %v279_v3 = vmul.f32 %v744_v0, %v243_v50 }
  0x2c   : > { %434 = vst [vmem:[%s804_s20 + $0x68] sm:$0xff] %v402_v39  ;;  %v314_v2 = vadd.f32 %v759_v1, %v278_v57  ;;  %v280_v4 = vmul.f32 %v744_v0, %v244_v51  ;;  %v405_v7 = vmax.f32 %v373_v58, 0.0  ;;  %v376_v9 = vadd.f32 %v344_v55, %v312_v60  ;;  %v355_v57 = vld [vmem:[%s754_s10 + $0xf0] sm:$0xff]  ;;  %v356_v58 = vld [vmem:[%s754_s10 + $0xf8] sm:$0xff] }
  0x2d   : > { %435 = vst [vmem:[%s804_s20 + $0x70] sm:$0xff] %v403_v52  ;;  %v406_v8 = vmax.f32 %v374_v59, 0.0  ;;  %v377_v10 = vadd.f32 %v345_v56, %v313_v61  ;;  %v407_v14 = vmax.f32 %v375_v63, 0.0  ;;  %v315_v16 = vadd.f32 %v759_v1, %v279_v3 }
  0x2e   : > { %436 = vst [vmem:[%s804_s20 + $0x78] sm:$0xff] %v404_v53  ;;  %v378_v15 = vadd.f32 %v346_v62, %v314_v2  ;;  %v316_v17 = vadd.f32 %v759_v1, %v280_v4  ;;  %v408_v20 = vmax.f32 %v376_v9, 0.0  ;;  %v281_v22 = vmul.f32 %v744_v0, %v245_v5 }
  0x2f   : > { %437 = vst [vmem:[%s804_s20 + $0x80] sm:$0xff] %v405_v7  ;;  %v409_v21 = vmax.f32 %v377_v10, 0.0  ;;  %v282_v23 = vmul.f32 %v744_v0, %v246_v6  ;;  %v379_v26 = vadd.f32 %v347_v11, %v315_v16  ;;  %v283_v30 = vmul.f32 %v744_v0, %v247_v13 }
  0x30   : > { %438 = vst [vmem:[%s804_s20 + $0x88] sm:$0xff] %v406_v8  ;;  %v410_v25 = vmax.f32 %v378_v15, 0.0  ;;  %v380_v27 = vadd.f32 %v348_v12, %v316_v17  ;;  %v317_v31 = vadd.f32 %v759_v1, %v281_v22  ;;  %v284_v34 = vmul.f32 %v744_v0, %v248_v18 }
  0x31   : > { %439 = vst [vmem:[%s804_s20 + $0x90] sm:$0xff] %v407_v14  ;;  %v318_v32 = vadd.f32 %v759_v1, %v282_v23  ;;  %v285_v35 = vmul.f32 %v744_v0, %v249_v19  ;;  %v411_v38 = vmax.f32 %v379_v26, 0.0  ;;  %v319_v40 = vadd.f32 %v759_v1, %v283_v30 }
  0x32   : > { %440 = vst [vmem:[%s804_s20 + $0x98] sm:$0xff] %v408_v20  ;;  %v412_v39 = vmax.f32 %v380_v27, 0.0  ;;  %v286_v43 = vmul.f32 %v744_v0, %v250_v24  ;;  %v381_v44 = vadd.f32 %v349_v28, %v317_v31  ;;  %v320_v46 = vadd.f32 %v759_v1, %v284_v34 }
  0x33   : > { %441 = vst [vmem:[%s804_s20 + $0xa0] sm:$0xff] %v409_v21  ;;  %v382_v45 = vadd.f32 %v350_v29, %v318_v32  ;;  %v321_v47 = vadd.f32 %v759_v1, %v285_v35  ;;  %v383_v49 = vadd.f32 %v351_v33, %v319_v40  ;;  %v287_v51 = vmul.f32 %v744_v0, %v251_v36 }
  0x34   : > { %442 = vst [vmem:[%s804_s20 + $0xa8] sm:$0xff] %v410_v25  ;;  %v322_v50 = vadd.f32 %v759_v1, %v286_v43  ;;  %v288_v52 = vmul.f32 %v744_v0, %v252_v37  ;;  %v413_v53 = vmax.f32 %v381_v44, 0.0  ;;  %v384_v55 = vadd.f32 %v352_v41, %v320_v46 }
  0x35   : > { %443 = vst [vmem:[%s804_s20 + $0xb0] sm:$0xff] %v411_v38  ;;  %v414_v54 = vmax.f32 %v382_v45, 0.0  ;;  %v385_v56 = vadd.f32 %v353_v42, %v321_v47  ;;  %v415_v59 = vmax.f32 %v383_v49, 0.0  ;;  %v323_v0 = vadd.f32 %v759_v1, %v287_v51 }
  0x36   : > { %444 = vst [vmem:[%s804_s20 + $0xb8] sm:$0xff] %v412_v39  ;;  %v386_v60 = vadd.f32 %v354_v48, %v322_v50  ;;  %v324_v61 = vadd.f32 %v759_v1, %v288_v52  ;;  %v416_v62 = vmax.f32 %v384_v55, 0.0 }
  0x37   : > { %445 = vst [vmem:[%s804_s20 + $0xc0] sm:$0xff] %v413_v53  ;;  %v417_v63 = vmax.f32 %v385_v56, 0.0  ;;  %v387_v3 = vadd.f32 %v355_v57, %v323_v0 }
  0x38   : > { %446 = vst [vmem:[%s804_s20 + $0xc8] sm:$0xff] %v414_v54  ;;  %v418_v2 = vmax.f32 %v386_v60, 0.0  ;;  %v388_v4 = vadd.f32 %v356_v58, %v324_v61 }
  0x39   : > { %447 = vst [vmem:[%s804_s20 + $0xd0] sm:$0xff] %v415_v59  ;;  %v419_v5 = vmax.f32 %v387_v3, 0.0 }
  0x3a   : > { %448 = vst [vmem:[%s804_s20 + $0xd8] sm:$0xff] %v416_v62  ;;  %v420_v6 = vmax.f32 %v388_v4, 0.0 }
  0x3b   : > { %449 = vst [vmem:[%s804_s20 + $0xe0] sm:$0xff] %v417_v63 }
  0x3c   : > { %450 = vst [vmem:[%s804_s20 + $0xe8] sm:$0xff] %v418_v2 }
  0x3d   : > { %451 = vst [vmem:[%s804_s20 + $0xf0] sm:$0xff] %v419_v5 }
  0x3e   : > { %452 = vst [vmem:[%s804_s20 + $0xf8] sm:$0xff] %v420_v6 }
  0x3f   : > { %628 = shalt.err (!%p625_p3)
}
  0x40   : > { %s665_s12 = smov 128   ;;  %s666_s13 = smov 8  }
  0x41   : > { %558 = dma.vmem_to_hbm [thread:$0]  (%p730_p5), %s467_s28, 4096, %s469_s29, %s454_s30, %s665_s12, %s665_s12, %s666_s13  }
  0x42 PF: > { %p564_p4 = scmp.ge.s32.totalorder %s663_s18, 2  ;;  %s483_s14 = sand.u32 1, %s651_s15  }
  0x43   : > { %s484_s20 = scalar_lea.sflag [#allocation3], %s483_s14 }
  0x44   : > { %p561_p7 = pnand %p564_p4, %p734_p6 }
  0x46   : > { %p562_p8 = pneg %p561_p7 }
  0x48   : > { %646 = dma.done.wait (%p562_p8), %s484_s20, 4096  }
  0x49   : > { %648 = vsyncadd (%p562_p8), %s484_s20, 4294963200  ;;  %p14_p9 = scmp.ge.s32.totalorder %s717_s21, 4   ;;  %s970_s15 = smov %s655_s16 }
  0x4a   : > { %s971_s16 = smov %s659_s17  ;;  %s972_s17 = smov %s728_s24 }
  0x4b   : > { %s973_s18 = smov %s717_s21  ;;  %16 = sbr.rel (!%p14_p9) target bundleno = 3 (0x3), region = 74 }
  0x50   :  { %490 = vsyncpa [#allocation3], 1 }
  0x51   :  { %492 = vsyncpa [#allocation3 + $0x1], 1 }

// kernel: bottleneck_forward.6
= control target key start
LH: loop header
LB: loop body
LE: loop exit
PB: predicated region body
PF: predicated region fallthrough
CT: control target
= control target key end

     0   :  { %s921_s21 = smov 0   ;;  %s1228_s0 = inlined_call_operand.vmem [shape: f32[512,32], index: 0, kind: input, shape index: {}]   ;;  %s1229_s1 = inlined_call_operand.vmem [shape: f32[1,32], index: 1, kind: input, shape index: {}]   ;;  %s1230_s2 = inlined_call_operand.vmem [shape: f32[1,32], index: 2, kind: input, shape index: {}]   ;;  %s1231_s3 = inlined_call_operand.vmem [shape: bf16[32,128], index: 3, kind: input, shape index: {}]   ;;  %s1232_s4 = inlined_call_operand.vmem [shape: f32[512,128], index: 4, kind: output, shape index: {0}]   ;;  %s1233_s5 = inlined_call_operand.vmem [shape: f32[2,1,128], index: 5, kind: output, shape index: {1}]   ;;  %s1234_s6 = inlined_call_operand.vmem [shape: f32[2,1,128], index: 6, kind: output, shape index: {2}]  }
   0x1 LB: > { %s927_s22 = sadd.s32 4294967295, %s884_s21   ;;  %p829_p0 = scmp.ge.s32.totalorder %s884_s21, 1  ;;  %s884_s21 = sphi %s921_s21, %s17_s21  }
   0x2   : > { %p218_p1 = scmp.lt.s32.totalorder %s884_s21, 3 }
   0x4   : > { %p219_p2 = pnand %p829_p0, %p218_p1 }
   0x5   : > { %s830_s25 = sshll.u32 (!%p219_p2), %s927_s22, 5  ;;  %p266_p4 = scmp.lt.s32.totalorder (!%p219_p2), %s927_s22, 1 }
   0x6   : > { %222 = sbr.rel (%p219_p2) target bundleno = 270 (0x10e), region = 36  ;;  %p255_p3 = scmp.lt.s32.totalorder (!%p219_p2), %s830_s25, 63 }
   0xb   : > { %v861_v0 = vld [vmem:[%s1231_s3 + $0x8] sm:$0xff]  ;;  %v860_v1 = vld [vmem:[%s1231_s3] sm:$0xff]  ;;  %s1236_s25 = smov (!%p255_p3, %s830_s25), 63  ;;  %vm441_vm0 = vcmask 261120   ;;  %s1238_s22 = smov (!%p266_p4, %s927_s22), 1 }
   0xc   : > { %496 = vmatpush.bf16.msra.mxu0 %v861_v0  ;;  %862 = vmatpush.bf16.msra.mxu1 %v861_v0  ;;  %v943_v2 = vld [vmem:[%s1229_s1] ss:$0 sm:$0xff]  ;;  %s831_s30 = sshll.u32 %s1236_s25, 3  ;;  %s268_s17 = scalar_lea.vmem %s1233_s5, %s1238_s22 }
   0xd   : > { %863 = vmatpush.bf16.msra.mxu2 %v861_v0  ;;  %864 = vmatpush.bf16.msra.mxu3 %v861_v0  ;;  %s951_s9 = scalar_lea.vmem %s1228_s0, %s831_s30  ;;  %v956_v3 = vld [vmem:[%s1230_s2] ss:$0 sm:$0xff]  ;;  %s1075_s14 = scalar_lea.vmem %s1232_s4, %s831_s30 }
   0xe   : > { %v273_v4 = vld [vmem:[%s951_s9] sm:$0xff]  ;;  %v274_v5 = vld [vmem:[%s951_s9 + $0x8] sm:$0xff]  ;;  %v275_v25 = vld [vmem:[%s951_s9 + $0x10] sm:$0xff]  ;;  %s271_s20 = scalar_lea.vmem %s1234_s6, %s1238_s22 }
   0xf   : > { %v281_v6 = vld [vmem:[%s951_s9 + $0x40] sm:$0xff]  ;;  %v309_v7 = vmul.f32 %v943_v2, %v273_v4  ;;  %v310_v8 = vmul.f32 %v943_v2, %v274_v5  ;;  %v282_v9 = vld [vmem:[%s951_s9 + $0x48] sm:$0xff]  ;;  %v276_v26 = vld [vmem:[%s951_s9 + $0x18] sm:$0xff]  ;;  %v311_v35 = vmul.f32 %v943_v2, %v275_v25 }
  0x10   : > { %497 = vmatpush.bf16.msra.mxu0 %v860_v1  ;;  %865 = vmatpush.bf16.msra.mxu1 %v860_v1  ;;  %v317_v10 = vmul.f32 %v943_v2, %v281_v6  ;;  %v318_v11 = vmul.f32 %v943_v2, %v282_v9  ;;  %v289_v12 = vld [vmem:[%s951_s9 + $0x80] sm:$0xff]  ;;  %v290_v13 = vld [vmem:[%s951_s9 + $0x88] sm:$0xff]  ;;  %v283_v30 = vld [vmem:[%s951_s9 + $0x50] sm:$0xff]  ;;  %v312_v36 = vmul.f32 %v943_v2, %v276_v26 }
  0x11   : > { %866 = vmatpush.bf16.msra.mxu2 %v860_v1  ;;  %867 = vmatpush.bf16.msra.mxu3 %v860_v1  ;;  %v345_v14 = vadd.f32 %v956_v3, %v309_v7  ;;  %v346_v15 = vadd.f32 %v956_v3, %v310_v8  ;;  %v325_v17 = vmul.f32 %v943_v2, %v289_v12  ;;  %v284_v31 = vld [vmem:[%s951_s9 + $0x58] sm:$0xff]  ;;  %v297_v32 = vld [vmem:[%s951_s9 + $0xc0] sm:$0xff]  ;;  %v291_v37 = vld [vmem:[%s951_s9 + $0x90] sm:$0xff] }
  0x12   : > { %v353_v16 = vadd.f32 %v956_v3, %v317_v10  ;;  %v354_v18 = vadd.f32 %v956_v3, %v318_v11  ;;  %v326_v19 = vmul.f32 %v943_v2, %v290_v13  ;;  %v292_v38 = vld [vmem:[%s951_s9 + $0x98] sm:$0xff]  ;;  %v298_v39 = vld [vmem:[%s951_s9 + $0xc8] sm:$0xff]  ;;  %v319_v41 = vmul.f32 %v943_v2, %v283_v30  ;;  %v299_v62 = vld [vmem:[%s951_s9 + $0xd0] sm:$0xff] }
  0x13   : > { %v377_v20 = vmax.f32 %v345_v14, 0.0  ;;  %v378_v21 = vmax.f32 %v346_v15, 0.0  ;;  %v361_v23 = vadd.f32 %v956_v3, %v325_v17  ;;  %v320_v42 = vmul.f32 %v943_v2, %v284_v31  ;;  %v300_v63 = vld [vmem:[%s951_s9 + $0xd8] sm:$0xff]  ;;  %v277_v8 = vld [vmem:[%s951_s9 + $0x20] sm:$0xff]  ;;  %v278_v9 = vld [vmem:[%s951_s9 + $0x28] sm:$0xff] }
  0x14   : > { %v385_v22 = vmax.f32 %v353_v16, 0.0  ;;  %v386_v24 = vmax.f32 %v354_v18, 0.0  ;;  %v362_v27 = vadd.f32 %v956_v3, %v326_v19  ;;  %v333_v43 = vmul.f32 %v943_v2, %v297_v32  ;;  %v285_v10 = vld [vmem:[%s951_s9 + $0x60] sm:$0xff]  ;;  %v286_v11 = vld [vmem:[%s951_s9 + $0x68] sm:$0xff] }
  0x15   : > { %v409_v28 = vpack.c.bf16 %v378_v21, %v377_v20  ;;  %v393_v29 = vmax.f32 %v361_v23, 0.0  ;;  %v327_v44 = vmul.f32 %v943_v2, %v291_v37  ;;  %v328_v45 = vmul.f32 %v943_v2, %v292_v38  ;;  %v293_v17 = vld [vmem:[%s951_s9 + $0xa0] sm:$0xff]  ;;  %v294_v18 = vld [vmem:[%s951_s9 + $0xa8] sm:$0xff] }
  0x16   : > { %v413_v33 = vpack.c.bf16 %v386_v24, %v385_v22  ;;  %v394_v34 = vmax.f32 %v362_v27, 0.0  ;;  %v334_v46 = vmul.f32 %v943_v2, %v298_v39  ;;  %v369_v47 = vadd.f32 %v956_v3, %v333_v43 }
  0x17   : > { %842 = vmatmul.msk.bf16.vlgmr.msra.gmra.mxu0 %vm441_vm0, %v409_v28  ;;  %v347_v48 = vadd.f32 %v956_v3, %v311_v35  ;;  %v348_v49 = vadd.f32 %v956_v3, %v312_v36  ;;  %v355_v50 = vadd.f32 %v956_v3, %v319_v41  ;;  %v356_v51 = vadd.f32 %v956_v3, %v320_v42  ;;  %v302_v35 = vld [vmem:[%s951_s9 + $0xe8] sm:$0xff] }
  0x18   : > { %846 = vmatmul.msk.bf16.vlgmr.msra.gmra.mxu1 %vm441_vm0, %v413_v33  ;;  %v417_v40 = vpack.c.bf16 %v394_v34, %v393_v29  ;;  %v370_v52 = vadd.f32 %v956_v3, %v334_v46  ;;  %v401_v53 = vmax.f32 %v369_v47, 0.0  ;;  %v363_v54 = vadd.f32 %v956_v3, %v327_v44  ;;  %v301_v34 = vld [vmem:[%s951_s9 + $0xe0] sm:$0xff]  ;;  %v279_v44 = vld [vmem:[%s951_s9 + $0x30] sm:$0xff]  ;;  %v288_v47 = vld [vmem:[%s951_s9 + $0x78] sm:$0xff] }
  0x19   : > { %v364_v55 = vadd.f32 %v956_v3, %v328_v45  ;;  %v379_v57 = vmax.f32 %v347_v48, 0.0  ;;  %v380_v58 = vmax.f32 %v348_v49, 0.0  ;;  %v387_v59 = vmax.f32 %v355_v50, 0.0  ;;  %v280_v45 = vld [vmem:[%s951_s9 + $0x38] sm:$0xff]  ;;  %v287_v46 = vld [vmem:[%s951_s9 + $0x70] sm:$0xff] }
  0x1a   : > { %850 = vmatmul.msk.bf16.vlgmr.msra.gmra.mxu2 %vm441_vm0, %v417_v40  ;;  %v402_v56 = vmax.f32 %v370_v52, 0.0  ;;  %v388_v60 = vmax.f32 %v356_v51, 0.0  ;;  %v395_v0 = vmax.f32 %v363_v54, 0.0  ;;  %v335_v4 = vmul.f32 %v943_v2, %v299_v62  ;;  %v296_v54 = vld [vmem:[%s951_s9 + $0xb8] sm:$0xff] }
  0x1b   : > { %v396_v1 = vmax.f32 %v364_v55, 0.0  ;;  %v336_v5 = vmul.f32 %v943_v2, %v300_v63  ;;  %v410_v6 = vpack.c.bf16 %v380_v58, %v379_v57  ;;  %v313_v15 = vmul.f32 %v943_v2, %v277_v8  ;;  %v303_v8 = vld [vmem:[%s951_s9 + $0xf0] sm:$0xff] }
  0x1c   : > { %v421_v61 = vpack.c.bf16 %v402_v56, %v401_v53  ;;  %v414_v7 = vpack.c.bf16 %v388_v60, %v387_v59  ;;  %v371_v13 = vadd.f32 %v956_v3, %v335_v4  ;;  %v314_v16 = vmul.f32 %v943_v2, %v278_v9  ;;  %v295_v53 = vld [vmem:[%s951_s9 + $0xb0] sm:$0xff]  ;;  %v304_v9 = vld [vmem:[%s951_s9 + $0xf8] sm:$0xff] }
  0x1d   : > { %v418_v12 = vpack.c.bf16 %v396_v1, %v395_v0  ;;  %v372_v14 = vadd.f32 %v956_v3, %v336_v5  ;;  %v321_v19 = vmul.f32 %v943_v2, %v285_v10  ;;  %v322_v20 = vmul.f32 %v943_v2, %v286_v11 }
  0x1e   : > { %854 = vmatmul.msk.bf16.vlgmr.msra.gmra.mxu3 %vm441_vm0, %v421_v61  ;;  %v329_v21 = vmul.f32 %v943_v2, %v293_v17  ;;  %v330_v22 = vmul.f32 %v943_v2, %v294_v18  ;;  %v403_v23 = vmax.f32 %v371_v13, 0.0  ;;  %v349_v25 = vadd.f32 %v956_v3, %v313_v15 }
  0x1f   : > { %v404_v24 = vmax.f32 %v372_v14, 0.0  ;;  %v350_v26 = vadd.f32 %v956_v3, %v314_v16  ;;  %v357_v27 = vadd.f32 %v956_v3, %v321_v19  ;;  %v358_v28 = vadd.f32 %v956_v3, %v322_v20 }
  0x20   : > { %v365_v29 = vadd.f32 %v956_v3, %v329_v21  ;;  %v366_v30 = vadd.f32 %v956_v3, %v330_v22  ;;  %v381_v32 = vmax.f32 %v349_v25, 0.0  ;;  %v337_v40 = vmul.f32 %v943_v2, %v301_v34 }
  0x21   : > { %v422_v31 = vpack.c.bf16 %v404_v24, %v403_v23  ;;  %v382_v33 = vmax.f32 %v350_v26, 0.0  ;;  %v389_v36 = vmax.f32 %v357_v27, 0.0  ;;  %v390_v37 = vmax.f32 %v358_v28, 0.0 }
  0x22   : > { %v397_v38 = vmax.f32 %v365_v29, 0.0  ;;  %v398_v39 = vmax.f32 %v366_v30, 0.0  ;;  %v338_v41 = vmul.f32 %v943_v2, %v302_v35  ;;  %v373_v49 = vadd.f32 %v956_v3, %v337_v40 }
  0x23   : > { %v411_v42 = vpack.c.bf16 %v382_v33, %v381_v32  ;;  %v415_v43 = vpack.c.bf16 %v390_v37, %v389_v36  ;;  %v315_v51 = vmul.f32 %v943_v2, %v279_v44  ;;  %v316_v52 = vmul.f32 %v943_v2, %v280_v45 }
  0x24   : > { %v419_v48 = vpack.c.bf16 %v398_v39, %v397_v38  ;;  %v374_v50 = vadd.f32 %v956_v3, %v338_v41  ;;  %v323_v55 = vmul.f32 %v943_v2, %v287_v46  ;;  %v324_v56 = vmul.f32 %v943_v2, %v288_v47 }
  0x25   : > { %v331_v57 = vmul.f32 %v943_v2, %v295_v53  ;;  %v332_v58 = vmul.f32 %v943_v2, %v296_v54  ;;  %v405_v59 = vmax.f32 %v373_v49, 0.0  ;;  %v351_v61 = vadd.f32 %v956_v3, %v315_v51 }
  0x26   : > { %v406_v60 = vmax.f32 %v374_v50, 0.0  ;;  %v352_v62 = vadd.f32 %v956_v3, %v316_v52  ;;  %v359_v63 = vadd.f32 %v956_v3, %v323_v55  ;;  %v360_v0 = vadd.f32 %v956_v3, %v324_v56 }
  0x27   : > { %843 = vmatmul.msk.bf16.gmra.mxu0 %vm441_vm0, %v410_v6  ;;  %v367_v1 = vadd.f32 %v956_v3, %v331_v57  ;;  %v368_v4 = vadd.f32 %v956_v3, %v332_v58  ;;  %v383_v6 = vmax.f32 %v351_v61, 0.0  ;;  %v339_v14 = vmul.f32 %v943_v2, %v303_v8 }
  0x28   : > { %847 = vmatmul.msk.bf16.gmra.mxu1 %vm441_vm0, %v414_v7  ;;  %v423_v5 = vpack.c.bf16 %v406_v60, %v405_v59  ;;  %v384_v7 = vmax.f32 %v352_v62, 0.0  ;;  %v391_v10 = vmax.f32 %v359_v63, 0.0  ;;  %v392_v11 = vmax.f32 %v360_v0, 0.0 }
  0x29   : > { %v400_v13 = vmax.f32 %v368_v4, 0.0  ;;  %v340_v15 = vmul.f32 %v943_v2, %v304_v9  ;;  %v375_v19 = vadd.f32 %v956_v3, %v339_v14 }
  0x2a   : > { %851 = vmatmul.msk.bf16.gmra.mxu2 %vm441_vm0, %v418_v12  ;;  %v399_v12 = vmax.f32 %v367_v1, 0.0  ;;  %v412_v16 = vpack.c.bf16 %v384_v7, %v383_v6  ;;  %v416_v17 = vpack.c.bf16 %v392_v11, %v391_v10 }
  0x2b   : > { %v376_v20 = vadd.f32 %v956_v3, %v340_v15  ;;  %v407_v21 = vmax.f32 %v375_v19, 0.0 }
  0x2c   : > { %v420_v18 = vpack.c.bf16 %v400_v13, %v399_v12 }
  0x2d   : > { %v408_v22 = vmax.f32 %v376_v20, 0.0 }
  0x2e   : > { %855 = vmatmul.msk.bf16.gmra.mxu3 %vm441_vm0, %v422_v31 }
  0x2f   : > { %v424_v23 = vpack.c.bf16 %v408_v22, %v407_v21 }
  0x37   : > { %844 = vmatmul.msk.bf16.gmra.mxu0 %vm441_vm0, %v411_v42 }
  0x38   : > { %848 = vmatmul.msk.bf16.gmra.mxu1 %vm441_vm0, %v415_v43 }
  0x3a   : > { %852 = vmatmul.msk.bf16.gmra.mxu2 %vm441_vm0, %v419_v48 }
  0x3e   : > { %856 = vmatmul.msk.bf16.gmra.mxu3 %vm441_vm0, %v423_v5 }
  0x47   : > { %845 = vmatmul.msk.bf16.gmra.mxu0 %vm441_vm0, %v412_v16 }
  0x48   : > { %849 = vmatmul.msk.bf16.gmra.mxu1 %vm441_vm0, %v416_v17 }
  0x4a   : > { %853 = vmatmul.msk.bf16.gmra.mxu2 %vm441_vm0, %v420_v18 }
  0x4e   : > { %857 = vmatmul.msk.bf16.gmra.mxu3 %vm441_vm0, %v424_v23 }
  0x94   : > { %v499_v2 = vpop.f32.mrf.mxu0 }
  0x95   : > { %579 = vst [vmem:[%s1075_s14] sm:$0xff] %v499_v2  ;;  %v1078_v3 = vpop.f32.mrf.mxu1  ;;  %v649_v44 = vmul.f32 %v499_v2, %v499_v2 }
  0x96   : > { %587 = vst [vmem:[%s1075_s14 + $0x40] sm:$0xff] %v1078_v3  ;;  %v657_v10 = vmul.f32 %v1078_v3, %v1078_v3 }
  0x9c   : > { %v501_v24 = vpop.f32.mrf.mxu0 }
  0x9d   : > { %580 = vst [vmem:[%s1075_s14 + $0x8] sm:$0xff] %v501_v24  ;;  %v1083_v25 = vpop.f32.mrf.mxu1  ;;  %v1085_v26 = vpop.f32.mrf.mxu2  ;;  %v650_v43 = vmul.f32 %v501_v24, %v501_v24  ;;  %v611_v45 = vadd.f32 %v501_v24, %v499_v2 }
  0x9e   : > { %588 = vst [vmem:[%s1075_s14 + $0x48] sm:$0xff] %v1083_v25  ;;  %v658_v13 = vmul.f32 %v1083_v25, %v1083_v25 }
  0x9f   : > { %595 = vst [vmem:[%s1075_s14 + $0x80] sm:$0xff] %v1085_v26  ;;  %v681_v47 = vadd.f32 %v650_v43, %v649_v44 }
  0xa1   : > { %v1098_v30 = vpop.f32.mrf.mxu3 }
  0xa2   : > { %603 = vst [vmem:[%s1075_s14 + $0xc0] sm:$0xff] %v1098_v30 }
  0xa4   : > { %v504_v27 = vpop.f32.mrf.mxu0 }
  0xa5   : > { %581 = vst [vmem:[%s1075_s14 + $0x10] sm:$0xff] %v504_v27  ;;  %v1092_v28 = vpop.f32.mrf.mxu1  ;;  %v1094_v29 = vpop.f32.mrf.mxu2  ;;  %v651_v46 = vmul.f32 %v504_v27, %v504_v27  ;;  %v612_v48 = vadd.f32 %v611_v45, %v504_v27 }
  0xa6   : > { %589 = vst [vmem:[%s1075_s14 + $0x50] sm:$0xff] %v1092_v28  ;;  %v659_v16 = vmul.f32 %v1092_v28, %v1092_v28 }
  0xa7   : > { %596 = vst [vmem:[%s1075_s14 + $0x88] sm:$0xff] %v1094_v29  ;;  %v682_v51 = vadd.f32 %v681_v47, %v651_v46  ;;  %v665_v46 = vmul.f32 %v1085_v26, %v1085_v26 }
  0xa9   : > { %v1111_v34 = vpop.f32.mrf.mxu3 }
  0xaa   : > { %604 = vst [vmem:[%s1075_s14 + $0xc8] sm:$0xff] %v1111_v34 }
  0xac   : > { %v506_v31 = vpop.f32.mrf.mxu0 }
  0xad   : > { %582 = vst [vmem:[%s1075_s14 + $0x18] sm:$0xff] %v506_v31  ;;  %v1105_v32 = vpop.f32.mrf.mxu1  ;;  %v1107_v33 = vpop.f32.mrf.mxu2  ;;  %v652_v49 = vmul.f32 %v506_v31, %v506_v31  ;;  %v613_v52 = vadd.f32 %v612_v48, %v506_v31  ;;  %v666_v48 = vmul.f32 %v1094_v29, %v1094_v29 }
  0xae   : > { %590 = vst [vmem:[%s1075_s14 + $0x58] sm:$0xff] %v1105_v32  ;;  %v660_v19 = vmul.f32 %v1105_v32, %v1105_v32 }
  0xaf   : > { %597 = vst [vmem:[%s1075_s14 + $0x90] sm:$0xff] %v1107_v33  ;;  %v683_v57 = vadd.f32 %v682_v51, %v652_v49 }
  0xb1   : > { %v1124_v38 = vpop.f32.mrf.mxu3 }
  0xb2   : > { %605 = vst [vmem:[%s1075_s14 + $0xd0] sm:$0xff] %v1124_v38 }
  0xb4   : > { %v509_v35 = vpop.f32.mrf.mxu0 }
  0xb5   : > { %583 = vst [vmem:[%s1075_s14 + $0x20] sm:$0xff] %v509_v35  ;;  %v1118_v36 = vpop.f32.mrf.mxu1  ;;  %v1120_v37 = vpop.f32.mrf.mxu2  ;;  %v653_v53 = vmul.f32 %v509_v35, %v509_v35  ;;  %v614_v58 = vadd.f32 %v613_v52, %v509_v35 }
  0xb6   : > { %591 = vst [vmem:[%s1075_s14 + $0x60] sm:$0xff] %v1118_v36  ;;  %v661_v2 = vmul.f32 %v1118_v36, %v1118_v36 }
  0xb7   : > { %598 = vst [vmem:[%s1075_s14 + $0x98] sm:$0xff] %v1120_v37  ;;  %v684_v60 = vadd.f32 %v683_v57, %v653_v53  ;;  %v668_v53 = vmul.f32 %v1120_v37, %v1120_v37 }
  0xb9   : > { %v1137_v42 = vpop.f32.mrf.mxu3 }
  0xba   : > { %606 = vst [vmem:[%s1075_s14 + $0xd8] sm:$0xff] %v1137_v42 }
  0xbc   : > { %v511_v39 = vpop.f32.mrf.mxu0 }
  0xbd   : > { %584 = vst [vmem:[%s1075_s14 + $0x28] sm:$0xff] %v511_v39  ;;  %v1131_v40 = vpop.f32.mrf.mxu1  ;;  %v1133_v41 = vpop.f32.mrf.mxu2  ;;  %v654_v59 = vmul.f32 %v511_v39, %v511_v39  ;;  %v615_v61 = vadd.f32 %v614_v58, %v511_v39 }
  0xbe   : > { %592 = vst [vmem:[%s1075_s14 + $0x68] sm:$0xff] %v1131_v40  ;;  %v669_v57 = vmul.f32 %v1133_v41, %v1133_v41 }
  0xbf   : > { %599 = vst [vmem:[%s1075_s14 + $0xa0] sm:$0xff] %v1133_v41  ;;  %v685_v63 = vadd.f32 %v684_v60, %v654_v59 }
  0xc1   : > { %v1147_v56 = vpop.f32.mrf.mxu3 }
  0xc2   : > { %607 = vst [vmem:[%s1075_s14 + $0xe0] sm:$0xff] %v1147_v56 }
  0xc4   : > { %v514_v50 = vpop.f32.mrf.mxu0 }
  0xc5   : > { %585 = vst [vmem:[%s1075_s14 + $0x30] sm:$0xff] %v514_v50  ;;  %v534_v54 = vpop.f32.mrf.mxu1  ;;  %v1144_v55 = vpop.f32.mrf.mxu2  ;;  %v655_v62 = vmul.f32 %v514_v50, %v514_v50  ;;  %v616_v0 = vadd.f32 %v615_v61, %v514_v50  ;;  %v667_v50 = vmul.f32 %v1107_v33, %v1107_v33 }
  0xc6   : > { %593 = vst [vmem:[%s1075_s14 + $0x70] sm:$0xff] %v534_v54  ;;  %v663_v35 = vmul.f32 %v534_v54, %v534_v54  ;;  %v670_v60 = vmul.f32 %v1144_v55, %v1144_v55 }
  0xc7   : > { %600 = vst [vmem:[%s1075_s14 + $0xa8] sm:$0xff] %v1144_v55  ;;  %v686_v4 = vadd.f32 %v685_v63, %v655_v62 }
  0xc9   : > { %v1155_v9 = vpop.f32.mrf.mxu3 }
  0xca   : > { %608 = vst [vmem:[%s1075_s14 + $0xe8] sm:$0xff] %v1155_v9 }
  0xcc   : > { %v516_v1 = vpop.f32.mrf.mxu0 }
  0xcd   : > { %586 = vst [vmem:[%s1075_s14 + $0x38] sm:$0xff] %v516_v1  ;;  %v617_v5 = vadd.f32 %v616_v0, %v516_v1  ;;  %v656_v6 = vmul.f32 %v516_v1, %v516_v1  ;;  %v536_v7 = vpop.f32.mrf.mxu1  ;;  %v554_v8 = vpop.f32.mrf.mxu2 }
  0xce   : > { %594 = vst [vmem:[%s1075_s14 + $0x78] sm:$0xff] %v536_v7  ;;  %v664_v44 = vmul.f32 %v536_v7, %v536_v7  ;;  %v671_v63 = vmul.f32 %v554_v8, %v554_v8 }
  0xcf   : > { %v618_v11 = vadd.f32 %v617_v5, %v1078_v3  ;;  %v687_v12 = vadd.f32 %v686_v4, %v656_v6  ;;  %601 = vst [vmem:[%s1075_s14 + $0xb0] sm:$0xff] %v554_v8 }
  0xd1   : > { %v619_v14 = vadd.f32 %v618_v11, %v1083_v25  ;;  %v688_v15 = vadd.f32 %v687_v12, %v657_v10  ;;  %v574_v23 = vpop.f32.mrf.mxu3  ;;  %v662_v25 = vmul.f32 %v1131_v40, %v1131_v40  ;;  %v676_v12 = vmul.f32 %v1137_v42, %v1137_v42 }
  0xd2   : > { %609 = vst [vmem:[%s1075_s14 + $0xf0] sm:$0xff] %v574_v23 }
  0xd3   : > { %v620_v17 = vadd.f32 %v619_v14, %v1092_v28  ;;  %v689_v18 = vadd.f32 %v688_v15, %v658_v13  ;;  %v677_v14 = vmul.f32 %v1147_v56, %v1147_v56 }
  0xd5   : > { %v690_v20 = vadd.f32 %v689_v18, %v659_v16  ;;  %v621_v21 = vadd.f32 %v620_v17, %v1105_v32  ;;  %v556_v22 = vpop.f32.mrf.mxu2 }
  0xd6   : > { %602 = vst [vmem:[%s1075_s14 + $0xb8] sm:$0xff] %v556_v22  ;;  %v672_v4 = vmul.f32 %v556_v22, %v556_v22 }
  0xd7   : > { %v622_v3 = vadd.f32 %v621_v21, %v1118_v36  ;;  %v691_v24 = vadd.f32 %v690_v20, %v660_v19  ;;  %v679_v20 = vmul.f32 %v574_v23, %v574_v23 }
  0xd9   : > { %v623_v27 = vadd.f32 %v622_v3, %v1131_v40  ;;  %v692_v28 = vadd.f32 %v691_v24, %v661_v2  ;;  %v576_v45 = vpop.f32.mrf.mxu3 }
  0xda   : > { %610 = vst [vmem:[%s1075_s14 + $0xf8] sm:$0xff] %v576_v45  ;;  %v680_v2 = vmul.f32 %v576_v45, %v576_v45 }
  0xdb   : > { %v624_v31 = vadd.f32 %v623_v27, %v534_v54  ;;  %v693_v32 = vadd.f32 %v692_v28, %v662_v25 }
  0xdd   : > { %v694_v39 = vadd.f32 %v693_v32, %v663_v35  ;;  %v625_v43 = vadd.f32 %v624_v31, %v536_v7 }
  0xdf   : > { %v626_v36 = vadd.f32 %v625_v43, %v1085_v26  ;;  %v695_v47 = vadd.f32 %v694_v39, %v664_v44 }
  0xe1   : > { %v627_v40 = vadd.f32 %v626_v36, %v1094_v29  ;;  %v696_v49 = vadd.f32 %v695_v47, %v665_v46 }
  0xe3   : > { %v628_v51 = vadd.f32 %v627_v40, %v1107_v33  ;;  %v697_v52 = vadd.f32 %v696_v49, %v666_v48 }
  0xe5   : > { %v698_v54 = vadd.f32 %v697_v52, %v667_v50  ;;  %v629_v26 = vadd.f32 %v628_v51, %v1120_v37  ;;  %v673_v37 = vmul.f32 %v1098_v30, %v1098_v30 }
  0xe7   : > { %v630_v58 = vadd.f32 %v629_v26, %v1133_v41  ;;  %v699_v59 = vadd.f32 %v698_v54, %v668_v53  ;;  %v674_v41 = vmul.f32 %v1111_v34, %v1111_v34 }
  0xe9   : > { %v631_v29 = vadd.f32 %v630_v58, %v1144_v55  ;;  %v700_v61 = vadd.f32 %v699_v59, %v669_v57  ;;  %v675_v55 = vmul.f32 %v1124_v38, %v1124_v38 }
  0xeb   : > { %v701_v33 = vadd.f32 %v700_v61, %v670_v60  ;;  %v632_v62 = vadd.f32 %v631_v29, %v554_v8 }
  0xed   : > { %v702_v0 = vadd.f32 %v701_v33, %v671_v63  ;;  %v633_v1 = vadd.f32 %v632_v62, %v556_v22 }
  0xef   : > { %v634_v5 = vadd.f32 %v633_v1, %v1098_v30  ;;  %v703_v6 = vadd.f32 %v702_v0, %v672_v4 }
  0xf1   : > { %v635_v7 = vadd.f32 %v634_v5, %v1111_v34  ;;  %v704_v10 = vadd.f32 %v703_v6, %v673_v37 }
  0xf3   : > { %v636_v8 = vadd.f32 %v635_v7, %v1124_v38  ;;  %v705_v11 = vadd.f32 %v704_v10, %v674_v41  ;;  %v678_v38 = vmul.f32 %v1155_v9, %v1155_v9 }
  0xf5   : > { %v706_v13 = vadd.f32 %v705_v11, %v675_v55  ;;  %v637_v30 = vadd.f32 %v636_v8, %v1137_v42 }
  0xf7   : > { %v638_v15 = vadd.f32 %v637_v30, %v1147_v56  ;;  %v707_v34 = vadd.f32 %v706_v13, %v676_v12 }
  0xf9   : > { %v639_v16 = vadd.f32 %v638_v15, %v1155_v9  ;;  %v708_v17 = vadd.f32 %v707_v34, %v677_v14 }
  0xfb   : > { %v709_v18 = vadd.f32 %v708_v17, %v678_v38  ;;  %v640_v19 = vadd.f32 %v639_v16, %v574_v23 }
  0xfd   : > { %v710_v21 = vadd.f32 %v709_v18, %v679_v20  ;;  %v641_v22 = vadd.f32 %v640_v19, %v576_v45 }
  0xff   : > { %v642_v42 = vrot.slane %v641_v22, 4  ;;  %v711_v3 = vadd.f32 %v710_v21, %v680_v2 }
 0x101   : > { %v643_v24 = vadd.f32 %v642_v42, %v641_v22  ;;  %v712_v25 = vrot.slane %v711_v3, 4 }
 0x103   : > { %v644_v56 = vrot.slane %v643_v24, 2  ;;  %v713_v27 = vadd.f32 %v712_v25, %v711_v3 }
 0x105   : > { %v645_v28 = vadd.f32 %v644_v56, %v643_v24  ;;  %v714_v31 = vrot.slane %v713_v27, 2 }
 0x107   : > { %v646_v35 = vrot.slane %v645_v28, 1  ;;  %v715_v32 = vadd.f32 %v714_v31, %v713_v27 }
 0x109   : > { %v647_v9 = vadd.f32 %v646_v35, %v645_v28  ;;  %v716_v23 = vrot.slane %v715_v32, 1 }
 0x10b   : > { %648 = vst [vmem:[%s268_s17] sm:$0x1] %v647_v9  ;;  %v717_v39 = vadd.f32 %v716_v23, %v715_v32 }
 0x10d   : > { %718 = vst [vmem:[%s271_s20] sm:$0x1] %v717_v39 }
 0x10e PF: > { %s17_s21 = sadd.s32 1, %s884_s21  }
 0x10f   : > { %p14_p5 = scmp.ge.s32.totalorder %s17_s21, 4  }
 0x111   :  { %16 = sbr.rel (!%p14_p5) target bundleno = 1 (0x1), region = 90 }

// kernel: bottleneck_forward.5
= control target key start
LH: loop header
LB: loop body
LE: loop exit
PB: predicated region body
PF: predicated region fallthrough
CT: control target
= control target key end

     0   :  { %s3893_s21 = smov 0   ;;  %s5089_s0 = inlined_call_operand.vmem [shape: f32[2,16,16,32], index: 0, kind: input, shape index: {}]   ;;  %s5090_s1 = inlined_call_operand.vmem [shape: f32[1,32], index: 1, kind: input, shape index: {}]   ;;  %s5091_s2 = inlined_call_operand.vmem [shape: f32[1,32], index: 2, kind: input, shape index: {}]   ;;  %s5092_s3 = inlined_call_operand.vmem [shape: bf16[9,32,32], index: 3, kind: input, shape index: {}]   ;;  %s5093_s4 = inlined_call_operand.vmem [shape: f32[2,16,16,32], index: 4, kind: output, shape index: {0}]   ;;  %s5094_s5 = inlined_call_operand.vmem [shape: f32[2,1,32], index: 5, kind: output, shape index: {1}]   ;;  %s5095_s6 = inlined_call_operand.vmem [shape: f32[2,1,32], index: 6, kind: output, shape index: {2}]  }
   0x1 LB: > { %s3551_s22 = sadd.s32 4294967295, %s3855_s21   ;;  %p3555_p0 = scmp.ge.s32.totalorder %s3855_s21, 1  ;;  %s3855_s21 = sphi %s3893_s21, %s17_s21  }
   0x2   : > { %p217_p1 = scmp.lt.s32.totalorder %s3855_s21, 3 }
   0x4   : > { %p218_p2 = pnand %p3555_p0, %p217_p1 }
   0x5   : > { %p253_p3 = scmp.lt.s32.totalorder (!%p218_p2), %s3551_s22, 1 }
   0x6   : > { %221 = sbr.rel (%p218_p2) target bundleno = 860 (0x35c), region = 36 }
   0xb   : > { %v3813_v0 = vld [vmem:[%s5092_s3 + $0x8] sm:$0xff]  ;;  %vm406_vm0 = vcmask 261120   ;;  %v3812_v1 = vld [vmem:[%s5092_s3] sm:$0xff]  ;;  %s5097_s22 = smov (!%p253_p3, %s3551_s22), 1  ;;  %vm409_vm1 = vcmask 254976   ;;  %v3857_v3 = vmov 0.0  }
   0xc   : > { %3830 = vmatpush.bf16.msra.mxu1 %v3813_v0  ;;  %3831 = vmatpush.bf16.msra.mxu2 %v3813_v0  ;;  %v3912_v2 = vld [vmem:[%s5090_s1] ss:$0 sm:$0xff]  ;;  %420 = vst.msk [vmem:[#allocation2 + $0x60] sm:$0xff] %vm406_vm0, %v3857_v3  ;;  %s3810_s29 = sshll.u32 %s5097_s22, 8  ;;  %v3815_v16 = vld [vmem:[%s5092_s3 + $0x18] sm:$0xff]  ;;  %v3817_v17 = vld [vmem:[%s5092_s3 + $0x28] sm:$0xff]  ;;  %s265_s10 = scalar_lea.vmem %s5094_s5, %s5097_s22 }
   0xd   : > { %3832 = vmatpush.bf16.msra.mxu3 %v3813_v0  ;;  %677 = vmatpush.bf16.msra.mxu0 %v3813_v0  ;;  %421 = vst.msk [vmem:[#allocation2 + $0x68] sm:$0xff] %vm406_vm0, %v3857_v3  ;;  %s3924_s8 = scalar_lea.vmem %s5089_s0, %s3810_s29  ;;  %v3929_v4 = vld [vmem:[%s5091_s2] ss:$0 sm:$0xff]  ;;  %v3819_v18 = vld [vmem:[%s5092_s3 + $0x38] sm:$0xff]  ;;  %v3821_v52 = vld [vmem:[%s5092_s3 + $0x48] sm:$0xff]  ;;  %s4717_s7 = scalar_lea.vmem %s5093_s4, %s3810_s29  ;;  %vm3342_vm2 = vcmask 253952  }
   0xe   : > { %422 = vst.msk [vmem:[#allocation2 + $0x70] sm:$0x3] %vm409_vm1, %v3857_v3  ;;  %v276_v5 = vld [vmem:[%s3924_s8 + $0x30] sm:$0xff]  ;;  %v277_v6 = vld [vmem:[%s3924_s8 + $0x38] sm:$0xff]  ;;  %v278_v25 = vld [vmem:[%s3924_s8 + $0x40] sm:$0xff]  ;;  %s268_s13 = scalar_lea.vmem %s5095_s6, %s5097_s22 }
   0xf   : > { %407 = vst.msk [vmem:[#allocation2] sm:$0xff] %vm406_vm0, %v3857_v3  ;;  %v312_v7 = vmul.f32 %v3912_v2, %v276_v5  ;;  %v313_v8 = vmul.f32 %v3912_v2, %v277_v6  ;;  %v284_v19 = vld [vmem:[%s3924_s8 + $0x70] sm:$0xff]  ;;  %v285_v20 = vld [vmem:[%s3924_s8 + $0x78] sm:$0xff]  ;;  %v279_v27 = vld [vmem:[%s3924_s8 + $0x48] sm:$0xff]  ;;  %v314_v31 = vmul.f32 %v3912_v2, %v278_v25 }
  0x10   : > { %3833 = vmatpush.bf16.msra.mxu1 %v3812_v1  ;;  %3834 = vmatpush.bf16.msra.mxu2 %v3812_v1  ;;  %408 = vst.msk [vmem:[#allocation2 + $0x8] sm:$0xff] %vm406_vm0, %v3857_v3  ;;  %v292_v21 = vld [vmem:[%s3924_s8 + $0xb0] sm:$0xff]  ;;  %v320_v22 = vmul.f32 %v3912_v2, %v284_v19  ;;  %v293_v23 = vld [vmem:[%s3924_s8 + $0xb8] sm:$0xff]  ;;  %v321_v24 = vmul.f32 %v3912_v2, %v285_v20  ;;  %v286_v29 = vld [vmem:[%s3924_s8 + $0x80] sm:$0xff] }
  0x11   : > { %3835 = vmatpush.bf16.msra.mxu3 %v3812_v1  ;;  %678 = vmatpush.bf16.msra.mxu0 %v3812_v1  ;;  %410 = vst.msk [vmem:[#allocation2 + $0x10] sm:$0x3] %vm409_vm1, %v3857_v3  ;;  %v348_v9 = vadd.f32 %v3929_v4, %v312_v7  ;;  %v349_v10 = vadd.f32 %v3929_v4, %v313_v8  ;;  %v287_v32 = vld [vmem:[%s3924_s8 + $0x88] sm:$0xff]  ;;  %v294_v35 = vld [vmem:[%s3924_s8 + $0xc0] sm:$0xff]  ;;  %v280_v43 = vld [vmem:[%s3924_s8 + $0x50] sm:$0xff] }
  0x12   : > { %411 = vst.msk [vmem:[#allocation2 + $0x18] sm:$0xff] %vm406_vm0, %v3857_v3  ;;  %v328_v26 = vmul.f32 %v3912_v2, %v292_v21  ;;  %v329_v28 = vmul.f32 %v3912_v2, %v293_v23  ;;  %v356_v30 = vadd.f32 %v3929_v4, %v320_v22  ;;  %v357_v33 = vadd.f32 %v3929_v4, %v321_v24  ;;  %v295_v38 = vld [vmem:[%s3924_s8 + $0xc8] sm:$0xff]  ;;  %v281_v48 = vld [vmem:[%s3924_s8 + $0x58] sm:$0xff]  ;;  %v288_v53 = vld [vmem:[%s3924_s8 + $0x90] sm:$0xff] }
  0x13   : > { %412 = vst.msk [vmem:[#allocation2 + $0x20] sm:$0xff] %vm406_vm0, %v3857_v3  ;;  %v380_v11 = vmax.f32 %v348_v9, 0.0  ;;  %v381_v12 = vmax.f32 %v349_v10, 0.0  ;;  %v315_v34 = vmul.f32 %v3912_v2, %v279_v27  ;;  %v322_v37 = vmul.f32 %v3912_v2, %v286_v29  ;;  %v289_v57 = vld [vmem:[%s3924_s8 + $0x98] sm:$0xff]  ;;  %v270_v0 = vld [vmem:[%s3924_s8] sm:$0xff]  ;;  %v271_v1 = vld [vmem:[%s3924_s8 + $0x8] sm:$0xff] }
  0x14   : > { %413 = vst.msk [vmem:[#allocation2 + $0x28] sm:$0x3] %vm409_vm1, %v3857_v3  ;;  %975 = vmatpush.bf16.msrb.mxu1 %v3815_v16  ;;  %1273 = vmatpush.bf16.msrb.mxu2 %v3817_v17  ;;  %v364_v36 = vadd.f32 %v3929_v4, %v328_v26  ;;  %v365_v39 = vadd.f32 %v3929_v4, %v329_v28  ;;  %v388_v44 = vmax.f32 %v356_v30, 0.0  ;;  %v389_v49 = vmax.f32 %v357_v33, 0.0  ;;  %v296_v7 = vld [vmem:[%s3924_s8 + $0xd0] sm:$0xff]  ;;  %v297_v8 = vld [vmem:[%s3924_s8 + $0xd8] sm:$0xff] }
  0x15   : > { %414 = vst.msk [vmem:[#allocation2 + $0x30] sm:$0xff] %vm406_vm0, %v3857_v3  ;;  %1571 = vmatpush.bf16.msrb.mxu3 %v3819_v18  ;;  %v323_v40 = vmul.f32 %v3912_v2, %v287_v32  ;;  %v350_v45 = vadd.f32 %v3929_v4, %v314_v31  ;;  %v330_v47 = vmul.f32 %v3912_v2, %v294_v35 }
  0x16   : > { %469 = vst.msk [vmem:[#allocation2 + $0x61] sm:$0xff] %vm406_vm0, %v380_v11  ;;  %v527_v41 = vld [vmem:[#allocation2] sm:$0xff]  ;;  %v351_v50 = vadd.f32 %v3929_v4, %v315_v34  ;;  %v331_v51 = vmul.f32 %v3912_v2, %v295_v38  ;;  %v396_v54 = vmax.f32 %v364_v36, 0.0  ;;  %v358_v55 = vadd.f32 %v3929_v4, %v322_v37  ;;  %1869 = vmatpush.bf16.msrb.mxu0 %v3821_v52  ;;  %v283_v37 = vld [vmem:[%s3924_s8 + $0x68] sm:$0xff] }
  0x17   : > { %470 = vst.msk [vmem:[#allocation2 + $0x69] sm:$0xff] %vm406_vm0, %v381_v12  ;;  %v528_v42 = vld [vmem:[#allocation2 + $0x8] sm:$0xff]  ;;  %v316_v56 = vmul.f32 %v3912_v2, %v280_v43  ;;  %v397_v58 = vmax.f32 %v365_v39, 0.0  ;;  %v359_v59 = vadd.f32 %v3929_v4, %v323_v40  ;;  %v317_v60 = vmul.f32 %v3912_v2, %v281_v48  ;;  %v282_v36 = vld [vmem:[%s3924_s8 + $0x60] sm:$0xff]  ;;  %v3814_v40 = vld [vmem:[%s5092_s3 + $0x10] sm:$0xff] }
  0x18   : > { %415 = vst.msk [vmem:[#allocation2 + $0x38] sm:$0xff] %vm406_vm0, %v3857_v3  ;;  %v591_v46 = vpack.c.bf16 %v528_v42, %v527_v41  ;;  %v382_v61 = vmax.f32 %v350_v45, 0.0  ;;  %v366_v62 = vadd.f32 %v3929_v4, %v330_v47  ;;  %v324_v63 = vmul.f32 %v3912_v2, %v288_v53  ;;  %v3816_v41 = vld [vmem:[%s5092_s3 + $0x20] sm:$0xff]  ;;  %976 = vmatpush.bf16.msrb.mxu1 %v3814_v40 }
  0x19   : > { %416 = vst.msk [vmem:[#allocation2 + $0x40] sm:$0x3] %vm409_vm1, %v3857_v3  ;;  %v383_v5 = vmax.f32 %v351_v50, 0.0  ;;  %v325_v6 = vmul.f32 %v3912_v2, %v289_v57  ;;  %v390_v9 = vmax.f32 %v358_v55, 0.0  ;;  %v352_v10 = vadd.f32 %v3929_v4, %v316_v56  ;;  %v290_v48 = vld [vmem:[%s3924_s8 + $0xa0] sm:$0xff]  ;;  %1274 = vmatpush.bf16.msrb.mxu2 %v3816_v41 }
  0x1a   : > { %417 = vst.msk [vmem:[#allocation2 + $0x48] sm:$0xff] %vm406_vm0, %v3857_v3  ;;  %3568 = vmatmul.msk.bf16.vlgmr.msra.gmra.mxu0 %vm406_vm0, %v591_v46  ;;  %v306_v11 = vmul.f32 %v3912_v2, %v270_v0  ;;  %v391_v12 = vmax.f32 %v359_v59, 0.0  ;;  %v398_v16 = vmax.f32 %v366_v62, 0.0  ;;  %v360_v17 = vadd.f32 %v3929_v4, %v324_v63  ;;  %v298_v0 = vld [vmem:[%s3924_s8 + $0xe0] sm:$0xff] }
  0x1b   : > { %418 = vst.msk [vmem:[#allocation2 + $0x50] sm:$0xff] %vm406_vm0, %v3857_v3  ;;  %v332_v18 = vmul.f32 %v3912_v2, %v296_v7  ;;  %v333_v19 = vmul.f32 %v3912_v2, %v297_v8  ;;  %v361_v21 = vadd.f32 %v3929_v4, %v325_v6  ;;  %v384_v22 = vmax.f32 %v352_v10, 0.0 }
  0x1c   : > { %419 = vst.msk [vmem:[#allocation2 + $0x58] sm:$0x3] %vm409_vm1, %v3857_v3  ;;  %v342_v23 = vadd.f32 %v3929_v4, %v306_v11  ;;  %v392_v28 = vmax.f32 %v360_v17, 0.0  ;;  %v318_v43 = vmul.f32 %v3912_v2, %v282_v36  ;;  %v334_v6 = vmul.f32 %v3912_v2, %v298_v0 }
  0x1d   : > { %v535_v13 = vld [vmem:[#allocation2 + $0x60] sm:$0xff]  ;;  %423 = vst.msk [vmem:[#allocation2 + $0x78] sm:$0xff] %vm406_vm0, %v3857_v3  ;;  %v368_v29 = vadd.f32 %v3929_v4, %v332_v18  ;;  %v369_v30 = vadd.f32 %v3929_v4, %v333_v19  ;;  %v393_v33 = vmax.f32 %v361_v21, 0.0 }
  0x1e   : > { %v536_v14 = vld [vmem:[#allocation2 + $0x68] sm:$0xff]  ;;  %424 = vst.msk [vmem:[#allocation2 + $0x80] sm:$0xff] %vm406_vm0, %v3857_v3  ;;  %v374_v35 = vmax.f32 %v342_v23, 0.0  ;;  %v354_v52 = vadd.f32 %v3929_v4, %v318_v43 }
  0x1f   : > { %v3969_v15 = vpack.c.bf16 %v536_v14, %v535_v13  ;;  %425 = vst.msk [vmem:[#allocation2 + $0x88] sm:$0x3] %vm409_vm1, %v3857_v3  ;;  %v353_v13 = vadd.f32 %v3929_v4, %v317_v60  ;;  %v307_v14 = vmul.f32 %v3912_v2, %v271_v1  ;;  %v400_v46 = vmax.f32 %v368_v29, 0.0  ;;  %v272_v60 = vld [vmem:[%s3924_s8 + $0x10] sm:$0xff]  ;;  %v299_v1 = vld [vmem:[%s3924_s8 + $0xe8] sm:$0xff]  ;;  %v3820_v29 = vld [vmem:[%s5092_s3 + $0x40] sm:$0xff] }
  0x20   : > { %426 = vst.msk [vmem:[#allocation2 + $0x90] sm:$0xff] %vm406_vm0, %v3857_v3  ;;  %v401_v47 = vmax.f32 %v369_v30, 0.0  ;;  %v386_v56 = vmax.f32 %v354_v52, 0.0  ;;  %v308_v62 = vmul.f32 %v3912_v2, %v272_v60  ;;  %v335_v7 = vmul.f32 %v3912_v2, %v299_v1  ;;  %1870 = vmatpush.bf16.msrb.mxu0 %v3820_v29  ;;  %v274_v30 = vld [vmem:[%s3924_s8 + $0x20] sm:$0xff]  ;;  %v3827_v52 = vld [vmem:[%s5092_s3 + $0x78] sm:$0xff]  ;;  %v3829_v1 = vld [vmem:[%s5092_s3 + $0x88] sm:$0xff] }
  0x21   : > { %3572 = vmatmul.msk.bf16.vlgmr.msra.gmra.mxu1 %vm406_vm0, %v3969_v15  ;;  %427 = vst.msk [vmem:[#allocation2 + $0x98] sm:$0xff] %vm406_vm0, %v3857_v3  ;;  %v385_v25 = vmax.f32 %v353_v13, 0.0  ;;  %v343_v26 = vadd.f32 %v3929_v4, %v307_v14 }
  0x22   : > { %428 = vst.msk [vmem:[#allocation2 + $0xa0] sm:$0x3] %vm409_vm1, %v3857_v3  ;;  %v344_v8 = vadd.f32 %v3929_v4, %v308_v62  ;;  %v371_v13 = vadd.f32 %v3929_v4, %v335_v7  ;;  %v825_v62 = vld [vmem:[#allocation2 + $0x9] sm:$0xff] }
  0x23   : > { %429 = vst.msk [vmem:[#allocation2 + $0xa8] sm:$0xff] %vm406_vm0, %v3857_v3  ;;  %v375_v42 = vmax.f32 %v343_v26, 0.0 }
  0x24   : > { %430 = vst.msk [vmem:[#allocation2 + $0xb0] sm:$0xff] %vm406_vm0, %v3857_v3  ;;  %3062 = vmatpush.bf16.msra.mxu0 %v3829_v1 }
  0x25   : > { %431 = vst.msk [vmem:[#allocation2 + $0xb8] sm:$0x3] %vm409_vm1, %v3857_v3 }
  0x26   : > { %432 = vst.msk [vmem:[#allocation2 + $0xc0] sm:$0xff] %vm406_vm0, %v3857_v3 }
  0x27   : > { %433 = vst.msk [vmem:[#allocation2 + $0xc8] sm:$0xff] %vm406_vm0, %v3857_v3 }
  0x28   : > { %434 = vst.msk [vmem:[#allocation2 + $0xd0] sm:$0x3] %vm409_vm1, %v3857_v3 }
  0x29   : > { %435 = vst.msk [vmem:[#allocation2 + $0xd8] sm:$0xff] %vm406_vm0, %v3857_v3 }
  0x2a   : > { %436 = vst.msk [vmem:[#allocation2 + $0xe0] sm:$0xff] %vm406_vm0, %v3857_v3 }
  0x2b   : > { %437 = vst.msk [vmem:[#allocation2 + $0xe8] sm:$0x3] %vm409_vm1, %v3857_v3 }
  0x2c   : > { %438 = vst.msk [vmem:[#allocation2 + $0xf0] sm:$0xff] %vm406_vm0, %v3857_v3 }
  0x2d   : > { %439 = vst.msk [vmem:[#allocation2 + $0xf8] sm:$0xff] %vm406_vm0, %v3857_v3 }
  0x2e   : > { %440 = vst.msk [vmem:[#allocation2 + $0x100] sm:$0x3] %vm409_vm1, %v3857_v3 }
  0x2f   : > { %441 = vst.msk [vmem:[#allocation2 + $0x108] sm:$0xff] %vm406_vm0, %v3857_v3 }
  0x30   : > { %442 = vst.msk [vmem:[#allocation2 + $0x110] sm:$0xff] %vm406_vm0, %v3857_v3 }
  0x31   : > { %443 = vst.msk [vmem:[#allocation2 + $0x118] sm:$0x3] %vm409_vm1, %v3857_v3 }
  0x32   : > { %444 = vst.msk [vmem:[#allocation2 + $0x120] sm:$0xff] %vm406_vm0, %v3857_v3 }
  0x33   : > { %445 = vst.msk [vmem:[#allocation2 + $0x128] sm:$0xff] %vm406_vm0, %v3857_v3 }
  0x34   : > { %446 = vst.msk [vmem:[#allocation2 + $0x130] sm:$0x3] %vm409_vm1, %v3857_v3 }
  0x35   : > { %447 = vst.msk [vmem:[#allocation2 + $0x138] sm:$0xff] %vm406_vm0, %v3857_v3 }
  0x36   : > { %448 = vst.msk [vmem:[#allocation2 + $0x140] sm:$0xff] %vm406_vm0, %v3857_v3 }
  0x37   : > { %449 = vst.msk [vmem:[#allocation2 + $0x148] sm:$0x3] %vm409_vm1, %v3857_v3 }
  0x38   : > { %450 = vst.msk [vmem:[#allocation2 + $0x150] sm:$0xff] %vm406_vm0, %v3857_v3 }
  0x39   : > { %451 = vst.msk [vmem:[#allocation2 + $0x158] sm:$0xff] %vm406_vm0, %v3857_v3 }
  0x3a   : > { %452 = vst.msk [vmem:[#allocation2 + $0x160] sm:$0x3] %vm409_vm1, %v3857_v3 }
  0x3b   : > { %453 = vst.msk [vmem:[#allocation2 + $0x168] sm:$0xff] %vm406_vm0, %v3857_v3 }
  0x3c   : > { %454 = vst.msk [vmem:[#allocation2 + $0x170] sm:$0xff] %vm406_vm0, %v3857_v3 }
  0x3d   : > { %455 = vst.msk [vmem:[#allocation2 + $0x178] sm:$0x3] %vm409_vm1, %v3857_v3 }
  0x3e   : > { %456 = vst.msk [vmem:[#allocation2 + $0x180] sm:$0xff] %vm406_vm0, %v3857_v3 }
  0x3f   : > { %457 = vst.msk [vmem:[#allocation2 + $0x188] sm:$0xff] %vm406_vm0, %v3857_v3 }
  0x40   : > { %458 = vst.msk [vmem:[#allocation2 + $0x190] sm:$0x3] %vm409_vm1, %v3857_v3 }
  0x41   : > { %459 = vst.msk [vmem:[#allocation2 + $0x198] sm:$0xff] %vm406_vm0, %v3857_v3 }
  0x42   : > { %460 = vst.msk [vmem:[#allocation2 + $0x1a0] sm:$0xff] %vm406_vm0, %v3857_v3 }
  0x43   : > { %461 = vst.msk [vmem:[#allocation2 + $0x1a8] sm:$0x3] %vm409_vm1, %v3857_v3 }
  0x44   : > { %495 = vst.msk [vmem:[#allocation3] sm:$0xff] %vm406_vm0, %v3857_v3 }
  0x45   : > { %496 = vst.msk [vmem:[#allocation3 + $0x8] sm:$0xff] %vm406_vm0, %v3857_v3 }
  0x46   : > { %497 = vst.msk [vmem:[#allocation3 + $0x10] sm:$0xff] %vm406_vm0, %v3857_v3 }
  0x47   : > { %498 = vst.msk [vmem:[#allocation3 + $0x18] sm:$0xff] %vm406_vm0, %v3857_v3 }
  0x48   : > { %499 = vst.msk [vmem:[#allocation3 + $0x20] sm:$0xff] %vm406_vm0, %v3857_v3 }
  0x49   : > { %500 = vst.msk [vmem:[#allocation3 + $0x28] sm:$0xff] %vm406_vm0, %v3857_v3 }
  0x4a   : > { %501 = vst.msk [vmem:[#allocation3 + $0x30] sm:$0xff] %vm406_vm0, %v3857_v3 }
  0x4b   : > { %502 = vst.msk [vmem:[#allocation3 + $0x38] sm:$0xff] %vm406_vm0, %v3857_v3 }
  0x4c   : > { %503 = vst.msk [vmem:[#allocation3 + $0x40] sm:$0xff] %vm406_vm0, %v3857_v3 }
  0x4d   : > { %504 = vst.msk [vmem:[#allocation3 + $0x48] sm:$0xff] %vm406_vm0, %v3857_v3 }
  0x4e   : > { %505 = vst.msk [vmem:[#allocation3 + $0x50] sm:$0xff] %vm406_vm0, %v3857_v3 }
  0x4f   : > { %506 = vst.msk [vmem:[#allocation3 + $0x58] sm:$0xff] %vm406_vm0, %v3857_v3 }
  0x50   : > { %507 = vst.msk [vmem:[#allocation3 + $0x60] sm:$0xff] %vm406_vm0, %v3857_v3 }
  0x51   : > { %508 = vst.msk [vmem:[#allocation3 + $0x68] sm:$0xff] %vm406_vm0, %v3857_v3 }
  0x52   : > { %509 = vst.msk [vmem:[#allocation3 + $0x70] sm:$0xff] %vm406_vm0, %v3857_v3 }
  0x53   : > { %510 = vst.msk [vmem:[#allocation3 + $0x78] sm:$0xff] %vm406_vm0, %v3857_v3 }
  0x54   : > { %511 = vst.msk [vmem:[#allocation3 + $0x80] sm:$0xff] %vm406_vm0, %v3857_v3 }
  0x55   : > { %512 = vst.msk [vmem:[#allocation3 + $0x88] sm:$0xff] %vm406_vm0, %v3857_v3 }
  0x56   : > { %513 = vst.msk [vmem:[#allocation3 + $0x90] sm:$0xff] %vm406_vm0, %v3857_v3 }
  0x57   : > { %514 = vst.msk [vmem:[#allocation3 + $0x98] sm:$0xff] %vm406_vm0, %v3857_v3 }
  0x58   : > { %515 = vst.msk [vmem:[#allocation3 + $0xa0] sm:$0xff] %vm406_vm0, %v3857_v3 }
  0x59   : > { %516 = vst.msk [vmem:[#allocation3 + $0xa8] sm:$0xff] %vm406_vm0, %v3857_v3 }
  0x5a   : > { %517 = vst.msk [vmem:[#allocation3 + $0xb0] sm:$0xff] %vm406_vm0, %v3857_v3 }
  0x5b   : > { %518 = vst.msk [vmem:[#allocation3 + $0xb8] sm:$0xff] %vm406_vm0, %v3857_v3 }
  0x5c   : > { %519 = vst.msk [vmem:[#allocation3 + $0xc0] sm:$0xff] %vm406_vm0, %v3857_v3 }
  0x5d   : > { %520 = vst.msk [vmem:[#allocation3 + $0xc8] sm:$0xff] %vm406_vm0, %v3857_v3 }
  0x5e   : > { %521 = vst.msk [vmem:[#allocation3 + $0xd0] sm:$0xff] %vm406_vm0, %v3857_v3 }
  0x5f   : > { %522 = vst.msk [vmem:[#allocation3 + $0xd8] sm:$0xff] %vm406_vm0, %v3857_v3 }
  0x60   : > { %523 = vst.msk [vmem:[#allocation3 + $0xe0] sm:$0xff] %vm406_vm0, %v3857_v3 }
  0x61   : > { %524 = vst.msk [vmem:[#allocation3 + $0xe8] sm:$0xff] %vm406_vm0, %v3857_v3 }
  0x62   : > { %525 = vst.msk [vmem:[#allocation3 + $0xf0] sm:$0xff] %vm406_vm0, %v3857_v3 }
  0x63   : > { %526 = vst.msk [vmem:[#allocation3 + $0xf8] sm:$0xff] %vm406_vm0, %v3857_v3  ;;  %v367_v3 = vadd.f32 %v3929_v4, %v331_v51  ;;  %v3818_v51 = vld [vmem:[%s5092_s3 + $0x30] sm:$0xff] }
  0x64   : > { %477 = vst.msk [vmem:[#allocation2 + $0xc1] sm:$0xff] %vm406_vm0, %v388_v44  ;;  %v319_v44 = vmul.f32 %v3912_v2, %v283_v37  ;;  %1572 = vmatpush.bf16.msrb.mxu3 %v3818_v51  ;;  %v3825_v51 = vld [vmem:[%s5092_s3 + $0x68] sm:$0xff] }
  0x65   : > { %478 = vst.msk [vmem:[#allocation2 + $0xc9] sm:$0xff] %vm406_vm0, %v389_v49  ;;  %v399_v20 = vmax.f32 %v367_v3, 0.0  ;;  %v291_v49 = vld [vmem:[%s3924_s8 + $0xa8] sm:$0xff] }
  0x66   : > { %485 = vst.msk [vmem:[#allocation2 + $0x121] sm:$0xff] %vm406_vm0, %v396_v54  ;;  %v355_v53 = vadd.f32 %v3929_v4, %v319_v44  ;;  %v326_v54 = vmul.f32 %v3912_v2, %v290_v48  ;;  %v327_v55 = vmul.f32 %v3912_v2, %v291_v49  ;;  %v3823_v49 = vld [vmem:[%s5092_s3 + $0x58] sm:$0xff] }
  0x67   : > { %486 = vst.msk [vmem:[#allocation2 + $0x129] sm:$0xff] %vm406_vm0, %v397_v58  ;;  %2167 = vmatpush.bf16.msra.mxu1 %v3823_v49 }
  0x68   : > { %471 = vst.msk [vmem:[#allocation2 + $0x79] sm:$0xff] %vm406_vm0, %v382_v61  ;;  %v387_v57 = vmax.f32 %v355_v53, 0.0  ;;  %v362_v58 = vadd.f32 %v3929_v4, %v326_v54  ;;  %v363_v59 = vadd.f32 %v3929_v4, %v327_v55  ;;  %v273_v61 = vld [vmem:[%s3924_s8 + $0x18] sm:$0xff] }
  0x69   : > { %472 = vst.msk [vmem:[#allocation2 + $0x81] sm:$0xff] %vm406_vm0, %v383_v5  ;;  %v309_v63 = vmul.f32 %v3912_v2, %v273_v61  ;;  %v824_v61 = vld [vmem:[#allocation2 + $0x1] sm:$0xff] }
  0x6a   : > { %479 = vst.msk [vmem:[#allocation2 + $0xd9] sm:$0xff] %vm406_vm0, %v390_v9  ;;  %v394_v5 = vmax.f32 %v362_v58, 0.0  ;;  %v395_v3 = vmax.f32 %v363_v59, 0.0  ;;  %v888_v0 = vpack.c.bf16 %v825_v62, %v824_v61  ;;  %v576_v61 = vld [vmem:[#allocation3 + $0x88] sm:$0xff] }
  0x6b   : > { %v543_v24 = vld [vmem:[#allocation2 + $0xc0] sm:$0xff]  ;;  %480 = vst.msk [vmem:[#allocation2 + $0xe1] sm:$0xff] %vm406_vm0, %v391_v12  ;;  %v345_v9 = vadd.f32 %v3929_v4, %v309_v63  ;;  %v370_v12 = vadd.f32 %v3929_v4, %v334_v6 }
  0x6c   : > { %v544_v27 = vld [vmem:[#allocation2 + $0xc8] sm:$0xff]  ;;  %487 = vst.msk [vmem:[#allocation2 + $0x139] sm:$0xff] %vm406_vm0, %v398_v16  ;;  %v376_v16 = vmax.f32 %v344_v8, 0.0 }
  0x6d   : > { %v4187_v31 = vpack.c.bf16 %v544_v27, %v543_v24  ;;  %v551_v32 = vld [vmem:[#allocation2 + $0x120] sm:$0xff]  ;;  %488 = vst.msk [vmem:[#allocation2 + $0x141] sm:$0xff] %vm406_vm0, %v399_v20  ;;  %v377_v17 = vmax.f32 %v345_v9, 0.0  ;;  %v402_v21 = vmax.f32 %v370_v12, 0.0 }
  0x6e   : > { %v552_v34 = vld [vmem:[#allocation2 + $0x128] sm:$0xff]  ;;  %473 = vst.msk [vmem:[#allocation2 + $0x91] sm:$0xff] %vm406_vm0, %v384_v22  ;;  %v403_v22 = vmax.f32 %v371_v13, 0.0 }
  0x6f   : > { %3576 = vmatmul.msk.bf16.vlgmr.msra.gmra.mxu2 %vm406_vm0, %v4187_v31  ;;  %v603_v38 = vpack.c.bf16 %v552_v34, %v551_v32  ;;  %v537_v39 = vld [vmem:[#allocation2 + $0x78] sm:$0xff]  ;;  %474 = vst.msk [vmem:[#allocation2 + $0x99] sm:$0xff] %vm406_vm0, %v385_v25  ;;  %v275_v32 = vld [vmem:[%s3924_s8 + $0x28] sm:$0xff] }
  0x70   : > { %v538_v45 = vld [vmem:[#allocation2 + $0x80] sm:$0xff]  ;;  %481 = vst.msk [vmem:[#allocation2 + $0xf1] sm:$0xff] %vm406_vm0, %v392_v28  ;;  %v311_v34 = vmul.f32 %v3912_v2, %v275_v32  ;;  %2466 = vmatpush.bf16.msra.mxu2 %v3825_v51 }
  0x71   : > { %3580 = vmatmul.msk.bf16.vlgmr.msra.gmra.mxu3 %vm406_vm0, %v603_v38  ;;  %v4208_v50 = vpack.c.bf16 %v538_v45, %v537_v39  ;;  %482 = vst.msk [vmem:[#allocation2 + $0xf9] sm:$0xff] %vm406_vm0, %v393_v33  ;;  %v545_v10 = vld [vmem:[#allocation2 + $0xd8] sm:$0xff]  ;;  %v310_v33 = vmul.f32 %v3912_v2, %v274_v30  ;;  %v569_v51 = vld [vmem:[#allocation3 + $0x50] sm:$0xff] }
  0x72   : > { %463 = vst.msk [vmem:[#allocation2 + $0x19] sm:$0xff] %vm406_vm0, %v374_v35  ;;  %v546_v11 = vld [vmem:[#allocation2 + $0xe0] sm:$0xff]  ;;  %v347_v38 = vadd.f32 %v3929_v4, %v311_v34  ;;  %2764 = vmatpush.bf16.msra.mxu3 %v3827_v52 }
  0x73   : > { %3573 = vmatmul.msk.bf16.gmra.mxu1 %vm406_vm0, %v4208_v50  ;;  %464 = vst.msk [vmem:[#allocation2 + $0x21] sm:$0xff] %vm406_vm0, %v375_v42  ;;  %v553_v18 = vld [vmem:[#allocation2 + $0x138] sm:$0xff]  ;;  %v4242_v23 = vpack.c.bf16 %v546_v11, %v545_v10  ;;  %v346_v37 = vadd.f32 %v3929_v4, %v310_v33  ;;  %v832_v34 = vld [vmem:[#allocation2 + $0x61] sm:$0xff] }
  0x74   : > { %489 = vst.msk [vmem:[#allocation2 + $0x151] sm:$0xff] %vm406_vm0, %v400_v46  ;;  %v554_v19 = vld [vmem:[#allocation2 + $0x140] sm:$0xff]  ;;  %v379_v43 = vmax.f32 %v347_v38, 0.0  ;;  %v559_v38 = vld [vmem:[#allocation3] sm:$0xff] }
  0x75   : > { %490 = vst.msk [vmem:[#allocation2 + $0x159] sm:$0xff] %vm406_vm0, %v401_v47  ;;  %v539_v25 = vld [vmem:[#allocation2 + $0x90] sm:$0xff]  ;;  %v604_v27 = vpack.c.bf16 %v554_v19, %v553_v18  ;;  %v378_v42 = vmax.f32 %v346_v37, 0.0  ;;  %v1132_v62 = vld [vmem:[#allocation2 + $0x7a] sm:$0xff] }
  0x76   : > { %475 = vst.msk [vmem:[#allocation2 + $0xa9] sm:$0xff] %vm406_vm0, %v386_v56  ;;  %v540_v26 = vld [vmem:[#allocation2 + $0x98] sm:$0xff] }
  0x77   : > { %476 = vst.msk [vmem:[#allocation2 + $0xb1] sm:$0xff] %vm406_vm0, %v387_v57  ;;  %v4254_v28 = vpack.c.bf16 %v540_v26, %v539_v25  ;;  %v547_v39 = vld [vmem:[#allocation2 + $0xf0] sm:$0xff]  ;;  %v837_v1 = vld [vmem:[#allocation2 + $0x99] sm:$0xff] }
  0x78   : > { %483 = vst.msk [vmem:[#allocation2 + $0x109] sm:$0xff] %vm406_vm0, %v394_v5  ;;  %v548_v40 = vld [vmem:[#allocation2 + $0xf8] sm:$0xff]  ;;  %v1122_v5 = vld [vmem:[#allocation2 + $0x2] sm:$0xff] }
  0x79   : > { %v529_v14 = vld [vmem:[#allocation2 + $0x18] sm:$0xff]  ;;  %484 = vst.msk [vmem:[#allocation2 + $0x111] sm:$0xff] %vm406_vm0, %v395_v3  ;;  %v4268_v46 = vpack.c.bf16 %v548_v40, %v547_v39  ;;  %v1123_v3 = vld [vmem:[#allocation2 + $0xa] sm:$0xff] }
  0x7a   : > { %v530_v20 = vld [vmem:[#allocation2 + $0x20] sm:$0xff]  ;;  %465 = vst.msk [vmem:[#allocation2 + $0x31] sm:$0xff] %vm406_vm0, %v376_v16  ;;  %v1186_v8 = vpack.c.bf16 %v1123_v3, %v1122_v5 }
  0x7b   : > { %v4244_v24 = vpack.c.bf16 %v530_v20, %v529_v14  ;;  %466 = vst.msk [vmem:[#allocation2 + $0x39] sm:$0xff] %vm406_vm0, %v377_v17  ;;  %v555_v44 = vld [vmem:[#allocation2 + $0x150] sm:$0xff]  ;;  %v826_v6 = vld [vmem:[#allocation2 + $0x19] sm:$0xff]  ;;  %v827_v7 = vld [vmem:[#allocation2 + $0x21] sm:$0xff] }
  0x7c   : > { %491 = vst.msk [vmem:[#allocation2 + $0x169] sm:$0xff] %vm406_vm0, %v402_v21  ;;  %v556_v45 = vld [vmem:[#allocation2 + $0x158] sm:$0xff]  ;;  %v889_v9 = vpack.c.bf16 %v827_v7, %v826_v6  ;;  %v1125_v11 = vld [vmem:[#allocation2 + $0x22] sm:$0xff]  ;;  %v567_v17 = vld [vmem:[#allocation3 + $0x40] sm:$0xff] }
  0x7d   : > { %3569 = vmatmul.msk.bf16.gmra.mxu0 %vm406_vm0, %v4244_v24  ;;  %492 = vst.msk [vmem:[#allocation2 + $0x171] sm:$0xff] %vm406_vm0, %v403_v22  ;;  %v541_v47 = vld [vmem:[#allocation2 + $0xa8] sm:$0xff]  ;;  %v605_v2 = vpack.c.bf16 %v556_v45, %v555_v44  ;;  %v1124_v10 = vld [vmem:[#allocation2 + $0x1a] sm:$0xff] }
  0x7e   : > { %467 = vst.msk [vmem:[#allocation2 + $0x49] sm:$0xff] %vm406_vm0, %v378_v42  ;;  %v542_v48 = vld [vmem:[#allocation2 + $0xb0] sm:$0xff]  ;;  %v1187_v14 = vpack.c.bf16 %v1125_v11, %v1124_v10  ;;  %v560_v42 = vld [vmem:[#allocation3 + $0x8] sm:$0xff]  ;;  %v561_v5 = vld [vmem:[#allocation3 + $0x10] sm:$0xff] }
  0x7f   : > { %3577 = vmatmul.msk.bf16.gmra.mxu2 %vm406_vm0, %v4242_v23  ;;  %468 = vst.msk [vmem:[#allocation2 + $0x51] sm:$0xff] %vm406_vm0, %v379_v43  ;;  %v4275_v4 = vpack.c.bf16 %v542_v48, %v541_v47  ;;  %v549_v55 = vld [vmem:[#allocation2 + $0x108] sm:$0xff]  ;;  %v834_v45 = vld [vmem:[#allocation2 + $0x79] sm:$0xff] }
  0x80   : > { %v550_v56 = vld [vmem:[#allocation2 + $0x110] sm:$0xff]  ;;  %v835_v47 = vld [vmem:[#allocation2 + $0x81] sm:$0xff]  ;;  %v584_v7 = vld [vmem:[#allocation3 + $0xc8] sm:$0xff] }
  0x81   : > { %3581 = vmatmul.msk.bf16.gmra.mxu3 %vm406_vm0, %v604_v27  ;;  %v531_v35 = vld [vmem:[#allocation2 + $0x30] sm:$0xff]  ;;  %v4289_v60 = vpack.c.bf16 %v550_v56, %v549_v55  ;;  %v568_v27 = vld [vmem:[#allocation3 + $0x48] sm:$0xff]  ;;  %v893_v49 = vpack.c.bf16 %v835_v47, %v834_v45 }
  0x82   : > { %v532_v36 = vld [vmem:[#allocation2 + $0x38] sm:$0xff]  ;;  %v1131_v44 = vld [vmem:[#allocation2 + $0x6a] sm:$0xff] }
  0x83   : > { %3574 = vmatmul.msk.bf16.gmra.mxu1 %vm406_vm0, %v4254_v28  ;;  %v593_v41 = vpack.c.bf16 %v532_v36, %v531_v35  ;;  %v557_v58 = vld [vmem:[#allocation2 + $0x168] sm:$0xff]  ;;  %v828_v12 = vld [vmem:[#allocation2 + $0x31] sm:$0xff]  ;;  %v829_v13 = vld [vmem:[#allocation2 + $0x39] sm:$0xff] }
  0x84   : > { %v558_v59 = vld [vmem:[#allocation2 + $0x170] sm:$0xff]  ;;  %v890_v16 = vpack.c.bf16 %v829_v13, %v828_v12  ;;  %v1127_v21 = vld [vmem:[#allocation2 + $0x3a] sm:$0xff] }
  0x85   : > { %v533_v53 = vld [vmem:[#allocation2 + $0x48] sm:$0xff]  ;;  %v606_v63 = vpack.c.bf16 %v558_v59, %v557_v58  ;;  %v1126_v20 = vld [vmem:[#allocation2 + $0x32] sm:$0xff] }
  0x86   : > { %v534_v54 = vld [vmem:[#allocation2 + $0x50] sm:$0xff]  ;;  %v1188_v25 = vpack.c.bf16 %v1127_v21, %v1126_v20  ;;  %v570_v59 = vld [vmem:[#allocation3 + $0x58] sm:$0xff] }
  0x87   : > { %v594_v57 = vpack.c.bf16 %v534_v54, %v533_v53  ;;  %v830_v22 = vld [vmem:[#allocation2 + $0x49] sm:$0xff]  ;;  %v1129_v33 = vld [vmem:[#allocation2 + $0x52] sm:$0xff] }
  0x88   : > { %v1128_v32 = vld [vmem:[#allocation2 + $0x4a] sm:$0xff] }
  0x89   : > { %v833_v35 = vld [vmem:[#allocation2 + $0x69] sm:$0xff]  ;;  %v1189_v36 = vpack.c.bf16 %v1129_v33, %v1128_v32  ;;  %v1134_v32 = vld [vmem:[#allocation2 + $0x92] sm:$0xff]  ;;  %v1135_v33 = vld [vmem:[#allocation2 + $0x9a] sm:$0xff] }
  0x8a   : > { %v892_v37 = vpack.c.bf16 %v833_v35, %v832_v34  ;;  %v583_v55 = vld [vmem:[#allocation3 + $0xc0] sm:$0xff] }
  0x8b   : > { %v838_v35 = vld [vmem:[#allocation2 + $0xa9] sm:$0xff] }
  0x8d   : > { %3570 = vmatmul.msk.bf16.gmra.mxu0 %vm406_vm0, %v593_v41 }
  0x8f   : > { %3578 = vmatmul.msk.bf16.gmra.mxu2 %vm406_vm0, %v4268_v46 }
  0x91   : > { %3582 = vmatmul.msk.bf16.gmra.mxu3 %vm406_vm0, %v605_v2 }
  0x93   : > { %3575 = vmatmul.msk.bf16.gmra.mxu1 %vm406_vm0, %v4275_v4 }
  0x97   : > { %v680_v39 = vpop.f32.mrf.mxu0 }
  0x98   : > { %v760_v40 = vadd.f32 %v680_v39, %v559_v38 }
  0x9a   : > { %792 = vst.msk [vmem:[#allocation3] sm:$0xff] %vm406_vm0, %v760_v40  ;;  %v586_v40 = vld [vmem:[#allocation3 + $0xd8] sm:$0xff] }
  0x9d   : > { %3571 = vmatmul.msk.bf16.gmra.mxu0 %vm406_vm0, %v594_v57 }
  0x9e   : > { %v700_v18 = vpop.f32.mrf.mxu1 }
  0x9f   : > { %3579 = vmatmul.msk.bf16.gmra.mxu2 %vm406_vm0, %v4289_v60  ;;  %v768_v19 = vadd.f32 %v700_v18, %v567_v17  ;;  %v682_v43 = vpop.f32.mrf.mxu0  ;;  %v577_v17 = vld [vmem:[#allocation3 + $0x90] sm:$0xff] }
  0xa0   : > { %v761_v48 = vadd.f32 %v682_v43, %v560_v42  ;;  %v1192_v43 = vpack.c.bf16 %v1135_v33, %v1134_v32  ;;  %v1138_v33 = vld [vmem:[#allocation2 + $0xc2] sm:$0xff] }
  0xa1   : > { %3583 = vmatmul.msk.bf16.gmra.mxu3 %vm406_vm0, %v606_v63  ;;  %800 = vst.msk [vmem:[#allocation3 + $0x40] sm:$0xff] %vm406_vm0, %v768_v19  ;;  %v1133_v63 = vld [vmem:[#allocation2 + $0x82] sm:$0xff] }
  0xa2   : > { %793 = vst.msk [vmem:[#allocation3 + $0x8] sm:$0xff] %vm406_vm0, %v761_v48  ;;  %v1191_v10 = vpack.c.bf16 %v1133_v63, %v1132_v62  ;;  %v562_v19 = vld [vmem:[#allocation3 + $0x18] sm:$0xff]  ;;  %v3824_v62 = vld [vmem:[%s5092_s3 + $0x60] sm:$0xff]  ;;  %v580_v63 = vld [vmem:[#allocation3 + $0xa8] sm:$0xff] }
  0xa3   : > { %3596 = vmatmul.msk.bf16.vlgmr.msrb.gmra.mxu1 %vm406_vm0, %v888_v0  ;;  %2467 = vmatpush.bf16.msra.mxu2 %v3824_v62  ;;  %v844_v62 = vld [vmem:[#allocation2 + $0xf1] sm:$0xff] }
  0xa6   : > { %v702_v29 = vpop.f32.mrf.mxu1 }
  0xa7   : > { %v769_v30 = vadd.f32 %v702_v29, %v568_v27 }
  0xa9   : > { %801 = vst.msk [vmem:[#allocation3 + $0x48] sm:$0xff] %vm406_vm0, %v769_v30  ;;  %v572_v30 = vld [vmem:[#allocation3 + $0x68] sm:$0xff] }
  0xad   : > { %3680 = vmatmul.msk.bf16.vlgmr.msrb.gmra.mxu0 %vm406_vm0, %v889_v9 }
  0xaf   : > { %3624 = vmatmul.msk.bf16.vlgmr.msrb.gmra.mxu2 %vm406_vm0, %v1186_v8 }
  0xb1   : > { %3652 = vmatmul.msk.bf16.vlgmr.msrb.gmra.mxu3 %vm406_vm0, %v4244_v24  ;;  %v831_v24 = vld [vmem:[#allocation2 + $0x51] sm:$0xff] }
  0xb2   : > { %v891_v26 = vpack.c.bf16 %v831_v24, %v830_v22  ;;  %v585_v22 = vld [vmem:[#allocation3 + $0xd0] sm:$0xff] }
  0xb3   : > { %3597 = vmatmul.msk.bf16.gmra.mxu1 %vm406_vm0, %v889_v9 }
  0xbd   : > { %3681 = vmatmul.msk.bf16.gmra.mxu0 %vm406_vm0, %v890_v16 }
  0xbf   : > { %3625 = vmatmul.msk.bf16.gmra.mxu2 %vm406_vm0, %v1187_v14 }
  0xc1   : > { %3653 = vmatmul.msk.bf16.gmra.mxu3 %vm406_vm0, %v593_v41  ;;  %v1130_v41 = vld [vmem:[#allocation2 + $0x62] sm:$0xff] }
  0xc2   : > { %v1190_v2 = vpack.c.bf16 %v1131_v44, %v1130_v41 }
  0xc3   : > { %3598 = vmatmul.msk.bf16.gmra.mxu1 %vm406_vm0, %v890_v16  ;;  %v571_v16 = vld [vmem:[#allocation3 + $0x60] sm:$0xff] }
  0xcd   : > { %3682 = vmatmul.msk.bf16.gmra.mxu0 %vm406_vm0, %v891_v26 }
  0xcf   : > { %3626 = vmatmul.msk.bf16.gmra.mxu2 %vm406_vm0, %v1188_v25 }
  0xd1   : > { %3654 = vmatmul.msk.bf16.gmra.mxu3 %vm406_vm0, %v594_v57 }
  0xd3   : > { %3599 = vmatmul.msk.bf16.gmra.mxu1 %vm406_vm0, %v891_v26 }
  0xdd   : > { %3683 = vmatmul.msk.bf16.gmra.mxu0 %vm406_vm0, %v892_v37 }
  0xdf   : > { %3627 = vmatmul.msk.bf16.gmra.mxu2 %vm406_vm0, %v1189_v36  ;;  %v839_v36 = vld [vmem:[#allocation2 + $0xb1] sm:$0xff] }
  0xe0   : > { %v895_v44 = vpack.c.bf16 %v839_v36, %v838_v35  ;;  %v1139_v35 = vld [vmem:[#allocation2 + $0xca] sm:$0xff] }
  0xe1   : > { %3655 = vmatmul.msk.bf16.gmra.mxu3 %vm406_vm0, %v3969_v15  ;;  %v575_v15 = vld [vmem:[#allocation3 + $0x80] sm:$0xff] }
  0xe3   : > { %3600 = vmatmul.msk.bf16.gmra.mxu1 %vm406_vm0, %v892_v37  ;;  %v563_v37 = vld [vmem:[#allocation3 + $0x20] sm:$0xff] }
  0xed   : > { %3684 = vmatmul.msk.bf16.gmra.mxu0 %vm406_vm0, %v893_v49 }
  0xef   : > { %3628 = vmatmul.msk.bf16.gmra.mxu2 %vm406_vm0, %v1190_v2  ;;  %v573_v2 = vld [vmem:[#allocation3 + $0x70] sm:$0xff] }
  0xf0   : > { %v705_v52 = vpop.f32.mrf.mxu1 }
  0xf1   : > { %3656 = vmatmul.msk.bf16.gmra.mxu3 %vm406_vm0, %v4208_v50  ;;  %v770_v53 = vadd.f32 %v705_v52, %v569_v51  ;;  %v836_v50 = vld [vmem:[#allocation2 + $0x91] sm:$0xff] }
  0xf2   : > { %v720_v54 = vpop.f32.mrf.mxu2  ;;  %v894_v11 = vpack.c.bf16 %v837_v1, %v836_v50  ;;  %v579_v51 = vld [vmem:[#allocation3 + $0xa0] sm:$0xff]  ;;  %v564_v52 = vld [vmem:[#allocation3 + $0x28] sm:$0xff] }
  0xf3   : > { %v776_v56 = vadd.f32 %v720_v54, %v575_v15  ;;  %802 = vst.msk [vmem:[#allocation3 + $0x50] sm:$0xff] %vm406_vm0, %v770_v53  ;;  %3601 = vmatmul.msk.bf16.gmra.mxu1 %vm406_vm0, %v893_v49  ;;  %v3822_v49 = vld [vmem:[%s5092_s3 + $0x50] sm:$0xff] }
  0xf4   : > { %v740_v57 = vpop.f32.mrf.mxu3  ;;  %2168 = vmatpush.bf16.msra.mxu1 %v3822_v49  ;;  %v1137_v50 = vld [vmem:[#allocation2 + $0xb2] sm:$0xff] }
  0xf5   : > { %808 = vst.msk [vmem:[#allocation3 + $0x80] sm:$0xff] %vm406_vm0, %v776_v56  ;;  %v784_v58 = vadd.f32 %v740_v57, %v583_v55  ;;  %v587_v55 = vld [vmem:[#allocation3 + $0xe0] sm:$0xff] }
  0xf7   : > { %816 = vst.msk [vmem:[#allocation3 + $0xc0] sm:$0xff] %vm406_vm0, %v784_v58 }
  0xf8   : > { %v707_v0 = vpop.f32.mrf.mxu1 }
  0xf9   : > { %v771_v3 = vadd.f32 %v707_v0, %v570_v59  ;;  %v1136_v0 = vld [vmem:[#allocation2 + $0xaa] sm:$0xff] }
  0xfa   : > { %v722_v6 = vpop.f32.mrf.mxu2  ;;  %v685_v8 = vpop.f32.mrf.mxu0 }
  0xfb   : > { %v777_v9 = vadd.f32 %v722_v6, %v576_v61  ;;  %803 = vst.msk [vmem:[#allocation3 + $0x58] sm:$0xff] %vm406_vm0, %v771_v3  ;;  %v762_v12 = vadd.f32 %v685_v8, %v561_v5  ;;  %v840_v5 = vld [vmem:[#allocation2 + $0xc1] sm:$0xff]  ;;  %v841_v3 = vld [vmem:[#allocation2 + $0xc9] sm:$0xff] }
  0xfc   : > { %v742_v13 = vpop.f32.mrf.mxu3  ;;  %v565_v6 = vld [vmem:[#allocation3 + $0x30] sm:$0xff] }
  0xfd   : > { %809 = vst.msk [vmem:[#allocation3 + $0x88] sm:$0xff] %vm406_vm0, %v777_v9  ;;  %v785_v14 = vadd.f32 %v742_v13, %v584_v7  ;;  %3685 = vmatmul.msk.bf16.gmra.mxu0 %vm406_vm0, %v894_v11  ;;  %v588_v9 = vld [vmem:[#allocation3 + $0xe8] sm:$0xff]  ;;  %v896_v13 = vpack.c.bf16 %v841_v3, %v840_v5 }
  0xfe   : > { %794 = vst.msk [vmem:[#allocation3 + $0x10] sm:$0xff] %vm406_vm0, %v762_v12  ;;  %v1193_v12 = vpack.c.bf16 %v1137_v50, %v1136_v0 }
  0xff   : > { %3629 = vmatmul.msk.bf16.gmra.mxu2 %vm406_vm0, %v1191_v10  ;;  %817 = vst.msk [vmem:[#allocation3 + $0xc8] sm:$0xff] %vm406_vm0, %v785_v14 }
 0x100   : > { %v710_v18 = vpop.f32.mrf.mxu1 }
 0x101   : > { %3657 = vmatmul.msk.bf16.gmra.mxu3 %vm406_vm0, %v4254_v28  ;;  %v772_v20 = vadd.f32 %v710_v18, %v571_v16  ;;  %v578_v28 = vld [vmem:[#allocation3 + $0x98] sm:$0xff]  ;;  %v3826_v18 = vld [vmem:[%s5092_s3 + $0x70] sm:$0xff] }
 0x102   : > { %v725_v21 = vpop.f32.mrf.mxu2  ;;  %v687_v24 = vpop.f32.mrf.mxu0  ;;  %2765 = vmatpush.bf16.msra.mxu3 %v3826_v18 }
 0x103   : > { %v778_v25 = vadd.f32 %v725_v21, %v577_v17  ;;  %804 = vst.msk [vmem:[#allocation3 + $0x60] sm:$0xff] %vm406_vm0, %v772_v20  ;;  %3602 = vmatmul.msk.bf16.gmra.mxu1 %vm406_vm0, %v894_v11  ;;  %v763_v26 = vadd.f32 %v687_v24, %v562_v19  ;;  %v581_v19 = vld [vmem:[#allocation3 + $0xb0] sm:$0xff]  ;;  %v856_v20 = vld [vmem:[#allocation3] sm:$0xff] }
 0x104   : > { %v745_v27 = vpop.f32.mrf.mxu3 }
 0x105   : > { %810 = vst.msk [vmem:[#allocation3 + $0x90] sm:$0xff] %vm406_vm0, %v778_v25  ;;  %v786_v29 = vadd.f32 %v745_v27, %v585_v22  ;;  %v566_v22 = vld [vmem:[#allocation3 + $0x38] sm:$0xff]  ;;  %v858_v49 = vld [vmem:[#allocation3 + $0x10] sm:$0xff] }
 0x106   : > { %795 = vst.msk [vmem:[#allocation3 + $0x18] sm:$0xff] %vm406_vm0, %v763_v26  ;;  %v589_v26 = vld [vmem:[#allocation3 + $0xf0] sm:$0xff] }
 0x107   : > { %818 = vst.msk [vmem:[#allocation3 + $0xd0] sm:$0xff] %vm406_vm0, %v786_v29 }
 0x108   : > { %v712_v34 = vpop.f32.mrf.mxu1 }
 0x109   : > { %v773_v38 = vadd.f32 %v712_v34, %v572_v30  ;;  %v857_v34 = vld [vmem:[#allocation3 + $0x8] sm:$0xff] }
 0x10a   : > { %v727_v39 = vpop.f32.mrf.mxu2  ;;  %v690_v41 = vpop.f32.mrf.mxu0 }
 0x10b   : > { %v779_v42 = vadd.f32 %v727_v39, %v578_v28  ;;  %805 = vst.msk [vmem:[#allocation3 + $0x68] sm:$0xff] %vm406_vm0, %v773_v38  ;;  %v764_v45 = vadd.f32 %v690_v41, %v563_v37  ;;  %v842_v37 = vld [vmem:[#allocation2 + $0xd9] sm:$0xff]  ;;  %v843_v38 = vld [vmem:[#allocation2 + $0xe1] sm:$0xff] }
 0x10c   : > { %v747_v47 = vpop.f32.mrf.mxu3  ;;  %v590_v41 = vld [vmem:[#allocation3 + $0xf8] sm:$0xff] }
 0x10d   : > { %811 = vst.msk [vmem:[#allocation3 + $0x98] sm:$0xff] %vm406_vm0, %v779_v42  ;;  %v787_v48 = vadd.f32 %v747_v47, %v586_v40  ;;  %3686 = vmatmul.msk.bf16.gmra.mxu0 %vm406_vm0, %v895_v44 }
 0x10e   : > { %796 = vst.msk [vmem:[#allocation3 + $0x20] sm:$0xff] %vm406_vm0, %v764_v45  ;;  %v897_v45 = vpack.c.bf16 %v843_v38, %v842_v37 }
 0x10f   : > { %3630 = vmatmul.msk.bf16.gmra.mxu2 %vm406_vm0, %v1192_v43  ;;  %819 = vst.msk [vmem:[#allocation3 + $0xd8] sm:$0xff] %vm406_vm0, %v787_v48 }
 0x110   : > { %v715_v15 = vpop.f32.mrf.mxu1 }
 0x111   : > { %3658 = vmatmul.msk.bf16.gmra.mxu3 %vm406_vm0, %v4275_v4  ;;  %v774_v53 = vadd.f32 %v715_v15, %v573_v2  ;;  %v574_v4 = vld [vmem:[#allocation3 + $0x78] sm:$0xff] }
 0x112   : > { %v730_v54 = vpop.f32.mrf.mxu2  ;;  %v692_v56 = vpop.f32.mrf.mxu0 }
 0x113   : > { %v780_v57 = vadd.f32 %v730_v54, %v579_v51  ;;  %806 = vst.msk [vmem:[#allocation3 + $0x70] sm:$0xff] %vm406_vm0, %v774_v53  ;;  %3603 = vmatmul.msk.bf16.gmra.mxu1 %vm406_vm0, %v895_v44  ;;  %v765_v58 = vadd.f32 %v692_v56, %v564_v52  ;;  %v1194_v44 = vpack.c.bf16 %v1139_v35, %v1138_v33  ;;  %v3828_v52 = vld [vmem:[%s5092_s3 + $0x80] sm:$0xff] }
 0x114   : > { %v750_v59 = vpop.f32.mrf.mxu3  ;;  %3063 = vmatpush.bf16.msra.mxu0 %v3828_v52  ;;  %v1145_v52 = vld [vmem:[#allocation2 + $0x112] sm:$0xff] }
 0x115   : > { %812 = vst.msk [vmem:[#allocation3 + $0xa0] sm:$0xff] %vm406_vm0, %v780_v57  ;;  %v788_v61 = vadd.f32 %v750_v59, %v587_v55  ;;  %v1140_v57 = vld [vmem:[#allocation2 + $0xda] sm:$0xff] }
 0x116   : > { %797 = vst.msk [vmem:[#allocation3 + $0x28] sm:$0xff] %vm406_vm0, %v765_v58  ;;  %v1141_v58 = vld [vmem:[#allocation2 + $0xe2] sm:$0xff] }
 0x117   : > { %820 = vst.msk [vmem:[#allocation3 + $0xe0] sm:$0xff] %vm406_vm0, %v788_v61  ;;  %v1195_v5 = vpack.c.bf16 %v1141_v58, %v1140_v57  ;;  %v849_v57 = vld [vmem:[#allocation2 + $0x129] sm:$0xff] }
 0x118   : > { %v717_v1 = vpop.f32.mrf.mxu1 }
 0x119   : > { %v775_v7 = vadd.f32 %v717_v1, %v574_v4  ;;  %v845_v4 = vld [vmem:[#allocation2 + $0xf9] sm:$0xff] }
 0x11a   : > { %v732_v8 = vpop.f32.mrf.mxu2  ;;  %v695_v10 = vpop.f32.mrf.mxu0  ;;  %v898_v3 = vpack.c.bf16 %v845_v4, %v844_v62 }
 0x11b   : > { %v781_v11 = vadd.f32 %v732_v8, %v580_v63  ;;  %807 = vst.msk [vmem:[#allocation3 + $0x78] sm:$0xff] %vm406_vm0, %v775_v7  ;;  %v766_v14 = vadd.f32 %v695_v10, %v565_v6  ;;  %v860_v10 = vld [vmem:[#allocation3 + $0x20] sm:$0xff] }
 0x11c   : > { %v752_v16 = vpop.f32.mrf.mxu3 }
 0x11d   : > { %813 = vst.msk [vmem:[#allocation3 + $0xa8] sm:$0xff] %vm406_vm0, %v781_v11  ;;  %v789_v17 = vadd.f32 %v752_v16, %v588_v9  ;;  %3687 = vmatmul.msk.bf16.gmra.mxu0 %vm406_vm0, %v896_v13 }
 0x11e   : > { %798 = vst.msk [vmem:[#allocation3 + $0x30] sm:$0xff] %vm406_vm0, %v766_v14 }
 0x11f   : > { %3631 = vmatmul.msk.bf16.gmra.mxu2 %vm406_vm0, %v1193_v12  ;;  %821 = vst.msk [vmem:[#allocation3 + $0xe8] sm:$0xff] %vm406_vm0, %v789_v17 }
 0x120   : > { %v978_v21 = vpop.f32.mrf.mxu1 }
 0x121   : > { %3659 = vmatmul.msk.bf16.gmra.mxu3 %vm406_vm0, %v4187_v31  ;;  %v1058_v24 = vadd.f32 %v978_v21, %v856_v20  ;;  %v582_v31 = vld [vmem:[#allocation3 + $0xb8] sm:$0xff] }
 0x122   : > { %v735_v25 = vpop.f32.mrf.mxu2  ;;  %v697_v27 = vpop.f32.mrf.mxu0 }
 0x123   : > { %v782_v29 = vadd.f32 %v735_v25, %v581_v19  ;;  %1090 = vst.msk [vmem:[#allocation3] sm:$0xff] %vm406_vm0, %v1058_v24  ;;  %3604 = vmatmul.msk.bf16.gmra.mxu1 %vm406_vm0, %v896_v13  ;;  %v767_v30 = vadd.f32 %v697_v27, %v566_v22  ;;  %v1142_v22 = vld [vmem:[#allocation2 + $0xf2] sm:$0xff]  ;;  %v846_v27 = vld [vmem:[#allocation2 + $0x109] sm:$0xff] }
 0x124   : > { %v755_v28 = vpop.f32.mrf.mxu3  ;;  %v861_v24 = vld [vmem:[#allocation3 + $0x28] sm:$0xff] }
 0x125   : > { %814 = vst.msk [vmem:[#allocation3 + $0xb0] sm:$0xff] %vm406_vm0, %v782_v29  ;;  %v790_v32 = vadd.f32 %v755_v28, %v589_v26  ;;  %v847_v29 = vld [vmem:[#allocation2 + $0x111] sm:$0xff] }
 0x126   : > { %799 = vst.msk [vmem:[#allocation3 + $0x38] sm:$0xff] %vm406_vm0, %v767_v30 }
 0x127   : > { %822 = vst.msk [vmem:[#allocation3 + $0xf0] sm:$0xff] %vm406_vm0, %v790_v32 }
 0x128   : > { %v980_v36 = vpop.f32.mrf.mxu1 }
 0x129   : > { %v1059_v39 = vadd.f32 %v980_v36, %v857_v34  ;;  %v899_v34 = vpack.c.bf16 %v847_v29, %v846_v27  ;;  %v851_v27 = vld [vmem:[#allocation2 + $0x141] sm:$0xff] }
 0x12a   : > { %v737_v40 = vpop.f32.mrf.mxu2  ;;  %v1872_v42 = vpop.f32.mrf.mxu0  ;;  %v1154_v2 = vld [vmem:[#allocation3] sm:$0xff] }
 0x12b   : > { %v783_v43 = vadd.f32 %v737_v40, %v582_v31  ;;  %1091 = vst.msk [vmem:[#allocation3 + $0x8] sm:$0xff] %vm406_vm0, %v1059_v39 }
 0x12c   : > { %v757_v47 = vpop.f32.mrf.mxu3 }
 0x12d   : > { %815 = vst.msk [vmem:[#allocation3 + $0xb8] sm:$0xff] %vm406_vm0, %v783_v43  ;;  %v791_v48 = vadd.f32 %v757_v47, %v590_v41  ;;  %3688 = vmatmul.msk.bf16.gmra.mxu0 %vm406_vm0, %v897_v45  ;;  %v862_v41 = vld [vmem:[#allocation3 + $0x30] sm:$0xff] }
 0x12f   : > { %3632 = vmatmul.msk.bf16.gmra.mxu2 %vm406_vm0, %v1194_v44  ;;  %823 = vst.msk [vmem:[#allocation3 + $0xf8] sm:$0xff] %vm406_vm0, %v791_v48 }
 0x130   : > { %v983_v51 = vpop.f32.mrf.mxu1 }
 0x131   : > { %3660 = vmatmul.msk.bf16.gmra.mxu3 %vm406_vm0, %v4242_v23  ;;  %v1060_v15 = vadd.f32 %v983_v51, %v858_v49  ;;  %v859_v23 = vld [vmem:[#allocation3 + $0x18] sm:$0xff] }
 0x132   : > { %v1276_v53 = vpop.f32.mrf.mxu2  ;;  %v4387_v54 = vpop.f32.mrf.mxu0  ;;  %v1155_v59 = vld [vmem:[#allocation3 + $0x8] sm:$0xff] }
 0x133   : > { %v1356_v55 = vadd.f32 %v1276_v53, %v1154_v2  ;;  %1092 = vst.msk [vmem:[#allocation3 + $0x10] sm:$0xff] %vm406_vm0, %v1060_v15  ;;  %3605 = vmatmul.msk.bf16.gmra.mxu1 %vm406_vm0, %v897_v45  ;;  %v863_v53 = vld [vmem:[#allocation3 + $0x38] sm:$0xff] }
 0x134   : > { %v1574_v56 = vpop.f32.mrf.mxu3 }
 0x135   : > { %1388 = vst.msk [vmem:[#allocation3] sm:$0xff] %vm406_vm0, %v1356_v55 }
 0x138   : > { %v985_v61 = vpop.f32.mrf.mxu1 }
 0x139   : > { %v1061_v63 = vadd.f32 %v985_v61, %v859_v23  ;;  %v1443_v61 = vld [vmem:[#allocation2 + $0x128] sm:$0xff] }
 0x13a   : > { %v1278_v0 = vpop.f32.mrf.mxu2  ;;  %v4392_v50 = vpop.f32.mrf.mxu0  ;;  %v1156_v9 = vld [vmem:[#allocation3 + $0x10] sm:$0xff] }
 0x13b   : > { %v1357_v1 = vadd.f32 %v1278_v0, %v1155_v59  ;;  %1093 = vst.msk [vmem:[#allocation3 + $0x18] sm:$0xff] %vm406_vm0, %v1061_v63  ;;  %v1442_v59 = vld [vmem:[#allocation2 + $0x120] sm:$0xff] }
 0x13c   : > { %v1452_v6 = vld [vmem:[#allocation3] sm:$0xff]  ;;  %v1576_v7 = vpop.f32.mrf.mxu3 }
 0x13d   : > { %v1654_v8 = vadd.f32 %v1574_v56, %v1452_v6  ;;  %1389 = vst.msk [vmem:[#allocation3 + $0x8] sm:$0xff] %vm406_vm0, %v1357_v1  ;;  %3689 = vmatmul.msk.bf16.gmra.mxu0 %vm406_vm0, %v898_v3  ;;  %v848_v56 = vld [vmem:[#allocation2 + $0x121] sm:$0xff] }
 0x13e   : > { %v900_v0 = vpack.c.bf16 %v849_v57, %v848_v56 }
 0x13f   : > { %1686 = vst.msk [vmem:[#allocation3] sm:$0xff] %vm406_vm0, %v1654_v8  ;;  %3633 = vmatmul.msk.bf16.gmra.mxu2 %vm406_vm0, %v1195_v5 }
 0x140   : > { %v988_v11 = vpop.f32.mrf.mxu1 }
 0x141   : > { %3661 = vmatmul.msk.bf16.gmra.mxu3 %vm406_vm0, %v4268_v46  ;;  %v1062_v12 = vadd.f32 %v988_v11, %v860_v10  ;;  %v1143_v46 = vld [vmem:[#allocation2 + $0xfa] sm:$0xff] }
 0x142   : > { %v1281_v13 = vpop.f32.mrf.mxu2  ;;  %v4401_v14 = vpop.f32.mrf.mxu0  ;;  %v1157_v25 = vld [vmem:[#allocation3 + $0x18] sm:$0xff]  ;;  %v1196_v33 = vpack.c.bf16 %v1143_v46, %v1142_v22  ;;  %v865_v46 = vld [vmem:[#allocation3 + $0x48] sm:$0xff] }
 0x143   : > { %v1358_v16 = vadd.f32 %v1281_v13, %v1156_v9  ;;  %1094 = vst.msk [vmem:[#allocation3 + $0x20] sm:$0xff] %vm406_vm0, %v1062_v12  ;;  %3606 = vmatmul.msk.bf16.gmra.mxu1 %vm406_vm0, %v898_v3  ;;  %v1495_v3 = vpack.c.bf16 %v1443_v61, %v1442_v59  ;;  %v864_v9 = vld [vmem:[#allocation3 + $0x40] sm:$0xff]  ;;  %v867_v59 = vld [vmem:[#allocation3 + $0x58] sm:$0xff]  ;;  %v3848_v61 = vld [vmem:[%s5091_s2] ss:$0 sm:$0xff] }
 0x144   : > { %v1453_v17 = vld [vmem:[#allocation3 + $0x8] sm:$0xff]  ;;  %v1579_v18 = vpop.f32.mrf.mxu3  ;;  %v1147_v22 = vld [vmem:[#allocation2 + $0x12a] sm:$0xff] }
 0x145   : > { %v1655_v19 = vadd.f32 %v1576_v7, %v1453_v17  ;;  %1390 = vst.msk [vmem:[#allocation3 + $0x10] sm:$0xff] %vm406_vm0, %v1358_v16 }
 0x146   : > { %v1750_v20 = vld [vmem:[#allocation3] sm:$0xff] }
 0x147   : > { %1687 = vst.msk [vmem:[#allocation3 + $0x8] sm:$0xff] %vm406_vm0, %v1655_v19  ;;  %v1952_v21 = vadd.f32 %v1872_v42, %v1750_v20 }
 0x148   : > { %v990_v26 = vpop.f32.mrf.mxu1 }
 0x149   : > { %1984 = vst.msk [vmem:[#allocation3] sm:$0xff] %vm406_vm0, %v1952_v21  ;;  %v1063_v30 = vadd.f32 %v990_v26, %v861_v24  ;;  %v1146_v21 = vld [vmem:[#allocation2 + $0x122] sm:$0xff]  ;;  %v850_v26 = vld [vmem:[#allocation2 + $0x139] sm:$0xff] }
 0x14a   : > { %v1283_v28 = vpop.f32.mrf.mxu2  ;;  %v4408_v32 = vpop.f32.mrf.mxu0  ;;  %v1158_v40 = vld [vmem:[#allocation3 + $0x20] sm:$0xff] }
 0x14b   : > { %v1359_v31 = vadd.f32 %v1283_v28, %v1157_v25  ;;  %1095 = vst.msk [vmem:[#allocation3 + $0x28] sm:$0xff] %vm406_vm0, %v1063_v30  ;;  %v1444_v28 = vld [vmem:[#allocation2 + $0x138] sm:$0xff] }
 0x14c   : > { %v1454_v35 = vld [vmem:[#allocation3 + $0x10] sm:$0xff]  ;;  %v1581_v36 = vpop.f32.mrf.mxu3 }
 0x14d   : > { %v1656_v37 = vadd.f32 %v1579_v18, %v1454_v35  ;;  %1391 = vst.msk [vmem:[#allocation3 + $0x18] sm:$0xff] %vm406_vm0, %v1359_v31  ;;  %3690 = vmatmul.msk.bf16.gmra.mxu0 %vm406_vm0, %v899_v34  ;;  %v1445_v31 = vld [vmem:[#allocation2 + $0x140] sm:$0xff]  ;;  %v1198_v35 = vpack.c.bf16 %v1147_v22, %v1146_v21 }
 0x14e   : > { %v1751_v38 = vld [vmem:[#allocation3 + $0x8] sm:$0xff] }
 0x14f   : > { %1688 = vst.msk [vmem:[#allocation3 + $0x10] sm:$0xff] %vm406_vm0, %v1656_v37  ;;  %v1953_v39 = vadd.f32 %v4387_v54, %v1751_v38  ;;  %3634 = vmatmul.msk.bf16.gmra.mxu2 %vm406_vm0, %v1196_v33 }
 0x150   : > { %v993_v42 = vpop.f32.mrf.mxu1 }
 0x151   : > { %1985 = vst.msk [vmem:[#allocation3 + $0x8] sm:$0xff] %vm406_vm0, %v1953_v39  ;;  %3662 = vmatmul.msk.bf16.gmra.mxu3 %vm406_vm0, %v4289_v60  ;;  %v1064_v43 = vadd.f32 %v993_v42, %v862_v41  ;;  %v1144_v60 = vld [vmem:[#allocation2 + $0x10a] sm:$0xff]  ;;  %v1496_v39 = vpack.c.bf16 %v1445_v31, %v1444_v28 }
 0x152   : > { %v1286_v44 = vpop.f32.mrf.mxu2  ;;  %v4419_v45 = vpop.f32.mrf.mxu0  ;;  %v1159_v54 = vld [vmem:[#allocation3 + $0x28] sm:$0xff]  ;;  %v1197_v63 = vpack.c.bf16 %v1145_v52, %v1144_v60 }
 0x153   : > { %v1360_v47 = vadd.f32 %v1286_v44, %v1158_v40  ;;  %1096 = vst.msk [vmem:[#allocation3 + $0x30] sm:$0xff] %vm406_vm0, %v1064_v43  ;;  %3607 = vmatmul.msk.bf16.gmra.mxu1 %vm406_vm0, %v899_v34  ;;  %v866_v43 = vld [vmem:[#allocation3 + $0x50] sm:$0xff]  ;;  %v301_v60 = vld [vmem:[%s3924_s8 + $0xf8] sm:$0xff] }
 0x154   : > { %v1455_v48 = vld [vmem:[#allocation3 + $0x18] sm:$0xff]  ;;  %v1584_v2 = vpop.f32.mrf.mxu3 }
 0x155   : > { %v1657_v49 = vadd.f32 %v1581_v36, %v1455_v48  ;;  %1392 = vst.msk [vmem:[#allocation3 + $0x20] sm:$0xff] %vm406_vm0, %v1360_v47 }
 0x156   : > { %v1752_v51 = vld [vmem:[#allocation3 + $0x10] sm:$0xff] }
 0x157   : > { %1689 = vst.msk [vmem:[#allocation3 + $0x18] sm:$0xff] %vm406_vm0, %v1657_v49  ;;  %v1954_v15 = vadd.f32 %v4392_v50, %v1752_v51 }
 0x158   : > { %v995_v55 = vpop.f32.mrf.mxu1 }
 0x159   : > { %1986 = vst.msk [vmem:[#allocation3 + $0x10] sm:$0xff] %vm406_vm0, %v1954_v15  ;;  %v1065_v58 = vadd.f32 %v995_v55, %v863_v53  ;;  %v300_v15 = vld [vmem:[%s3924_s8 + $0xf0] sm:$0xff]  ;;  %v3847_v53 = vld [vmem:[%s5090_s1] ss:$0 sm:$0xff] }
 0x15a   : > { %v1288_v23 = vpop.f32.mrf.mxu2  ;;  %v4427_v62 = vpop.f32.mrf.mxu0  ;;  %v1160_v8 = vld [vmem:[#allocation3 + $0x30] sm:$0xff]  ;;  %v337_v55 = vmul.f32 %v3847_v53, %v301_v60 }
 0x15b   : > { %v1361_v4 = vadd.f32 %v1288_v23, %v1159_v54  ;;  %1097 = vst.msk [vmem:[#allocation3 + $0x38] sm:$0xff] %vm406_vm0, %v1065_v58  ;;  %v336_v54 = vmul.f32 %v3847_v53, %v300_v15  ;;  %v1148_v58 = vld [vmem:[#allocation2 + $0x13a] sm:$0xff]  ;;  %v1149_v23 = vld [vmem:[#allocation2 + $0x142] sm:$0xff] }
 0x15c   : > { %v1456_v50 = vld [vmem:[#allocation3 + $0x20] sm:$0xff]  ;;  %v1586_v1 = vpop.f32.mrf.mxu3 }
 0x15d   : > { %v1658_v5 = vadd.f32 %v1584_v2, %v1456_v50  ;;  %1393 = vst.msk [vmem:[#allocation3 + $0x28] sm:$0xff] %vm406_vm0, %v1361_v4  ;;  %3691 = vmatmul.msk.bf16.gmra.mxu0 %vm406_vm0, %v900_v0  ;;  %v372_v4 = vadd.f32 %v3848_v61, %v336_v54 }
 0x15e   : > { %v1753_v6 = vld [vmem:[#allocation3 + $0x18] sm:$0xff] }
 0x15f   : > { %1690 = vst.msk [vmem:[#allocation3 + $0x20] sm:$0xff] %vm406_vm0, %v1658_v5  ;;  %v1955_v7 = vadd.f32 %v4401_v14, %v1753_v6  ;;  %3635 = vmatmul.msk.bf16.gmra.mxu2 %vm406_vm0, %v1197_v63  ;;  %v373_v63 = vadd.f32 %v3848_v61, %v337_v55  ;;  %v853_v5 = vld [vmem:[#allocation2 + $0x159] sm:$0xff]  ;;  %v404_v6 = vmax.f32 %v372_v4, 0.0 }
 0x160   : > { %v998_v10 = vpop.f32.mrf.mxu1  ;;  %v870_v55 = vld [vmem:[#allocation3 + $0x70] sm:$0xff] }
 0x161   : > { %1987 = vst.msk [vmem:[#allocation3 + $0x18] sm:$0xff] %vm406_vm0, %v1955_v7  ;;  %3663 = vmatmul.msk.bf16.gmra.mxu3 %vm406_vm0, %v1495_v3  ;;  %v1066_v11 = vadd.f32 %v998_v10, %v864_v9  ;;  %v405_v10 = vmax.f32 %v373_v63, 0.0 }
 0x162   : > { %v1291_v12 = vpop.f32.mrf.mxu2  ;;  %v4437_v13 = vpop.f32.mrf.mxu0  ;;  %v1161_v24 = vld [vmem:[#allocation3 + $0x38] sm:$0xff]  ;;  %493 = vst.msk [vmem:[#allocation2 + $0x181] sm:$0xff] %vm406_vm0, %v404_v6 }
 0x163   : > { %v1362_v16 = vadd.f32 %v1291_v12, %v1160_v8  ;;  %1098 = vst.msk [vmem:[#allocation3 + $0x40] sm:$0xff] %vm406_vm0, %v1066_v11  ;;  %3608 = vmatmul.msk.bf16.gmra.mxu1 %vm406_vm0, %v900_v0  ;;  %v1446_v8 = vld [vmem:[#allocation2 + $0x150] sm:$0xff]  ;;  %v1199_v12 = vpack.c.bf16 %v1149_v23, %v1148_v58 }
 0x164   : > { %v1457_v17 = vld [vmem:[#allocation3 + $0x28] sm:$0xff]  ;;  %v1589_v14 = vpop.f32.mrf.mxu3  ;;  %494 = vst.msk [vmem:[#allocation2 + $0x189] sm:$0xff] %vm406_vm0, %v405_v10  ;;  %v1152_v6 = vld [vmem:[#allocation2 + $0x16a] sm:$0xff] }
 0x165   : > { %v1659_v18 = vadd.f32 %v1586_v1, %v1457_v17  ;;  %1394 = vst.msk [vmem:[#allocation3 + $0x30] sm:$0xff] %vm406_vm0, %v1362_v16  ;;  %v852_v1 = vld [vmem:[#allocation2 + $0x151] sm:$0xff] }
 0x166   : > { %v1754_v19 = vld [vmem:[#allocation3 + $0x20] sm:$0xff]  ;;  %v902_v16 = vpack.c.bf16 %v853_v5, %v852_v1  ;;  %v871_v5 = vld [vmem:[#allocation3 + $0x78] sm:$0xff] }
 0x167   : > { %1691 = vst.msk [vmem:[#allocation3 + $0x28] sm:$0xff] %vm406_vm0, %v1659_v18  ;;  %v1956_v20 = vadd.f32 %v4408_v32, %v1754_v19  ;;  %v901_v32 = vpack.c.bf16 %v851_v27, %v850_v26 }
 0x168   : > { %v1000_v25 = vpop.f32.mrf.mxu1 }
 0x169   : > { %1988 = vst.msk [vmem:[#allocation3 + $0x20] sm:$0xff] %vm406_vm0, %v1956_v20  ;;  %v1067_v29 = vadd.f32 %v1000_v25, %v865_v46  ;;  %v868_v46 = vld [vmem:[#allocation3 + $0x60] sm:$0xff] }
 0x16a   : > { %v1293_v30 = vpop.f32.mrf.mxu2  ;;  %v4445_v33 = vpop.f32.mrf.mxu0  ;;  %v1162_v42 = vld [vmem:[#allocation3 + $0x40] sm:$0xff] }
 0x16b   : > { %v1363_v34 = vadd.f32 %v1293_v30, %v1161_v24  ;;  %1099 = vst.msk [vmem:[#allocation3 + $0x48] sm:$0xff] %vm406_vm0, %v1067_v29 }
 0x16c   : > { %v1458_v36 = vld [vmem:[#allocation3 + $0x30] sm:$0xff]  ;;  %v1591_v37 = vpop.f32.mrf.mxu3 }
 0x16d   : > { %v1660_v38 = vadd.f32 %v1589_v14, %v1458_v36  ;;  %1395 = vst.msk [vmem:[#allocation3 + $0x38] sm:$0xff] %vm406_vm0, %v1363_v34  ;;  %3692 = vmatmul.msk.bf16.gmra.mxu0 %vm406_vm0, %v901_v32  ;;  %v869_v36 = vld [vmem:[#allocation3 + $0x68] sm:$0xff] }
 0x16e   : > { %v1755_v40 = vld [vmem:[#allocation3 + $0x28] sm:$0xff] }
 0x16f   : > { %1692 = vst.msk [vmem:[#allocation3 + $0x30] sm:$0xff] %vm406_vm0, %v1660_v38  ;;  %v1957_v41 = vadd.f32 %v4419_v45, %v1755_v40  ;;  %3636 = vmatmul.msk.bf16.gmra.mxu2 %vm406_vm0, %v1198_v35  ;;  %v1150_v35 = vld [vmem:[#allocation2 + $0x152] sm:$0xff] }
 0x170   : > { %v1003_v44 = vpop.f32.mrf.mxu1  ;;  %v855_v40 = vld [vmem:[#allocation2 + $0x171] sm:$0xff] }
 0x171   : > { %1989 = vst.msk [vmem:[#allocation3 + $0x28] sm:$0xff] %vm406_vm0, %v1957_v41  ;;  %3664 = vmatmul.msk.bf16.gmra.mxu3 %vm406_vm0, %v1496_v39  ;;  %v1068_v47 = vadd.f32 %v1003_v44, %v866_v43  ;;  %v854_v39 = vld [vmem:[#allocation2 + $0x169] sm:$0xff] }
 0x172   : > { %v1296_v48 = vpop.f32.mrf.mxu2  ;;  %v4455_v2 = vpop.f32.mrf.mxu0  ;;  %v1163_v0 = vld [vmem:[#allocation3 + $0x48] sm:$0xff]  ;;  %v1448_v43 = vld [vmem:[#allocation2 + $0x168] sm:$0xff]  ;;  %v1449_v44 = vld [vmem:[#allocation2 + $0x170] sm:$0xff] }
 0x173   : > { %v1364_v49 = vadd.f32 %v1296_v48, %v1162_v42  ;;  %1100 = vst.msk [vmem:[#allocation3 + $0x50] sm:$0xff] %vm406_vm0, %v1068_v47  ;;  %3609 = vmatmul.msk.bf16.gmra.mxu1 %vm406_vm0, %v901_v32  ;;  %v1151_v32 = vld [vmem:[#allocation2 + $0x15a] sm:$0xff]  ;;  %v1498_v60 = vpack.c.bf16 %v1449_v44, %v1448_v43  ;;  %v2018_v44 = vld [vmem:[#allocation2 + $0x32] sm:$0xff] }
 0x174   : > { %v1459_v45 = vld [vmem:[#allocation3 + $0x38] sm:$0xff]  ;;  %v1594_v51 = vpop.f32.mrf.mxu3 }
 0x175   : > { %v1661_v52 = vadd.f32 %v1591_v37, %v1459_v45  ;;  %1396 = vst.msk [vmem:[#allocation3 + $0x40] sm:$0xff] %vm406_vm0, %v1364_v49  ;;  %v1200_v49 = vpack.c.bf16 %v1151_v32, %v1150_v35 }
 0x176   : > { %v1756_v56 = vld [vmem:[#allocation3 + $0x30] sm:$0xff] }
 0x177   : > { %1693 = vst.msk [vmem:[#allocation3 + $0x38] sm:$0xff] %vm406_vm0, %v1661_v52  ;;  %v1958_v57 = vadd.f32 %v4427_v62, %v1756_v56  ;;  %v1447_v62 = vld [vmem:[#allocation2 + $0x158] sm:$0xff] }
 0x178   : > { %v1005_v50 = vpop.f32.mrf.mxu1  ;;  %v1497_v19 = vpack.c.bf16 %v1447_v62, %v1446_v8 }
 0x179   : > { %1990 = vst.msk [vmem:[#allocation3 + $0x30] sm:$0xff] %vm406_vm0, %v1958_v57  ;;  %v1069_v3 = vadd.f32 %v1005_v50, %v867_v59  ;;  %v1749_v50 = vld [vmem:[#allocation2 + $0x189] sm:$0xff] }
 0x17a   : > { %v1298_v7 = vpop.f32.mrf.mxu2  ;;  %v4471_v9 = vpop.f32.mrf.mxu0  ;;  %v1164_v22 = vld [vmem:[#allocation3 + $0x50] sm:$0xff] }
 0x17b   : > { %v1365_v11 = vadd.f32 %v1298_v7, %v1163_v0  ;;  %1101 = vst.msk [vmem:[#allocation3 + $0x58] sm:$0xff] %vm406_vm0, %v1069_v3  ;;  %v1748_v0 = vld [vmem:[#allocation2 + $0x181] sm:$0xff]  ;;  %v1153_v7 = vld [vmem:[#allocation2 + $0x172] sm:$0xff] }
 0x17c   : > { %v1460_v17 = vld [vmem:[#allocation3 + $0x40] sm:$0xff]  ;;  %v1596_v14 = vpop.f32.mrf.mxu3  ;;  %v1797_v10 = vpack.c.bf16 %v1749_v50, %v1748_v0 }
 0x17d   : > { %v1662_v18 = vadd.f32 %v1594_v51, %v1460_v17  ;;  %1397 = vst.msk [vmem:[#allocation3 + $0x48] sm:$0xff] %vm406_vm0, %v1365_v11  ;;  %3693 = vmatmul.msk.bf16.gmra.mxu0 %vm406_vm0, %v902_v16 }
 0x17e   : > { %v1757_v20 = vld [vmem:[#allocation3 + $0x38] sm:$0xff] }
 0x17f   : > { %1694 = vst.msk [vmem:[#allocation3 + $0x40] sm:$0xff] %vm406_vm0, %v1662_v18  ;;  %v1959_v21 = vadd.f32 %v4437_v13, %v1757_v20  ;;  %3637 = vmatmul.msk.bf16.gmra.mxu2 %vm406_vm0, %v1199_v12  ;;  %v1450_v12 = vld [vmem:[#allocation2 + $0x180] sm:$0xff]  ;;  %v1201_v18 = vpack.c.bf16 %v1153_v7, %v1152_v6  ;;  %v2317_v7 = vld [vmem:[#allocation2 + $0x48] sm:$0xff] }
 0x180   : > { %v1008_v24 = vpop.f32.mrf.mxu1  ;;  %v2016_v20 = vld [vmem:[#allocation2 + $0x1a] sm:$0xff] }
 0x181   : > { %1991 = vst.msk [vmem:[#allocation3 + $0x38] sm:$0xff] %vm406_vm0, %v1959_v21  ;;  %3665 = vmatmul.msk.bf16.gmra.mxu3 %vm406_vm0, %v1497_v19  ;;  %v1070_v25 = vadd.f32 %v1008_v24, %v868_v46  ;;  %v2017_v21 = vld [vmem:[#allocation2 + $0x22] sm:$0xff] }
 0x182   : > { %v1301_v26 = vpop.f32.mrf.mxu2  ;;  %v4483_v27 = vpop.f32.mrf.mxu0  ;;  %v1165_v37 = vld [vmem:[#allocation3 + $0x58] sm:$0xff] }
 0x183   : > { %v1366_v29 = vadd.f32 %v1301_v26, %v1164_v22  ;;  %1102 = vst.msk [vmem:[#allocation3 + $0x60] sm:$0xff] %vm406_vm0, %v1070_v25  ;;  %3610 = vmatmul.msk.bf16.gmra.mxu1 %vm406_vm0, %v902_v16  ;;  %v1451_v16 = vld [vmem:[#allocation2 + $0x188] sm:$0xff]  ;;  %v2080_v26 = vpack.c.bf16 %v2017_v21, %v2016_v20 }
 0x184   : > { %v1461_v30 = vld [vmem:[#allocation3 + $0x48] sm:$0xff]  ;;  %v1599_v13 = vpop.f32.mrf.mxu3  ;;  %v1499_v46 = vpack.c.bf16 %v1451_v16, %v1450_v12  ;;  %v2020_v12 = vld [vmem:[#allocation2 + $0x4a] sm:$0xff] }
 0x185   : > { %v1663_v28 = vadd.f32 %v1596_v14, %v1461_v30  ;;  %1398 = vst.msk [vmem:[#allocation3 + $0x50] sm:$0xff] %vm406_vm0, %v1366_v29  ;;  %v872_v30 = vld [vmem:[#allocation3 + $0x80] sm:$0xff] }
 0x186   : > { %v1758_v31 = vld [vmem:[#allocation3 + $0x40] sm:$0xff] }
 0x187   : > { %1695 = vst.msk [vmem:[#allocation3 + $0x48] sm:$0xff] %vm406_vm0, %v1663_v28  ;;  %v1960_v34 = vadd.f32 %v4445_v33, %v1758_v31  ;;  %v903_v33 = vpack.c.bf16 %v855_v40, %v854_v39  ;;  %v2315_v39 = vld [vmem:[#allocation2 + $0x30] sm:$0xff]  ;;  %v2316_v40 = vld [vmem:[#allocation2 + $0x38] sm:$0xff] }
 0x188   : > { %v1010_v38 = vpop.f32.mrf.mxu1  ;;  %v2021_v16 = vld [vmem:[#allocation2 + $0x52] sm:$0xff] }
 0x189   : > { %1992 = vst.msk [vmem:[#allocation3 + $0x40] sm:$0xff] %vm406_vm0, %v1960_v34  ;;  %v1071_v41 = vadd.f32 %v1010_v38, %v869_v36 }
 0x18a   : > { %v1303_v42 = vpop.f32.mrf.mxu2  ;;  %v4491_v47 = vpop.f32.mrf.mxu0  ;;  %v1166_v54 = vld [vmem:[#allocation3 + $0x60] sm:$0xff] }
 0x18b   : > { %v1367_v48 = vadd.f32 %v1303_v42, %v1165_v37  ;;  %1103 = vst.msk [vmem:[#allocation3 + $0x68] sm:$0xff] %vm406_vm0, %v1071_v41  ;;  %v873_v41 = vld [vmem:[#allocation3 + $0x88] sm:$0xff] }
 0x18c   : > { %v1462_v45 = vld [vmem:[#allocation3 + $0x50] sm:$0xff]  ;;  %v1601_v51 = vpop.f32.mrf.mxu3 }
 0x18d   : > { %v1664_v15 = vadd.f32 %v1599_v13, %v1462_v45  ;;  %1399 = vst.msk [vmem:[#allocation3 + $0x58] sm:$0xff] %vm406_vm0, %v1367_v48  ;;  %3694 = vmatmul.msk.bf16.gmra.mxu0 %vm406_vm0, %v903_v33  ;;  %v2019_v48 = vld [vmem:[#allocation2 + $0x3a] sm:$0xff]  ;;  %v2613_v45 = vld [vmem:[#allocation2 + $0x31] sm:$0xff] }
 0x18e   : > { %v1759_v52 = vld [vmem:[#allocation3 + $0x48] sm:$0xff] }
 0x18f   : > { %1696 = vst.msk [vmem:[#allocation3 + $0x50] sm:$0xff] %vm406_vm0, %v1664_v15  ;;  %v1961_v53 = vadd.f32 %v4455_v2, %v1759_v52  ;;  %3638 = vmatmul.msk.bf16.gmra.mxu2 %vm406_vm0, %v1200_v49  ;;  %v2379_v52 = vpack.c.bf16 %v2316_v40, %v2315_v39 }
 0x190   : > { %v1013_v56 = vpop.f32.mrf.mxu1 }
 0x191   : > { %1993 = vst.msk [vmem:[#allocation3 + $0x48] sm:$0xff] %vm406_vm0, %v1961_v53  ;;  %3666 = vmatmul.msk.bf16.gmra.mxu3 %vm406_vm0, %v1498_v60  ;;  %v1072_v57 = vadd.f32 %v1013_v56, %v870_v55 }
 0x192   : > { %v1306_v58 = vpop.f32.mrf.mxu2  ;;  %v4501_v23 = vpop.f32.mrf.mxu0  ;;  %v1167_v3 = vld [vmem:[#allocation3 + $0x68] sm:$0xff] }
 0x193   : > { %v1368_v59 = vadd.f32 %v1306_v58, %v1166_v54  ;;  %1104 = vst.msk [vmem:[#allocation3 + $0x70] sm:$0xff] %vm406_vm0, %v1072_v57  ;;  %3611 = vmatmul.msk.bf16.gmra.mxu1 %vm406_vm0, %v903_v33 }
 0x194   : > { %v1463_v61 = vld [vmem:[#allocation3 + $0x58] sm:$0xff]  ;;  %v1604_v2 = vpop.f32.mrf.mxu3 }
 0x195   : > { %v1665_v4 = vadd.f32 %v1601_v51, %v1463_v61  ;;  %1400 = vst.msk [vmem:[#allocation3 + $0x60] sm:$0xff] %vm406_vm0, %v1368_v59  ;;  %v2614_v51 = vld [vmem:[#allocation2 + $0x39] sm:$0xff] }
 0x196   : > { %v1760_v63 = vld [vmem:[#allocation3 + $0x50] sm:$0xff]  ;;  %v2677_v56 = vpack.c.bf16 %v2614_v51, %v2613_v45 }
 0x197   : > { %1697 = vst.msk [vmem:[#allocation3 + $0x58] sm:$0xff] %vm406_vm0, %v1665_v4  ;;  %v1962_v1 = vadd.f32 %v4471_v9, %v1760_v63  ;;  %v874_v61 = vld [vmem:[#allocation3 + $0x90] sm:$0xff] }
 0x198   : > { %v1015_v8 = vpop.f32.mrf.mxu1 }
 0x199   : > { %1994 = vst.msk [vmem:[#allocation3 + $0x50] sm:$0xff] %vm406_vm0, %v1962_v1  ;;  %v1073_v62 = vadd.f32 %v1015_v8, %v871_v5  ;;  %v2318_v8 = vld [vmem:[#allocation2 + $0x50] sm:$0xff] }
 0x19a   : > { %v1308_v11 = vpop.f32.mrf.mxu2  ;;  %v4509_v17 = vpop.f32.mrf.mxu0  ;;  %v1168_v29 = vld [vmem:[#allocation3 + $0x70] sm:$0xff] }
 0x19b   : > { %v1369_v14 = vadd.f32 %v1308_v11, %v1167_v3  ;;  %1105 = vst.msk [vmem:[#allocation3 + $0x78] sm:$0xff] %vm406_vm0, %v1073_v62  ;;  %v875_v62 = vld [vmem:[#allocation3 + $0x98] sm:$0xff] }
 0x19c   : > { %v1464_v19 = vld [vmem:[#allocation3 + $0x60] sm:$0xff]  ;;  %v1606_v9 = vpop.f32.mrf.mxu3 }
 0x19d   : > { %v1666_v22 = vadd.f32 %v1604_v2, %v1464_v19  ;;  %1401 = vst.msk [vmem:[#allocation3 + $0x68] sm:$0xff] %vm406_vm0, %v1369_v14  ;;  %3695 = vmatmul.msk.bf16.gmra.mxu0 %vm406_vm0, %v1797_v10  ;;  %v2615_v19 = vld [vmem:[#allocation2 + $0x49] sm:$0xff] }
 0x19e   : > { %v1761_v24 = vld [vmem:[#allocation3 + $0x58] sm:$0xff] }
 0x19f   : > { %1698 = vst.msk [vmem:[#allocation3 + $0x60] sm:$0xff] %vm406_vm0, %v1666_v22  ;;  %v1963_v25 = vadd.f32 %v4483_v27, %v1761_v24  ;;  %3639 = vmatmul.msk.bf16.gmra.mxu2 %vm406_vm0, %v1201_v18  ;;  %v2380_v22 = vpack.c.bf16 %v2318_v8, %v2317_v7 }
 0x1a0   : > { %v1018_v13 = vpop.f32.mrf.mxu1 }
 0x1a1   : > { %1995 = vst.msk [vmem:[#allocation3 + $0x58] sm:$0xff] %vm406_vm0, %v1963_v25  ;;  %3667 = vmatmul.msk.bf16.gmra.mxu3 %vm406_vm0, %v1499_v46  ;;  %v1074_v28 = vadd.f32 %v1018_v13, %v872_v30 }
 0x1a2   : > { %v1311_v31 = vpop.f32.mrf.mxu2  ;;  %v4519_v34 = vpop.f32.mrf.mxu0  ;;  %v1169_v42 = vld [vmem:[#allocation3 + $0x78] sm:$0xff] }
 0x1a3   : > { %v1370_v35 = vadd.f32 %v1311_v31, %v1168_v29  ;;  %1106 = vst.msk [vmem:[#allocation3 + $0x80] sm:$0xff] %vm406_vm0, %v1074_v28  ;;  %3708 = vmatmul.msk.bf16.vlgmr.msra.gmra.mxu1 %vm406_vm0, %v2080_v26  ;;  %v876_v28 = vld [vmem:[#allocation3 + $0xa0] sm:$0xff] }
 0x1a4   : > { %v1465_v27 = vld [vmem:[#allocation3 + $0x68] sm:$0xff]  ;;  %v1609_v32 = vpop.f32.mrf.mxu3 }
 0x1a5   : > { %v1667_v36 = vadd.f32 %v1606_v9, %v1465_v27  ;;  %1402 = vst.msk [vmem:[#allocation3 + $0x70] sm:$0xff] %vm406_vm0, %v1370_v35  ;;  %v2616_v9 = vld [vmem:[#allocation2 + $0x51] sm:$0xff] }
 0x1a6   : > { %v1762_v37 = vld [vmem:[#allocation3 + $0x60] sm:$0xff]  ;;  %v2678_v26 = vpack.c.bf16 %v2616_v9, %v2615_v19 }
 0x1a7   : > { %1699 = vst.msk [vmem:[#allocation3 + $0x68] sm:$0xff] %vm406_vm0, %v1667_v36  ;;  %v1964_v38 = vadd.f32 %v4491_v47, %v1762_v37  ;;  %v2081_v47 = vpack.c.bf16 %v2019_v48, %v2018_v44 }
 0x1a8   : > { %v1020_v43 = vpop.f32.mrf.mxu1 }
 0x1a9   : > { %1996 = vst.msk [vmem:[#allocation3 + $0x60] sm:$0xff] %vm406_vm0, %v1964_v38  ;;  %v1075_v49 = vadd.f32 %v1020_v43, %v873_v41  ;;  %v2319_v41 = vld [vmem:[#allocation2 + $0x60] sm:$0xff]  ;;  %v877_v43 = vld [vmem:[#allocation3 + $0xa8] sm:$0xff] }
 0x1aa   : > { %v1313_v33 = vpop.f32.mrf.mxu2  ;;  %v4527_v15 = vpop.f32.mrf.mxu0  ;;  %v1170_v59 = vld [vmem:[#allocation3 + $0x80] sm:$0xff] }
 0x1ab   : > { %v1371_v60 = vadd.f32 %v1313_v33, %v1169_v42  ;;  %1107 = vst.msk [vmem:[#allocation3 + $0x88] sm:$0xff] %vm406_vm0, %v1075_v49  ;;  %v2320_v42 = vld [vmem:[#allocation2 + $0x68] sm:$0xff] }
 0x1ac   : > { %v1466_v53 = vld [vmem:[#allocation3 + $0x70] sm:$0xff]  ;;  %v1611_v54 = vpop.f32.mrf.mxu3  ;;  %v2023_v33 = vld [vmem:[#allocation2 + $0x6a] sm:$0xff] }
 0x1ad   : > { %v1668_v55 = vadd.f32 %v1609_v32, %v1466_v53  ;;  %1403 = vst.msk [vmem:[#allocation3 + $0x78] sm:$0xff] %vm406_vm0, %v1371_v60  ;;  %3792 = vmatmul.msk.bf16.vlgmr.msra.gmra.mxu0 %vm406_vm0, %v2081_v47  ;;  %v2022_v49 = vld [vmem:[#allocation2 + $0x62] sm:$0xff] }
 0x1ae   : > { %v1763_v57 = vld [vmem:[#allocation3 + $0x68] sm:$0xff]  ;;  %v2617_v60 = vld [vmem:[#allocation2 + $0x61] sm:$0xff] }
 0x1af   : > { %1700 = vst.msk [vmem:[#allocation3 + $0x70] sm:$0xff] %vm406_vm0, %v1668_v55  ;;  %v1965_v58 = vadd.f32 %v4501_v23, %v1763_v57  ;;  %3736 = vmatmul.msk.bf16.vlgmr.msra.gmra.mxu2 %vm406_vm0, %v2379_v52  ;;  %v2618_v52 = vld [vmem:[#allocation2 + $0x69] sm:$0xff] }
 0x1b0   : > { %v1023_v2 = vpop.f32.mrf.mxu1 }
 0x1b1   : > { %1997 = vst.msk [vmem:[#allocation3 + $0x68] sm:$0xff] %vm406_vm0, %v1965_v58  ;;  %3764 = vmatmul.msk.bf16.vlgmr.msra.gmra.mxu3 %vm406_vm0, %v2677_v56  ;;  %v1076_v4 = vadd.f32 %v1023_v2, %v874_v61  ;;  %v2679_v58 = vpack.c.bf16 %v2618_v52, %v2617_v60 }
 0x1b2   : > { %v1316_v63 = vpop.f32.mrf.mxu2  ;;  %v4537_v0 = vpop.f32.mrf.mxu0  ;;  %v1171_v10 = vld [vmem:[#allocation3 + $0x88] sm:$0xff] }
 0x1b3   : > { %v1372_v50 = vadd.f32 %v1316_v63, %v1170_v59  ;;  %1108 = vst.msk [vmem:[#allocation3 + $0x90] sm:$0xff] %vm406_vm0, %v1076_v4  ;;  %3709 = vmatmul.msk.bf16.gmra.mxu1 %vm406_vm0, %v2081_v47  ;;  %v878_v4 = vld [vmem:[#allocation3 + $0xb0] sm:$0xff] }
 0x1b4   : > { %v1467_v1 = vld [vmem:[#allocation3 + $0x78] sm:$0xff]  ;;  %v1614_v23 = vpop.f32.mrf.mxu3 }
 0x1b5   : > { %v1669_v5 = vadd.f32 %v1611_v54, %v1467_v1  ;;  %1404 = vst.msk [vmem:[#allocation3 + $0x80] sm:$0xff] %vm406_vm0, %v1372_v50  ;;  %v2381_v54 = vpack.c.bf16 %v2320_v42, %v2319_v41 }
 0x1b6   : > { %v1764_v3 = vld [vmem:[#allocation3 + $0x70] sm:$0xff] }
 0x1b7   : > { %1701 = vst.msk [vmem:[#allocation3 + $0x78] sm:$0xff] %vm406_vm0, %v1669_v5  ;;  %v1966_v6 = vadd.f32 %v4509_v17, %v1764_v3  ;;  %v2082_v17 = vpack.c.bf16 %v2021_v16, %v2020_v12 }
 0x1b8   : > { %v1025_v11 = vpop.f32.mrf.mxu1 }
 0x1b9   : > { %1998 = vst.msk [vmem:[#allocation3 + $0x70] sm:$0xff] %vm406_vm0, %v1966_v6  ;;  %v1077_v14 = vadd.f32 %v1025_v11, %v875_v62  ;;  %v2321_v62 = vld [vmem:[#allocation2 + $0x78] sm:$0xff]  ;;  %v879_v11 = vld [vmem:[#allocation3 + $0xb8] sm:$0xff] }
 0x1ba   : > { %v1318_v18 = vpop.f32.mrf.mxu2  ;;  %v4545_v20 = vpop.f32.mrf.mxu0  ;;  %v1172_v13 = vld [vmem:[#allocation3 + $0x90] sm:$0xff] }
 0x1bb   : > { %v1373_v21 = vadd.f32 %v1318_v18, %v1171_v10  ;;  %1109 = vst.msk [vmem:[#allocation3 + $0x98] sm:$0xff] %vm406_vm0, %v1077_v14  ;;  %v2322_v10 = vld [vmem:[#allocation2 + $0x80] sm:$0xff] }
 0x1bc   : > { %v1468_v46 = vld [vmem:[#allocation3 + $0x80] sm:$0xff]  ;;  %v1616_v24 = vpop.f32.mrf.mxu3  ;;  %v2024_v14 = vld [vmem:[#allocation2 + $0x7a] sm:$0xff]  ;;  %v2025_v18 = vld [vmem:[#allocation2 + $0x82] sm:$0xff] }
 0x1bd   : > { %v1670_v25 = vadd.f32 %v1614_v23, %v1468_v46  ;;  %1405 = vst.msk [vmem:[#allocation3 + $0x88] sm:$0xff] %vm406_vm0, %v1373_v21  ;;  %3793 = vmatmul.msk.bf16.gmra.mxu0 %vm406_vm0, %v2082_v17  ;;  %v2619_v21 = vld [vmem:[#allocation2 + $0x79] sm:$0xff] }
 0x1be   : > { %v1765_v29 = vld [vmem:[#allocation3 + $0x78] sm:$0xff] }
 0x1bf   : > { %1702 = vst.msk [vmem:[#allocation3 + $0x80] sm:$0xff] %vm406_vm0, %v1670_v25  ;;  %v1967_v30 = vadd.f32 %v4519_v34, %v1765_v29  ;;  %3737 = vmatmul.msk.bf16.gmra.mxu2 %vm406_vm0, %v2380_v22  ;;  %v2620_v22 = vld [vmem:[#allocation2 + $0x81] sm:$0xff] }
 0x1c0   : > { %v1028_v31 = vpop.f32.mrf.mxu1 }
 0x1c1   : > { %1999 = vst.msk [vmem:[#allocation3 + $0x78] sm:$0xff] %vm406_vm0, %v1967_v30  ;;  %3765 = vmatmul.msk.bf16.gmra.mxu3 %vm406_vm0, %v2678_v26  ;;  %v1078_v35 = vadd.f32 %v1028_v31, %v876_v28  ;;  %v2680_v30 = vpack.c.bf16 %v2620_v22, %v2619_v21 }
 0x1c2   : > { %v1321_v27 = vpop.f32.mrf.mxu2  ;;  %v4555_v32 = vpop.f32.mrf.mxu0  ;;  %v1173_v44 = vld [vmem:[#allocation3 + $0x98] sm:$0xff] }
 0x1c3   : > { %v1374_v36 = vadd.f32 %v1321_v27, %v1172_v13  ;;  %1110 = vst.msk [vmem:[#allocation3 + $0xa0] sm:$0xff] %vm406_vm0, %v1078_v35  ;;  %3710 = vmatmul.msk.bf16.gmra.mxu1 %vm406_vm0, %v2082_v17  ;;  %v880_v35 = vld [vmem:[#allocation3 + $0xc0] sm:$0xff] }
 0x1c4   : > { %v1469_v37 = vld [vmem:[#allocation3 + $0x88] sm:$0xff]  ;;  %v1619_v34 = vpop.f32.mrf.mxu3 }
 0x1c5   : > { %v1671_v38 = vadd.f32 %v1616_v24, %v1469_v37  ;;  %1406 = vst.msk [vmem:[#allocation3 + $0x90] sm:$0xff] %vm406_vm0, %v1374_v36  ;;  %v2382_v24 = vpack.c.bf16 %v2322_v10, %v2321_v62 }
 0x1c6   : > { %v1766_v39 = vld [vmem:[#allocation3 + $0x80] sm:$0xff] }
 0x1c7   : > { %1703 = vst.msk [vmem:[#allocation3 + $0x88] sm:$0xff] %vm406_vm0, %v1671_v38  ;;  %v1968_v40 = vadd.f32 %v4527_v15, %v1766_v39  ;;  %v2083_v15 = vpack.c.bf16 %v2023_v33, %v2022_v49 }
 0x1c8   : > { %v1030_v48 = vpop.f32.mrf.mxu1 }
 0x1c9   : > { %2000 = vst.msk [vmem:[#allocation3 + $0x80] sm:$0xff] %vm406_vm0, %v1968_v40  ;;  %v1079_v45 = vadd.f32 %v1030_v48, %v877_v43  ;;  %v2323_v43 = vld [vmem:[#allocation2 + $0x90] sm:$0xff]  ;;  %v881_v48 = vld [vmem:[#allocation3 + $0xc8] sm:$0xff] }
 0x1ca   : > { %v1323_v51 = vpop.f32.mrf.mxu2  ;;  %v4563_v47 = vpop.f32.mrf.mxu0  ;;  %v1174_v2 = vld [vmem:[#allocation3 + $0xa0] sm:$0xff] }
 0x1cb   : > { %v1375_v53 = vadd.f32 %v1323_v51, %v1173_v44  ;;  %1111 = vst.msk [vmem:[#allocation3 + $0xa8] sm:$0xff] %vm406_vm0, %v1079_v45  ;;  %v2324_v44 = vld [vmem:[#allocation2 + $0x98] sm:$0xff] }
 0x1cc   : > { %v1470_v55 = vld [vmem:[#allocation3 + $0x90] sm:$0xff]  ;;  %v1621_v56 = vpop.f32.mrf.mxu3  ;;  %v2026_v45 = vld [vmem:[#allocation2 + $0x92] sm:$0xff] }
 0x1cd   : > { %v1672_v57 = vadd.f32 %v1619_v34, %v1470_v55  ;;  %1407 = vst.msk [vmem:[#allocation3 + $0x98] sm:$0xff] %vm406_vm0, %v1375_v53  ;;  %3794 = vmatmul.msk.bf16.gmra.mxu0 %vm406_vm0, %v2083_v15  ;;  %v2027_v51 = vld [vmem:[#allocation2 + $0x9a] sm:$0xff]  ;;  %v2621_v53 = vld [vmem:[#allocation2 + $0x91] sm:$0xff] }
 0x1ce   : > { %v1767_v59 = vld [vmem:[#allocation3 + $0x88] sm:$0xff] }
 0x1cf   : > { %1704 = vst.msk [vmem:[#allocation3 + $0x90] sm:$0xff] %vm406_vm0, %v1672_v57  ;;  %v1969_v61 = vadd.f32 %v4537_v0, %v1767_v59  ;;  %3738 = vmatmul.msk.bf16.gmra.mxu2 %vm406_vm0, %v2381_v54  ;;  %v2622_v54 = vld [vmem:[#allocation2 + $0x99] sm:$0xff] }
 0x1d0   : > { %v1033_v63 = vpop.f32.mrf.mxu1 }
 0x1d1   : > { %2001 = vst.msk [vmem:[#allocation3 + $0x88] sm:$0xff] %vm406_vm0, %v1969_v61  ;;  %3766 = vmatmul.msk.bf16.gmra.mxu3 %vm406_vm0, %v2679_v58  ;;  %v1080_v50 = vadd.f32 %v1033_v63, %v878_v4  ;;  %v2681_v61 = vpack.c.bf16 %v2622_v54, %v2621_v53 }
 0x1d2   : > { %v1326_v1 = vpop.f32.mrf.mxu2  ;;  %v4573_v23 = vpop.f32.mrf.mxu0  ;;  %v1175_v12 = vld [vmem:[#allocation3 + $0xa8] sm:$0xff] }
 0x1d3   : > { %v1376_v5 = vadd.f32 %v1326_v1, %v1174_v2  ;;  %1112 = vst.msk [vmem:[#allocation3 + $0xb0] sm:$0xff] %vm406_vm0, %v1080_v50  ;;  %3711 = vmatmul.msk.bf16.gmra.mxu1 %vm406_vm0, %v2083_v15  ;;  %v882_v50 = vld [vmem:[#allocation3 + $0xd0] sm:$0xff] }
 0x1d4   : > { %v1471_v3 = vld [vmem:[#allocation3 + $0x98] sm:$0xff]  ;;  %v1624_v0 = vpop.f32.mrf.mxu3 }
 0x1d5   : > { %v1673_v6 = vadd.f32 %v1621_v56, %v1471_v3  ;;  %1408 = vst.msk [vmem:[#allocation3 + $0xa0] sm:$0xff] %vm406_vm0, %v1376_v5  ;;  %v2383_v56 = vpack.c.bf16 %v2324_v44, %v2323_v43 }
 0x1d6   : > { %v1768_v7 = vld [vmem:[#allocation3 + $0x90] sm:$0xff] }
 0x1d7   : > { %1705 = vst.msk [vmem:[#allocation3 + $0x98] sm:$0xff] %vm406_vm0, %v1673_v6  ;;  %v1970_v8 = vadd.f32 %v4545_v20, %v1768_v7  ;;  %v2084_v20 = vpack.c.bf16 %v2025_v18, %v2024_v14 }
 0x1d8   : > { %v1035_v16 = vpop.f32.mrf.mxu1 }
 0x1d9   : > { %2002 = vst.msk [vmem:[#allocation3 + $0x90] sm:$0xff] %vm406_vm0, %v1970_v8  ;;  %v1081_v19 = vadd.f32 %v1035_v16, %v879_v11  ;;  %v2325_v11 = vld [vmem:[#allocation2 + $0xa8] sm:$0xff] }
 0x1da   : > { %v1328_v9 = vpop.f32.mrf.mxu2  ;;  %v4581_v17 = vpop.f32.mrf.mxu0  ;;  %v1176_v31 = vld [vmem:[#allocation3 + $0xb0] sm:$0xff]  ;;  %v883_v16 = vld [vmem:[#allocation3 + $0xd8] sm:$0xff] }
 0x1db   : > { %v1377_v46 = vadd.f32 %v1328_v9, %v1175_v12  ;;  %1113 = vst.msk [vmem:[#allocation3 + $0xb8] sm:$0xff] %vm406_vm0, %v1081_v19  ;;  %v2326_v12 = vld [vmem:[#allocation2 + $0xb0] sm:$0xff] }
 0x1dc   : > { %v1472_v25 = vld [vmem:[#allocation3 + $0xa0] sm:$0xff]  ;;  %v1626_v26 = vpop.f32.mrf.mxu3 }
 0x1dd   : > { %v1674_v29 = vadd.f32 %v1624_v0, %v1472_v25  ;;  %1409 = vst.msk [vmem:[#allocation3 + $0xa8] sm:$0xff] %vm406_vm0, %v1377_v46  ;;  %3795 = vmatmul.msk.bf16.gmra.mxu0 %vm406_vm0, %v2084_v20  ;;  %v2028_v19 = vld [vmem:[#allocation2 + $0xaa] sm:$0xff]  ;;  %v2029_v9 = vld [vmem:[#allocation2 + $0xb2] sm:$0xff] }
 0x1de   : > { %v1769_v13 = vld [vmem:[#allocation3 + $0x98] sm:$0xff] }
 0x1df   : > { %1706 = vst.msk [vmem:[#allocation3 + $0xa0] sm:$0xff] %vm406_vm0, %v1674_v29  ;;  %v1971_v28 = vadd.f32 %v4555_v32, %v1769_v13  ;;  %3739 = vmatmul.msk.bf16.gmra.mxu2 %vm406_vm0, %v2382_v24  ;;  %v2623_v46 = vld [vmem:[#allocation2 + $0xa9] sm:$0xff]  ;;  %v2624_v24 = vld [vmem:[#allocation2 + $0xb1] sm:$0xff] }
 0x1e0   : > { %v1038_v27 = vpop.f32.mrf.mxu1 }
 0x1e1   : > { %2003 = vst.msk [vmem:[#allocation3 + $0x98] sm:$0xff] %vm406_vm0, %v1971_v28  ;;  %3767 = vmatmul.msk.bf16.gmra.mxu3 %vm406_vm0, %v2680_v30  ;;  %v1082_v36 = vadd.f32 %v1038_v27, %v880_v35  ;;  %v2682_v28 = vpack.c.bf16 %v2624_v24, %v2623_v46 }
 0x1e2   : > { %v1331_v37 = vpop.f32.mrf.mxu2  ;;  %v4591_v34 = vpop.f32.mrf.mxu0  ;;  %v1177_v49 = vld [vmem:[#allocation3 + $0xb8] sm:$0xff] }
 0x1e3   : > { %v1378_v38 = vadd.f32 %v1331_v37, %v1176_v31  ;;  %1114 = vst.msk [vmem:[#allocation3 + $0xc0] sm:$0xff] %vm406_vm0, %v1082_v36  ;;  %3712 = vmatmul.msk.bf16.gmra.mxu1 %vm406_vm0, %v2084_v20  ;;  %v884_v36 = vld [vmem:[#allocation3 + $0xe0] sm:$0xff] }
 0x1e4   : > { %v1473_v39 = vld [vmem:[#allocation3 + $0xa8] sm:$0xff]  ;;  %v1629_v32 = vpop.f32.mrf.mxu3 }
 0x1e5   : > { %v1675_v40 = vadd.f32 %v1626_v26, %v1473_v39  ;;  %1410 = vst.msk [vmem:[#allocation3 + $0xb0] sm:$0xff] %vm406_vm0, %v1378_v38  ;;  %v2384_v26 = vpack.c.bf16 %v2326_v12, %v2325_v11 }
 0x1e6   : > { %v1770_v41 = vld [vmem:[#allocation3 + $0xa0] sm:$0xff] }
 0x1e7   : > { %1707 = vst.msk [vmem:[#allocation3 + $0xa8] sm:$0xff] %vm406_vm0, %v1675_v40  ;;  %v1972_v42 = vadd.f32 %v4563_v47, %v1770_v41  ;;  %v2085_v47 = vpack.c.bf16 %v2027_v51, %v2026_v45 }
 0x1e8   : > { %v1040_v33 = vpop.f32.mrf.mxu1 }
 0x1e9   : > { %2004 = vst.msk [vmem:[#allocation3 + $0xa0] sm:$0xff] %vm406_vm0, %v1972_v42  ;;  %v1083_v60 = vadd.f32 %v1040_v33, %v881_v48  ;;  %v2327_v48 = vld [vmem:[#allocation2 + $0xc0] sm:$0xff]  ;;  %v885_v33 = vld [vmem:[#allocation3 + $0xe8] sm:$0xff] }
 0x1ea   : > { %v1333_v52 = vpop.f32.mrf.mxu2  ;;  %v4599_v15 = vpop.f32.mrf.mxu0  ;;  %v1178_v63 = vld [vmem:[#allocation3 + $0xc0] sm:$0xff] }
 0x1eb   : > { %v1379_v55 = vadd.f32 %v1333_v52, %v1177_v49  ;;  %1115 = vst.msk [vmem:[#allocation3 + $0xc8] sm:$0xff] %vm406_vm0, %v1083_v60  ;;  %v2328_v49 = vld [vmem:[#allocation2 + $0xc8] sm:$0xff] }
 0x1ec   : > { %v1474_v57 = vld [vmem:[#allocation3 + $0xb0] sm:$0xff]  ;;  %v1631_v58 = vpop.f32.mrf.mxu3  ;;  %v2031_v52 = vld [vmem:[#allocation2 + $0xca] sm:$0xff] }
 0x1ed   : > { %v1676_v59 = vadd.f32 %v1629_v32, %v1474_v57  ;;  %1411 = vst.msk [vmem:[#allocation3 + $0xb8] sm:$0xff] %vm406_vm0, %v1379_v55  ;;  %3796 = vmatmul.msk.bf16.gmra.mxu0 %vm406_vm0, %v2085_v47  ;;  %v2030_v60 = vld [vmem:[#allocation2 + $0xc2] sm:$0xff] }
 0x1ee   : > { %v1771_v2 = vld [vmem:[#allocation3 + $0xa8] sm:$0xff]  ;;  %v2625_v55 = vld [vmem:[#allocation2 + $0xc1] sm:$0xff] }
 0x1ef   : > { %1708 = vst.msk [vmem:[#allocation3 + $0xb0] sm:$0xff] %vm406_vm0, %v1676_v59  ;;  %v1973_v4 = vadd.f32 %v4573_v23, %v1771_v2  ;;  %3740 = vmatmul.msk.bf16.gmra.mxu2 %vm406_vm0, %v2383_v56  ;;  %v2626_v56 = vld [vmem:[#allocation2 + $0xc9] sm:$0xff] }
 0x1f0   : > { %v1043_v1 = vpop.f32.mrf.mxu1 }
 0x1f1   : > { %2005 = vst.msk [vmem:[#allocation3 + $0xa8] sm:$0xff] %vm406_vm0, %v1973_v4  ;;  %3768 = vmatmul.msk.bf16.gmra.mxu3 %vm406_vm0, %v2681_v61  ;;  %v1084_v5 = vadd.f32 %v1043_v1, %v882_v50  ;;  %v2683_v4 = vpack.c.bf16 %v2626_v56, %v2625_v55 }
 0x1f2   : > { %v1336_v3 = vpop.f32.mrf.mxu2  ;;  %v4609_v0 = vpop.f32.mrf.mxu0  ;;  %v1179_v14 = vld [vmem:[#allocation3 + $0xc8] sm:$0xff] }
 0x1f3   : > { %v1380_v6 = vadd.f32 %v1336_v3, %v1178_v63  ;;  %1116 = vst.msk [vmem:[#allocation3 + $0xd0] sm:$0xff] %vm406_vm0, %v1084_v5  ;;  %3713 = vmatmul.msk.bf16.gmra.mxu1 %vm406_vm0, %v2085_v47  ;;  %v886_v5 = vld [vmem:[#allocation3 + $0xf0] sm:$0xff] }
 0x1f4   : > { %v1475_v7 = vld [vmem:[#allocation3 + $0xb8] sm:$0xff]  ;;  %v1634_v23 = vpop.f32.mrf.mxu3 }
 0x1f5   : > { %v1677_v8 = vadd.f32 %v1631_v58, %v1475_v7  ;;  %1412 = vst.msk [vmem:[#allocation3 + $0xc0] sm:$0xff] %vm406_vm0, %v1380_v6  ;;  %v2385_v58 = vpack.c.bf16 %v2328_v49, %v2327_v48 }
 0x1f6   : > { %v1772_v62 = vld [vmem:[#allocation3 + $0xb0] sm:$0xff] }
 0x1f7   : > { %1709 = vst.msk [vmem:[#allocation3 + $0xb8] sm:$0xff] %vm406_vm0, %v1677_v8  ;;  %v1974_v10 = vadd.f32 %v4581_v17, %v1772_v62  ;;  %v2086_v17 = vpack.c.bf16 %v2029_v9, %v2028_v19 }
 0x1f8   : > { %v1045_v18 = vpop.f32.mrf.mxu1 }
 0x1f9   : > { %2006 = vst.msk [vmem:[#allocation3 + $0xb0] sm:$0xff] %vm406_vm0, %v1974_v10  ;;  %v1085_v21 = vadd.f32 %v1045_v18, %v883_v16  ;;  %v2329_v16 = vld [vmem:[#allocation2 + $0xd8] sm:$0xff]  ;;  %v887_v18 = vld [vmem:[#allocation3 + $0xf8] sm:$0xff] }
 0x1fa   : > { %v1338_v22 = vpop.f32.mrf.mxu2  ;;  %v4617_v20 = vpop.f32.mrf.mxu0  ;;  %v1180_v27 = vld [vmem:[#allocation3 + $0xd0] sm:$0xff] }
 0x1fb   : > { %v1381_v25 = vadd.f32 %v1338_v22, %v1179_v14  ;;  %1117 = vst.msk [vmem:[#allocation3 + $0xd8] sm:$0xff] %vm406_vm0, %v1085_v21  ;;  %v2330_v14 = vld [vmem:[#allocation2 + $0xe0] sm:$0xff] }
 0x1fc   : > { %v1476_v29 = vld [vmem:[#allocation3 + $0xc0] sm:$0xff]  ;;  %v1636_v30 = vpop.f32.mrf.mxu3  ;;  %v2032_v21 = vld [vmem:[#allocation2 + $0xda] sm:$0xff]  ;;  %v2033_v22 = vld [vmem:[#allocation2 + $0xe2] sm:$0xff] }
 0x1fd   : > { %v1678_v13 = vadd.f32 %v1634_v23, %v1476_v29  ;;  %1413 = vst.msk [vmem:[#allocation3 + $0xc8] sm:$0xff] %vm406_vm0, %v1381_v25  ;;  %3797 = vmatmul.msk.bf16.gmra.mxu0 %vm406_vm0, %v2086_v17  ;;  %v2627_v25 = vld [vmem:[#allocation2 + $0xd9] sm:$0xff] }
 0x1fe   : > { %v1773_v31 = vld [vmem:[#allocation3 + $0xb8] sm:$0xff] }
 0x1ff   : > { %1710 = vst.msk [vmem:[#allocation3 + $0xc0] sm:$0xff] %vm406_vm0, %v1678_v13  ;;  %v1975_v35 = vadd.f32 %v4591_v34, %v1773_v31  ;;  %3741 = vmatmul.msk.bf16.gmra.mxu2 %vm406_vm0, %v2384_v26  ;;  %v2628_v26 = vld [vmem:[#allocation2 + $0xe1] sm:$0xff] }
 0x200   : > { %v1048_v37 = vpop.f32.mrf.mxu1 }
 0x201   : > { %2007 = vst.msk [vmem:[#allocation3 + $0xb8] sm:$0xff] %vm406_vm0, %v1975_v35  ;;  %3769 = vmatmul.msk.bf16.gmra.mxu3 %vm406_vm0, %v2682_v28  ;;  %v1086_v38 = vadd.f32 %v1048_v37, %v884_v36  ;;  %v2684_v35 = vpack.c.bf16 %v2628_v26, %v2627_v25 }
 0x202   : > { %v1341_v39 = vpop.f32.mrf.mxu2  ;;  %v4627_v32 = vpop.f32.mrf.mxu0  ;;  %v1181_v45 = vld [vmem:[#allocation3 + $0xd8] sm:$0xff] }
 0x203   : > { %v1382_v40 = vadd.f32 %v1341_v39, %v1180_v27  ;;  %1118 = vst.msk [vmem:[#allocation3 + $0xe0] sm:$0xff] %vm406_vm0, %v1086_v38  ;;  %3714 = vmatmul.msk.bf16.gmra.mxu1 %vm406_vm0, %v2086_v17  ;;  %v2048_v38 = vld [vmem:[#allocation3] sm:$0xff] }
 0x204   : > { %v1477_v41 = vld [vmem:[#allocation3 + $0xc8] sm:$0xff]  ;;  %v1639_v34 = vpop.f32.mrf.mxu3 }
 0x205   : > { %v1679_v42 = vadd.f32 %v1636_v30, %v1477_v41  ;;  %1414 = vst.msk [vmem:[#allocation3 + $0xd0] sm:$0xff] %vm406_vm0, %v1382_v40  ;;  %v2386_v30 = vpack.c.bf16 %v2330_v14, %v2329_v16 }
 0x206   : > { %v1774_v43 = vld [vmem:[#allocation3 + $0xc0] sm:$0xff] }
 0x207   : > { %1711 = vst.msk [vmem:[#allocation3 + $0xc8] sm:$0xff] %vm406_vm0, %v1679_v42  ;;  %v1976_v44 = vadd.f32 %v4599_v15, %v1774_v43  ;;  %v2087_v15 = vpack.c.bf16 %v2031_v52, %v2030_v60 }
 0x208   : > { %v1050_v51 = vpop.f32.mrf.mxu1 }
 0x209   : > { %2008 = vst.msk [vmem:[#allocation3 + $0xc0] sm:$0xff] %vm406_vm0, %v1976_v44  ;;  %v1087_v53 = vadd.f32 %v1050_v51, %v885_v33  ;;  %v2331_v33 = vld [vmem:[#allocation2 + $0xf0] sm:$0xff]  ;;  %v2049_v51 = vld [vmem:[#allocation3 + $0x8] sm:$0xff] }
 0x20a   : > { %v1343_v54 = vpop.f32.mrf.mxu2  ;;  %v4635_v47 = vpop.f32.mrf.mxu0  ;;  %v1182_v1 = vld [vmem:[#allocation3 + $0xe0] sm:$0xff] }
 0x20b   : > { %v1383_v57 = vadd.f32 %v1343_v54, %v1181_v45  ;;  %1119 = vst.msk [vmem:[#allocation3 + $0xe8] sm:$0xff] %vm406_vm0, %v1087_v53  ;;  %v2332_v45 = vld [vmem:[#allocation2 + $0xf8] sm:$0xff] }
 0x20c   : > { %v1478_v59 = vld [vmem:[#allocation3 + $0xd0] sm:$0xff]  ;;  %v1641_v61 = vpop.f32.mrf.mxu3  ;;  %v2034_v53 = vld [vmem:[#allocation2 + $0xf2] sm:$0xff] }
 0x20d   : > { %v1680_v2 = vadd.f32 %v1639_v34, %v1478_v59  ;;  %1415 = vst.msk [vmem:[#allocation3 + $0xd8] sm:$0xff] %vm406_vm0, %v1383_v57  ;;  %3798 = vmatmul.msk.bf16.gmra.mxu0 %vm406_vm0, %v2087_v15  ;;  %v2035_v54 = vld [vmem:[#allocation2 + $0xfa] sm:$0xff]  ;;  %v2629_v57 = vld [vmem:[#allocation2 + $0xf1] sm:$0xff] }
 0x20e   : > { %v1775_v63 = vld [vmem:[#allocation3 + $0xc8] sm:$0xff] }
 0x20f   : > { %1712 = vst.msk [vmem:[#allocation3 + $0xd0] sm:$0xff] %vm406_vm0, %v1680_v2  ;;  %v1977_v50 = vadd.f32 %v4609_v0, %v1775_v63  ;;  %3742 = vmatmul.msk.bf16.gmra.mxu2 %vm406_vm0, %v2385_v58  ;;  %v2630_v58 = vld [vmem:[#allocation2 + $0xf9] sm:$0xff] }
 0x210   : > { %v1053_v3 = vpop.f32.mrf.mxu1 }
 0x211   : > { %2009 = vst.msk [vmem:[#allocation3 + $0xc8] sm:$0xff] %vm406_vm0, %v1977_v50  ;;  %3770 = vmatmul.msk.bf16.gmra.mxu3 %vm406_vm0, %v2683_v4  ;;  %v1088_v6 = vadd.f32 %v1053_v3, %v886_v5  ;;  %v2685_v50 = vpack.c.bf16 %v2630_v58, %v2629_v57 }
 0x212   : > { %v1346_v7 = vpop.f32.mrf.mxu2  ;;  %v4645_v23 = vpop.f32.mrf.mxu0  ;;  %v1183_v19 = vld [vmem:[#allocation3 + $0xe8] sm:$0xff] }
 0x213   : > { %v1384_v8 = vadd.f32 %v1346_v7, %v1182_v1  ;;  %1120 = vst.msk [vmem:[#allocation3 + $0xf0] sm:$0xff] %vm406_vm0, %v1088_v6  ;;  %3715 = vmatmul.msk.bf16.gmra.mxu1 %vm406_vm0, %v2087_v15  ;;  %v2050_v6 = vld [vmem:[#allocation3 + $0x10] sm:$0xff] }
 0x214   : > { %v1479_v62 = vld [vmem:[#allocation3 + $0xd8] sm:$0xff]  ;;  %v1644_v0 = vpop.f32.mrf.mxu3 }
 0x215   : > { %v1681_v10 = vadd.f32 %v1641_v61, %v1479_v62  ;;  %1416 = vst.msk [vmem:[#allocation3 + $0xe0] sm:$0xff] %vm406_vm0, %v1384_v8  ;;  %v2387_v61 = vpack.c.bf16 %v2332_v45, %v2331_v33 }
 0x216   : > { %v1776_v11 = vld [vmem:[#allocation3 + $0xd0] sm:$0xff] }
 0x217   : > { %1713 = vst.msk [vmem:[#allocation3 + $0xd8] sm:$0xff] %vm406_vm0, %v1681_v10  ;;  %v1978_v12 = vadd.f32 %v4617_v20, %v1776_v11  ;;  %v2088_v20 = vpack.c.bf16 %v2033_v22, %v2032_v21 }
 0x218   : > { %v1055_v9 = vpop.f32.mrf.mxu1 }
 0x219   : > { %2010 = vst.msk [vmem:[#allocation3 + $0xd0] sm:$0xff] %vm406_vm0, %v1978_v12  ;;  %v1089_v46 = vadd.f32 %v1055_v9, %v887_v18  ;;  %v2333_v18 = vld [vmem:[#allocation2 + $0x108] sm:$0xff] }
 0x21a   : > { %v1348_v24 = vpop.f32.mrf.mxu2  ;;  %v4653_v17 = vpop.f32.mrf.mxu0  ;;  %v1184_v37 = vld [vmem:[#allocation3 + $0xf0] sm:$0xff]  ;;  %v2051_v9 = vld [vmem:[#allocation3 + $0x18] sm:$0xff] }
 0x21b   : > { %v1385_v29 = vadd.f32 %v1348_v24, %v1183_v19  ;;  %1121 = vst.msk [vmem:[#allocation3 + $0xf8] sm:$0xff] %vm406_vm0, %v1089_v46  ;;  %v2334_v19 = vld [vmem:[#allocation2 + $0x110] sm:$0xff] }
 0x21c   : > { %v1480_v13 = vld [vmem:[#allocation3 + $0xe0] sm:$0xff]  ;;  %v1646_v28 = vpop.f32.mrf.mxu3 }
 0x21d   : > { %v1682_v31 = vadd.f32 %v1644_v0, %v1480_v13  ;;  %1417 = vst.msk [vmem:[#allocation3 + $0xe8] sm:$0xff] %vm406_vm0, %v1385_v29  ;;  %3799 = vmatmul.msk.bf16.gmra.mxu0 %vm406_vm0, %v2088_v20  ;;  %v2036_v46 = vld [vmem:[#allocation2 + $0x10a] sm:$0xff]  ;;  %v2037_v24 = vld [vmem:[#allocation2 + $0x112] sm:$0xff] }
 0x21e   : > { %v1777_v27 = vld [vmem:[#allocation3 + $0xd8] sm:$0xff] }
 0x21f   : > { %1714 = vst.msk [vmem:[#allocation3 + $0xe0] sm:$0xff] %vm406_vm0, %v1682_v31  ;;  %v1979_v36 = vadd.f32 %v4627_v32, %v1777_v27  ;;  %3743 = vmatmul.msk.bf16.gmra.mxu2 %vm406_vm0, %v2386_v30  ;;  %v2631_v29 = vld [vmem:[#allocation2 + $0x109] sm:$0xff]  ;;  %v2632_v30 = vld [vmem:[#allocation2 + $0x111] sm:$0xff] }
 0x220   : > { %v2170_v39 = vpop.f32.mrf.mxu1 }
 0x221   : > { %2011 = vst.msk [vmem:[#allocation3 + $0xd8] sm:$0xff] %vm406_vm0, %v1979_v36  ;;  %3771 = vmatmul.msk.bf16.gmra.mxu3 %vm406_vm0, %v2684_v35  ;;  %v2250_v40 = vadd.f32 %v2170_v39, %v2048_v38  ;;  %v2686_v36 = vpack.c.bf16 %v2632_v30, %v2631_v29  ;;  %v2040_v29 = vld [vmem:[#allocation2 + $0x13a] sm:$0xff]  ;;  %v2041_v30 = vld [vmem:[#allocation2 + $0x142] sm:$0xff] }
 0x222   : > { %v1351_v41 = vpop.f32.mrf.mxu2  ;;  %v4663_v34 = vpop.f32.mrf.mxu0  ;;  %v1185_v60 = vld [vmem:[#allocation3 + $0xf8] sm:$0xff] }
 0x223   : > { %v1386_v42 = vadd.f32 %v1351_v41, %v1184_v37  ;;  %2282 = vst.msk [vmem:[#allocation3] sm:$0xff] %vm406_vm0, %v2250_v40  ;;  %3716 = vmatmul.msk.bf16.gmra.mxu1 %vm406_vm0, %v2088_v20  ;;  %v2052_v40 = vld [vmem:[#allocation3 + $0x20] sm:$0xff] }
 0x224   : > { %v1481_v43 = vld [vmem:[#allocation3 + $0xe8] sm:$0xff]  ;;  %v1649_v32 = vpop.f32.mrf.mxu3 }
 0x225   : > { %v1683_v44 = vadd.f32 %v1646_v28, %v1481_v43  ;;  %1418 = vst.msk [vmem:[#allocation3 + $0xf0] sm:$0xff] %vm406_vm0, %v1386_v42  ;;  %v2388_v28 = vpack.c.bf16 %v2334_v19, %v2333_v18 }
 0x226   : > { %v1778_v48 = vld [vmem:[#allocation3 + $0xe0] sm:$0xff] }
 0x227   : > { %1715 = vst.msk [vmem:[#allocation3 + $0xe8] sm:$0xff] %vm406_vm0, %v1683_v44  ;;  %v1980_v49 = vadd.f32 %v4635_v47, %v1778_v48  ;;  %v2089_v47 = vpack.c.bf16 %v2035_v54, %v2034_v53 }
 0x228   : > { %v2172_v52 = vpop.f32.mrf.mxu1 }
 0x229   : > { %2012 = vst.msk [vmem:[#allocation3 + $0xe0] sm:$0xff] %vm406_vm0, %v1980_v49  ;;  %v2251_v55 = vadd.f32 %v2172_v52, %v2049_v51  ;;  %v2335_v51 = vld [vmem:[#allocation2 + $0x120] sm:$0xff]  ;;  %v2053_v52 = vld [vmem:[#allocation3 + $0x28] sm:$0xff] }
 0x22a   : > { %v1353_v56 = vpop.f32.mrf.mxu2  ;;  %v4671_v15 = vpop.f32.mrf.mxu0  ;;  %v2347_v3 = vld [vmem:[#allocation3] sm:$0xff] }
 0x22b   : > { %v1387_v59 = vadd.f32 %v1353_v56, %v1185_v60  ;;  %2283 = vst.msk [vmem:[#allocation3 + $0x8] sm:$0xff] %vm406_vm0, %v2251_v55  ;;  %v2336_v60 = vld [vmem:[#allocation2 + $0x128] sm:$0xff] }
 0x22c   : > { %v1482_v2 = vld [vmem:[#allocation3 + $0xf0] sm:$0xff]  ;;  %v1651_v4 = vpop.f32.mrf.mxu3  ;;  %v2039_v56 = vld [vmem:[#allocation2 + $0x12a] sm:$0xff] }
 0x22d   : > { %v1684_v63 = vadd.f32 %v1649_v32, %v1482_v2  ;;  %1419 = vst.msk [vmem:[#allocation3 + $0xf8] sm:$0xff] %vm406_vm0, %v1387_v59  ;;  %3800 = vmatmul.msk.bf16.gmra.mxu0 %vm406_vm0, %v2089_v47  ;;  %v2038_v55 = vld [vmem:[#allocation2 + $0x122] sm:$0xff] }
 0x22e   : > { %v1779_v1 = vld [vmem:[#allocation3 + $0xe8] sm:$0xff]  ;;  %v2633_v59 = vld [vmem:[#allocation2 + $0x121] sm:$0xff] }
 0x22f   : > { %1716 = vst.msk [vmem:[#allocation3 + $0xf0] sm:$0xff] %vm406_vm0, %v1684_v63  ;;  %v1981_v5 = vadd.f32 %v4645_v23, %v1779_v1  ;;  %3744 = vmatmul.msk.bf16.gmra.mxu2 %vm406_vm0, %v2387_v61  ;;  %v2634_v61 = vld [vmem:[#allocation2 + $0x129] sm:$0xff] }
 0x230   : > { %v2175_v7 = vpop.f32.mrf.mxu1 }
 0x231   : > { %2013 = vst.msk [vmem:[#allocation3 + $0xe8] sm:$0xff] %vm406_vm0, %v1981_v5  ;;  %3772 = vmatmul.msk.bf16.gmra.mxu3 %vm406_vm0, %v2685_v50  ;;  %v2252_v8 = vadd.f32 %v2175_v7, %v2050_v6  ;;  %v2687_v5 = vpack.c.bf16 %v2634_v61, %v2633_v59 }
 0x232   : > { %v2469_v62 = vpop.f32.mrf.mxu2  ;;  %v4681_v0 = vpop.f32.mrf.mxu0  ;;  %v2348_v21 = vld [vmem:[#allocation3 + $0x8] sm:$0xff] }
 0x233   : > { %v2549_v10 = vadd.f32 %v2469_v62, %v2347_v3  ;;  %2284 = vst.msk [vmem:[#allocation3 + $0x10] sm:$0xff] %vm406_vm0, %v2252_v8  ;;  %3717 = vmatmul.msk.bf16.gmra.mxu1 %vm406_vm0, %v2089_v47  ;;  %v2054_v62 = vld [vmem:[#allocation3 + $0x30] sm:$0xff] }
 0x234   : > { %v1483_v11 = vld [vmem:[#allocation3 + $0xf8] sm:$0xff]  ;;  %v2767_v23 = vpop.f32.mrf.mxu3 }
 0x235   : > { %v1685_v12 = vadd.f32 %v1651_v4, %v1483_v11  ;;  %2581 = vst.msk [vmem:[#allocation3] sm:$0xff] %vm406_vm0, %v2549_v10  ;;  %v2389_v4 = vpack.c.bf16 %v2336_v60, %v2335_v51 }
 0x236   : > { %v1780_v16 = vld [vmem:[#allocation3 + $0xf0] sm:$0xff] }
 0x237   : > { %1717 = vst.msk [vmem:[#allocation3 + $0xf8] sm:$0xff] %vm406_vm0, %v1685_v12  ;;  %v1982_v14 = vadd.f32 %v4653_v17, %v1780_v16  ;;  %v2090_v17 = vpack.c.bf16 %v2037_v24, %v2036_v46  ;;  %v2055_v46 = vld [vmem:[#allocation3 + $0x38] sm:$0xff] }
 0x238   : > { %v2177_v22 = vpop.f32.mrf.mxu1 }
 0x239   : > { %2014 = vst.msk [vmem:[#allocation3 + $0xf0] sm:$0xff] %vm406_vm0, %v1982_v14  ;;  %v2253_v25 = vadd.f32 %v2177_v22, %v2051_v9  ;;  %v2338_v22 = vld [vmem:[#allocation2 + $0x140] sm:$0xff] }
 0x23a   : > { %v2471_v26 = vpop.f32.mrf.mxu2  ;;  %v4689_v20 = vpop.f32.mrf.mxu0  ;;  %v2349_v39 = vld [vmem:[#allocation3 + $0x10] sm:$0xff] }
 0x23b   : > { %v2550_v13 = vadd.f32 %v2471_v26, %v2348_v21  ;;  %2285 = vst.msk [vmem:[#allocation3 + $0x18] sm:$0xff] %vm406_vm0, %v2253_v25  ;;  %v2337_v21 = vld [vmem:[#allocation2 + $0x138] sm:$0xff] }
 0x23c   : > { %v2645_v31 = vld [vmem:[#allocation3] sm:$0xff]  ;;  %v2769_v35 = vpop.f32.mrf.mxu3 }
 0x23d   : > { %v2847_v27 = vadd.f32 %v2767_v23, %v2645_v31  ;;  %2582 = vst.msk [vmem:[#allocation3 + $0x8] sm:$0xff] %vm406_vm0, %v2550_v13  ;;  %3801 = vmatmul.msk.bf16.gmra.mxu0 %vm406_vm0, %v2090_v17 }
 0x23e   : > { %v1781_v37 = vld [vmem:[#allocation3 + $0xf8] sm:$0xff] }
 0x23f   : > { %2879 = vst.msk [vmem:[#allocation3] sm:$0xff] %vm406_vm0, %v2847_v27  ;;  %v1983_v38 = vadd.f32 %v4663_v34, %v1781_v37  ;;  %3745 = vmatmul.msk.bf16.gmra.mxu2 %vm406_vm0, %v2388_v28  ;;  %v2635_v27 = vld [vmem:[#allocation2 + $0x139] sm:$0xff] }
 0x240   : > { %v2180_v41 = vpop.f32.mrf.mxu1 }
 0x241   : > { %2015 = vst.msk [vmem:[#allocation3 + $0xf8] sm:$0xff] %vm406_vm0, %v1983_v38  ;;  %3773 = vmatmul.msk.bf16.gmra.mxu3 %vm406_vm0, %v2686_v36  ;;  %v2254_v42 = vadd.f32 %v2180_v41, %v2052_v40  ;;  %v2636_v36 = vld [vmem:[#allocation2 + $0x141] sm:$0xff]  ;;  %v2390_v40 = vpack.c.bf16 %v2338_v22, %v2337_v21  ;;  %v2092_v41 = vpack.c.bf16 %v2041_v30, %v2040_v29 }
 0x242   : > { %v2474_v43 = vpop.f32.mrf.mxu2  ;;  %v4699_v32 = vpop.f32.mrf.mxu0  ;;  %v2350_v53 = vld [vmem:[#allocation3 + $0x18] sm:$0xff] }
 0x243   : > { %v2551_v44 = vadd.f32 %v2474_v43, %v2349_v39  ;;  %2286 = vst.msk [vmem:[#allocation3 + $0x20] sm:$0xff] %vm406_vm0, %v2254_v42  ;;  %3718 = vmatmul.msk.bf16.gmra.mxu1 %vm406_vm0, %v2090_v17 }
 0x244   : > { %v2646_v48 = vld [vmem:[#allocation3 + $0x8] sm:$0xff]  ;;  %v2772_v34 = vpop.f32.mrf.mxu3 }
 0x245   : > { %v2848_v49 = vadd.f32 %v2769_v35, %v2646_v48  ;;  %2583 = vst.msk [vmem:[#allocation3 + $0x10] sm:$0xff] %vm406_vm0, %v2551_v44 }
 0x246   : > { %v2943_v33 = vld [vmem:[#allocation3] sm:$0xff] }
 0x247   : > { %2880 = vst.msk [vmem:[#allocation3 + $0x8] sm:$0xff] %vm406_vm0, %v2848_v49  ;;  %v3145_v45 = vadd.f32 %v4671_v15, %v2943_v33  ;;  %v2091_v15 = vpack.c.bf16 %v2039_v56, %v2038_v55  ;;  %v2688_v33 = vpack.c.bf16 %v2636_v36, %v2635_v27  ;;  %v2058_v27 = vld [vmem:[#allocation3 + $0x50] sm:$0xff] }
 0x248   : > { %v2182_v54 = vpop.f32.mrf.mxu1 }
 0x249   : > { %3177 = vst.msk [vmem:[#allocation3] sm:$0xff] %vm406_vm0, %v3145_v45  ;;  %v2255_v57 = vadd.f32 %v2182_v54, %v2053_v52 }
 0x24a   : > { %v2476_v58 = vpop.f32.mrf.mxu2  ;;  %v4707_v47 = vpop.f32.mrf.mxu0  ;;  %v2351_v8 = vld [vmem:[#allocation3 + $0x20] sm:$0xff] }
 0x24b   : > { %v2552_v2 = vadd.f32 %v2476_v58, %v2350_v53  ;;  %2287 = vst.msk [vmem:[#allocation3 + $0x28] sm:$0xff] %vm406_vm0, %v2255_v57  ;;  %v2056_v53 = vld [vmem:[#allocation3 + $0x40] sm:$0xff] }
 0x24c   : > { %v2647_v63 = vld [vmem:[#allocation3 + $0x10] sm:$0xff]  ;;  %v2774_v50 = vpop.f32.mrf.mxu3 }
 0x24d   : > { %v2849_v1 = vadd.f32 %v2772_v34, %v2647_v63  ;;  %2584 = vst.msk [vmem:[#allocation3 + $0x18] sm:$0xff] %vm406_vm0, %v2552_v2  ;;  %3802 = vmatmul.msk.bf16.gmra.mxu0 %vm406_vm0, %v2091_v15 }
 0x24e   : > { %v2944_v3 = vld [vmem:[#allocation3 + $0x8] sm:$0xff] }
 0x24f   : > { %2881 = vst.msk [vmem:[#allocation3 + $0x10] sm:$0xff] %vm406_vm0, %v2849_v1  ;;  %v3146_v6 = vadd.f32 %v4681_v0, %v2944_v3  ;;  %3746 = vmatmul.msk.bf16.gmra.mxu2 %vm406_vm0, %v2389_v4  ;;  %v2339_v3 = vld [vmem:[#allocation2 + $0x150] sm:$0xff] }
 0x250   : > { %v3209_v7 = vld [vmem:[#allocation3] sm:$0xff]  ;;  %v2185_v10 = vpop.f32.mrf.mxu1 }
 0x251   : > { %3241 = vst.msk [vmem:[%s4717_s7] sm:$0xff] %vm406_vm0, %v3209_v7  ;;  %3774 = vmatmul.msk.bf16.gmra.mxu3 %vm406_vm0, %v2687_v5  ;;  %v2256_v11 = vadd.f32 %v2185_v10, %v2054_v62  ;;  %v3344_v24 = vmul.f32 %v3209_v7, %v3209_v7  ;;  %v3273_v17 = vsel %vm406_vm0, %v3209_v7, 0.0  ;;  %v2057_v7 = vld [vmem:[#allocation3 + $0x48] sm:$0xff] }
 0x252   : > { %3178 = vst.msk [vmem:[#allocation3 + $0x8] sm:$0xff] %vm406_vm0, %v3146_v6  ;;  %v2479_v23 = vpop.f32.mrf.mxu2  ;;  %v4726_v12 = vpop.f32.mrf.mxu0  ;;  %v2352_v25 = vld [vmem:[#allocation3 + $0x28] sm:$0xff] }
 0x253   : > { %v2553_v16 = vadd.f32 %v2479_v23, %v2351_v8  ;;  %2288 = vst.msk [vmem:[#allocation3 + $0x30] sm:$0xff] %vm406_vm0, %v2256_v11  ;;  %3719 = vmatmul.msk.bf16.gmra.mxu1 %vm406_vm0, %v2091_v15  ;;  %v3376_v42 = vsel %vm406_vm0, %v3344_v24, 0.0  ;;  %v2340_v6 = vld [vmem:[#allocation2 + $0x158] sm:$0xff] }
 0x254   : > { %v2648_v0 = vld [vmem:[#allocation3 + $0x18] sm:$0xff]  ;;  %v2777_v14 = vpop.f32.mrf.mxu3  ;;  %v2042_v10 = vld [vmem:[#allocation2 + $0x152] sm:$0xff]  ;;  %v2043_v11 = vld [vmem:[#allocation2 + $0x15a] sm:$0xff] }
 0x255   : > { %v2850_v18 = vadd.f32 %v2774_v50, %v2648_v0  ;;  %2585 = vst.msk [vmem:[#allocation3 + $0x20] sm:$0xff] %vm406_vm0, %v2553_v16  ;;  %v2093_v24 = vpack.c.bf16 %v2043_v11, %v2042_v10 }
 0x256   : > { %v2945_v19 = vld [vmem:[#allocation3 + $0x10] sm:$0xff] }
 0x257   : > { %2882 = vst.msk [vmem:[#allocation3 + $0x18] sm:$0xff] %vm406_vm0, %v2850_v18  ;;  %v3147_v9 = vadd.f32 %v4689_v20, %v2945_v19  ;;  %v2637_v19 = vld [vmem:[#allocation2 + $0x151] sm:$0xff] }
 0x258   : > { %v2187_v26 = vpop.f32.mrf.mxu1 }
 0x259   : > { %v3210_v13 = vld [vmem:[#allocation3 + $0x8] sm:$0xff]  ;;  %3179 = vst.msk [vmem:[#allocation3 + $0x10] sm:$0xff] %vm406_vm0, %v3147_v9  ;;  %v2257_v28 = vadd.f32 %v2187_v26, %v2055_v46  ;;  %v2391_v46 = vpack.c.bf16 %v2340_v6, %v2339_v3 }
 0x25a   : > { %3242 = vst.msk [vmem:[%s4717_s7 + $0x8] sm:$0xff] %vm406_vm0, %v3210_v13  ;;  %v3274_v31 = vsel %vm406_vm0, %v3210_v13, 0.0  ;;  %v3345_v35 = vmul.f32 %v3210_v13, %v3210_v13  ;;  %v2481_v20 = vpop.f32.mrf.mxu2  ;;  %v4738_v37 = vpop.f32.mrf.mxu0  ;;  %v2353_v52 = vld [vmem:[#allocation3 + $0x30] sm:$0xff] }
 0x25b   : > { %v3275_v38 = vadd.f32 %v3274_v31, %v3273_v17  ;;  %v2554_v39 = vadd.f32 %v2481_v20, %v2352_v25  ;;  %2289 = vst.msk [vmem:[#allocation3 + $0x38] sm:$0xff] %vm406_vm0, %v2257_v28  ;;  %v2638_v9 = vld [vmem:[#allocation2 + $0x159] sm:$0xff] }
 0x25c   : > { %v3377_v43 = vsel %vm406_vm0, %v3345_v35, 0.0  ;;  %v2649_v44 = vld [vmem:[#allocation3 + $0x20] sm:$0xff]  ;;  %v2779_v48 = vpop.f32.mrf.mxu3  ;;  %v2689_v28 = vpack.c.bf16 %v2638_v9, %v2637_v19 }
 0x25d   : > { %v3378_v34 = vadd.f32 %v3377_v43, %v3376_v42  ;;  %v2851_v49 = vadd.f32 %v2777_v14, %v2649_v44  ;;  %2586 = vst.msk [vmem:[#allocation3 + $0x28] sm:$0xff] %vm406_vm0, %v2554_v39  ;;  %3803 = vmatmul.msk.bf16.gmra.mxu0 %vm406_vm0, %v2092_v41 }
 0x25e   : > { %v2946_v45 = vld [vmem:[#allocation3 + $0x18] sm:$0xff] }
 0x25f   : > { %2883 = vst.msk [vmem:[#allocation3 + $0x20] sm:$0xff] %vm406_vm0, %v2851_v49  ;;  %v3148_v51 = vadd.f32 %v4699_v32, %v2946_v45  ;;  %3747 = vmatmul.msk.bf16.gmra.mxu2 %vm406_vm0, %v2390_v40 }
 0x260   : > { %v3211_v60 = vld [vmem:[#allocation3 + $0x10] sm:$0xff]  ;;  %v2190_v54 = vpop.f32.mrf.mxu1 }
 0x261   : > { %3243 = vst.msk [vmem:[%s4717_s7 + $0x10] sm:$0xff] %vm406_vm0, %v3211_v60  ;;  %v3276_v55 = vsel %vm406_vm0, %v3211_v60, 0.0  ;;  %v3346_v56 = vmul.f32 %v3211_v60, %v3211_v60  ;;  %3775 = vmatmul.msk.bf16.gmra.mxu3 %vm406_vm0, %v2688_v33  ;;  %v2258_v57 = vadd.f32 %v2190_v54, %v2056_v53  ;;  %v2341_v60 = vld [vmem:[#allocation2 + $0x168] sm:$0xff] }
 0x262   : > { %v3277_v58 = vadd.f32 %v3276_v55, %v3275_v38  ;;  %3180 = vst.msk [vmem:[#allocation3 + $0x18] sm:$0xff] %vm406_vm0, %v3148_v51  ;;  %v2484_v59 = vpop.f32.mrf.mxu2  ;;  %v4753_v61 = vpop.f32.mrf.mxu0  ;;  %v2354_v8 = vld [vmem:[#allocation3 + $0x38] sm:$0xff] }
 0x263   : > { %v3379_v32 = vsel %vm406_vm0, %v3346_v56, 0.0  ;;  %v2555_v2 = vadd.f32 %v2484_v59, %v2353_v52  ;;  %2290 = vst.msk [vmem:[#allocation3 + $0x40] sm:$0xff] %vm406_vm0, %v2258_v57  ;;  %3720 = vmatmul.msk.bf16.gmra.mxu1 %vm406_vm0, %v2092_v41  ;;  %v2342_v52 = vld [vmem:[#allocation2 + $0x170] sm:$0xff]  ;;  %v2059_v53 = vld [vmem:[#allocation3 + $0x58] sm:$0xff] }
 0x264   : > { %v3380_v4 = vadd.f32 %v3379_v32, %v3378_v34  ;;  %v2650_v15 = vld [vmem:[#allocation3 + $0x28] sm:$0xff]  ;;  %v2782_v63 = vpop.f32.mrf.mxu3  ;;  %v2044_v56 = vld [vmem:[#allocation2 + $0x16a] sm:$0xff] }
 0x265   : > { %v2852_v50 = vadd.f32 %v2779_v48, %v2650_v15  ;;  %2587 = vst.msk [vmem:[#allocation3 + $0x30] sm:$0xff] %vm406_vm0, %v2555_v2  ;;  %v2045_v57 = vld [vmem:[#allocation2 + $0x172] sm:$0xff]  ;;  %v2639_v15 = vld [vmem:[#allocation2 + $0x169] sm:$0xff] }
 0x266   : > { %v2947_v1 = vld [vmem:[#allocation3 + $0x20] sm:$0xff]  ;;  %v2094_v3 = vpack.c.bf16 %v2045_v57, %v2044_v56 }
 0x267   : > { %2884 = vst.msk [vmem:[#allocation3 + $0x28] sm:$0xff] %vm406_vm0, %v2852_v50  ;;  %v3149_v5 = vadd.f32 %v4707_v47, %v2947_v1 }
 0x268   : > { %v2192_v62 = vpop.f32.mrf.mxu1 }
 0x269   : > { %v3212_v23 = vld [vmem:[#allocation3 + $0x18] sm:$0xff]  ;;  %3181 = vst.msk [vmem:[#allocation3 + $0x20] sm:$0xff] %vm406_vm0, %v3149_v5  ;;  %v2259_v16 = vadd.f32 %v2192_v62, %v2057_v7  ;;  %v2392_v5 = vpack.c.bf16 %v2342_v52, %v2341_v60 }
 0x26a   : > { %3244 = vst.msk [vmem:[%s4717_s7 + $0x18] sm:$0xff] %vm406_vm0, %v3212_v23  ;;  %v3278_v0 = vsel %vm406_vm0, %v3212_v23, 0.0  ;;  %v3347_v14 = vmul.f32 %v3212_v23, %v3212_v23  ;;  %v2486_v18 = vpop.f32.mrf.mxu2  ;;  %v4765_v47 = vpop.f32.mrf.mxu0  ;;  %v2355_v20 = vld [vmem:[#allocation3 + $0x40] sm:$0xff] }
 0x26b   : > { %v3279_v21 = vadd.f32 %v3278_v0, %v3277_v58  ;;  %v2556_v22 = vadd.f32 %v2486_v18, %v2354_v8  ;;  %2291 = vst.msk [vmem:[#allocation3 + $0x48] sm:$0xff] %vm406_vm0, %v2259_v16  ;;  %v2060_v18 = vld [vmem:[#allocation3 + $0x60] sm:$0xff] }
 0x26c   : > { %v3381_v25 = vsel %vm406_vm0, %v3347_v14, 0.0  ;;  %v2651_v26 = vld [vmem:[#allocation3 + $0x30] sm:$0xff]  ;;  %v2784_v29 = vpop.f32.mrf.mxu3 }
 0x26d   : > { %v3382_v30 = vadd.f32 %v3381_v25, %v3380_v4  ;;  %v2853_v13 = vadd.f32 %v2782_v63, %v2651_v26  ;;  %2588 = vst.msk [vmem:[#allocation3 + $0x38] sm:$0xff] %vm406_vm0, %v2556_v22  ;;  %3804 = vmatmul.msk.bf16.gmra.mxu0 %vm406_vm0, %v2093_v24  ;;  %v2640_v63 = vld [vmem:[#allocation2 + $0x171] sm:$0xff] }
 0x26e   : > { %v2948_v17 = vld [vmem:[#allocation3 + $0x28] sm:$0xff]  ;;  %v2690_v11 = vpack.c.bf16 %v2640_v63, %v2639_v15 }
 0x26f   : > { %2885 = vst.msk [vmem:[#allocation3 + $0x30] sm:$0xff] %vm406_vm0, %v2853_v13  ;;  %v3150_v31 = vadd.f32 %v4726_v12, %v2948_v17  ;;  %3748 = vmatmul.msk.bf16.gmra.mxu2 %vm406_vm0, %v2391_v46 }
 0x270   : > { %v3213_v35 = vld [vmem:[#allocation3 + $0x20] sm:$0xff]  ;;  %v2195_v36 = vpop.f32.mrf.mxu1 }
 0x271   : > { %3245 = vst.msk [vmem:[%s4717_s7 + $0x20] sm:$0xff] %vm406_vm0, %v3213_v35  ;;  %v3280_v38 = vsel %vm406_vm0, %v3213_v35, 0.0  ;;  %v3348_v39 = vmul.f32 %v3213_v35, %v3213_v35  ;;  %3776 = vmatmul.msk.bf16.gmra.mxu3 %vm406_vm0, %v2689_v28  ;;  %v2260_v40 = vadd.f32 %v2195_v36, %v2058_v27  ;;  %v2343_v35 = vld [vmem:[#allocation2 + $0x180] sm:$0xff]  ;;  %v2061_v27 = vld [vmem:[#allocation3 + $0x68] sm:$0xff] }
 0x272   : > { %v3281_v41 = vadd.f32 %v3280_v38, %v3279_v21  ;;  %3182 = vst.msk [vmem:[#allocation3 + $0x28] sm:$0xff] %vm406_vm0, %v3150_v31  ;;  %v2489_v42 = vpop.f32.mrf.mxu2  ;;  %v4779_v43 = vpop.f32.mrf.mxu0  ;;  %v2356_v54 = vld [vmem:[#allocation3 + $0x48] sm:$0xff] }
 0x273   : > { %v3383_v12 = vsel %vm406_vm0, %v3348_v39, 0.0  ;;  %v2557_v44 = vadd.f32 %v2489_v42, %v2355_v20  ;;  %2292 = vst.msk [vmem:[#allocation3 + $0x50] sm:$0xff] %vm406_vm0, %v2260_v40  ;;  %3721 = vmatmul.msk.bf16.gmra.mxu1 %vm406_vm0, %v2093_v24  ;;  %v2344_v20 = vld [vmem:[#allocation2 + $0x188] sm:$0xff] }
 0x274   : > { %v3384_v48 = vadd.f32 %v3383_v12, %v3382_v30  ;;  %v2652_v34 = vld [vmem:[#allocation3 + $0x38] sm:$0xff]  ;;  %v2787_v49 = vpop.f32.mrf.mxu3 }
 0x275   : > { %v2854_v33 = vadd.f32 %v2784_v29, %v2652_v34  ;;  %2589 = vst.msk [vmem:[#allocation3 + $0x40] sm:$0xff] %vm406_vm0, %v2557_v44  ;;  %v2046_v39 = vld [vmem:[#allocation2 + $0x182] sm:$0xff]  ;;  %v2047_v40 = vld [vmem:[#allocation2 + $0x18a] sm:$0xff] }
 0x276   : > { %v2949_v45 = vld [vmem:[#allocation3 + $0x30] sm:$0xff]  ;;  %v2095_v60 = vpack.c.bf16 %v2047_v40, %v2046_v39 }
 0x277   : > { %2886 = vst.msk [vmem:[#allocation3 + $0x38] sm:$0xff] %vm406_vm0, %v2854_v33  ;;  %v3151_v51 = vadd.f32 %v4738_v37, %v2949_v45  ;;  %v2641_v34 = vld [vmem:[#allocation2 + $0x181] sm:$0xff] }
 0x278   : > { %v2197_v55 = vpop.f32.mrf.mxu1 }
 0x279   : > { %v3214_v58 = vld [vmem:[#allocation3 + $0x28] sm:$0xff]  ;;  %3183 = vst.msk [vmem:[#allocation3 + $0x30] sm:$0xff] %vm406_vm0, %v3151_v51  ;;  %v2261_v59 = vadd.f32 %v2197_v55, %v2059_v53  ;;  %v2393_v51 = vpack.c.bf16 %v2344_v20, %v2343_v35 }
 0x27a   : > { %3246 = vst.msk [vmem:[%s4717_s7 + $0x28] sm:$0xff] %vm406_vm0, %v3214_v58  ;;  %v3282_v32 = vsel %vm406_vm0, %v3214_v58, 0.0  ;;  %v3349_v2 = vmul.f32 %v3214_v58, %v3214_v58  ;;  %v2491_v4 = vpop.f32.mrf.mxu2  ;;  %v4791_v37 = vpop.f32.mrf.mxu0  ;;  %v2357_v14 = vld [vmem:[#allocation3 + $0x50] sm:$0xff] }
 0x27b   : > { %v3283_v50 = vadd.f32 %v3282_v32, %v3281_v41  ;;  %v2558_v1 = vadd.f32 %v2491_v4, %v2356_v54  ;;  %2293 = vst.msk [vmem:[#allocation3 + $0x58] sm:$0xff] %vm406_vm0, %v2261_v59  ;;  %v2062_v4 = vld [vmem:[#allocation3 + $0x70] sm:$0xff] }
 0x27c   : > { %v3385_v6 = vsel %vm406_vm0, %v3349_v2, 0.0  ;;  %v2653_v7 = vld [vmem:[#allocation3 + $0x40] sm:$0xff]  ;;  %v2789_v8 = vpop.f32.mrf.mxu3 }
 0x27d   : > { %v3386_v62 = vadd.f32 %v3385_v6, %v3384_v48  ;;  %v2855_v10 = vadd.f32 %v2787_v49, %v2653_v7  ;;  %2590 = vst.msk [vmem:[#allocation3 + $0x48] sm:$0xff] %vm406_vm0, %v2558_v1  ;;  %3805 = vmatmul.msk.bf16.gmra.mxu0 %vm406_vm0, %v2094_v3  ;;  %v2642_v49 = vld [vmem:[#allocation2 + $0x189] sm:$0xff] }
 0x27e   : > { %v2950_v23 = vld [vmem:[#allocation3 + $0x38] sm:$0xff]  ;;  %v2691_v57 = vpack.c.bf16 %v2642_v49, %v2641_v34 }
 0x27f   : > { %2887 = vst.msk [vmem:[#allocation3 + $0x40] sm:$0xff] %vm406_vm0, %v2855_v10  ;;  %v3152_v16 = vadd.f32 %v4753_v61, %v2950_v23  ;;  %3749 = vmatmul.msk.bf16.gmra.mxu2 %vm406_vm0, %v2392_v5 }
 0x280   : > { %v3215_v0 = vld [vmem:[#allocation3 + $0x30] sm:$0xff]  ;;  %v2200_v19 = vpop.f32.mrf.mxu1 }
 0x281   : > { %3247 = vst.msk [vmem:[%s4717_s7 + $0x30] sm:$0xff] %vm406_vm0, %v3215_v0  ;;  %v3284_v9 = vsel %vm406_vm0, %v3215_v0, 0.0  ;;  %v3350_v21 = vmul.f32 %v3215_v0, %v3215_v0  ;;  %3777 = vmatmul.msk.bf16.gmra.mxu3 %vm406_vm0, %v2690_v11  ;;  %v2262_v22 = vadd.f32 %v2200_v19, %v2060_v18  ;;  %v2942_v0 = vld [vmem:[#allocation2 + $0x1a2] sm:$0xff] }
 0x282   : > { %v3285_v46 = vadd.f32 %v3284_v9, %v3283_v50  ;;  %3184 = vst.msk [vmem:[#allocation3 + $0x38] sm:$0xff] %vm406_vm0, %v3152_v16  ;;  %v2494_v24 = vpop.f32.mrf.mxu2  ;;  %v4805_v25 = vpop.f32.mrf.mxu0  ;;  %v2358_v36 = vld [vmem:[#allocation3 + $0x58] sm:$0xff]  ;;  %v2941_v16 = vld [vmem:[#allocation2 + $0x19a] sm:$0xff] }
 0x283   : > { %v3387_v61 = vsel %vm406_vm0, %v3350_v21, 0.0  ;;  %v2559_v26 = vadd.f32 %v2494_v24, %v2357_v14  ;;  %2294 = vst.msk [vmem:[#allocation3 + $0x60] sm:$0xff] %vm406_vm0, %v2262_v22  ;;  %3722 = vmatmul.msk.bf16.gmra.mxu1 %vm406_vm0, %v2094_v3  ;;  %v2063_v18 = vld [vmem:[#allocation3 + $0x78] sm:$0xff]  ;;  %v2345_v9 = vld [vmem:[#allocation2 + $0x198] sm:$0xff]  ;;  %v2346_v21 = vld [vmem:[#allocation2 + $0x1a0] sm:$0xff] }
 0x284   : > { %v3388_v29 = vadd.f32 %v3387_v61, %v3386_v62  ;;  %v2654_v30 = vld [vmem:[#allocation3 + $0x48] sm:$0xff]  ;;  %v2792_v13 = vpop.f32.mrf.mxu3  ;;  %v2990_v61 = vpack.c.bf16 %v2942_v0, %v2941_v16  ;;  %v2394_v35 = vpack.c.bf16 %v2346_v21, %v2345_v9 }
 0x285   : > { %v2856_v28 = vadd.f32 %v2789_v8, %v2654_v30  ;;  %2591 = vst.msk [vmem:[#allocation3 + $0x50] sm:$0xff] %vm406_vm0, %v2559_v26 }
 0x286   : > { %v2951_v17 = vld [vmem:[#allocation3 + $0x40] sm:$0xff] }
 0x287   : > { %2888 = vst.msk [vmem:[#allocation3 + $0x48] sm:$0xff] %vm406_vm0, %v2856_v28  ;;  %v3153_v31 = vadd.f32 %v4765_v47, %v2951_v17  ;;  %v2644_v28 = vld [vmem:[#allocation2 + $0x1a1] sm:$0xff] }
 0x288   : > { %v2202_v38 = vpop.f32.mrf.mxu1 }
 0x289   : > { %v3216_v41 = vld [vmem:[#allocation3 + $0x38] sm:$0xff]  ;;  %3185 = vst.msk [vmem:[#allocation3 + $0x40] sm:$0xff] %vm406_vm0, %v3153_v31  ;;  %v2263_v42 = vadd.f32 %v2202_v38, %v2061_v27 }
 0x28a   : > { %3248 = vst.msk [vmem:[%s4717_s7 + $0x38] sm:$0xff] %vm406_vm0, %v3216_v41  ;;  %v3286_v12 = vsel %vm406_vm0, %v3216_v41, 0.0  ;;  %v3351_v44 = vmul.f32 %v3216_v41, %v3216_v41  ;;  %v2496_v48 = vpop.f32.mrf.mxu2  ;;  %v4817_v47 = vpop.f32.mrf.mxu0  ;;  %v2359_v2 = vld [vmem:[#allocation3 + $0x60] sm:$0xff] }
 0x28b   : > { %v3287_v33 = vadd.f32 %v3286_v12, %v3285_v46  ;;  %v2560_v45 = vadd.f32 %v2496_v48, %v2358_v36  ;;  %2295 = vst.msk [vmem:[#allocation3 + $0x68] sm:$0xff] %vm406_vm0, %v2263_v42  ;;  %v2064_v48 = vld [vmem:[#allocation3 + $0x80] sm:$0xff] }
 0x28c   : > { %v3389_v52 = vsel %vm406_vm0, %v3351_v44, 0.0  ;;  %v2655_v53 = vld [vmem:[#allocation3 + $0x50] sm:$0xff]  ;;  %v2794_v54 = vpop.f32.mrf.mxu3 }
 0x28d   : > { %v3390_v55 = vadd.f32 %v3389_v52, %v3388_v29  ;;  %v2857_v56 = vadd.f32 %v2792_v13, %v2655_v53  ;;  %2592 = vst.msk [vmem:[#allocation3 + $0x58] sm:$0xff] %vm406_vm0, %v2560_v45  ;;  %3806 = vmatmul.msk.bf16.gmra.mxu0 %vm406_vm0, %v2095_v60  ;;  %v2643_v13 = vld [vmem:[#allocation2 + $0x199] sm:$0xff] }
 0x28e   : > { %v2952_v58 = vld [vmem:[#allocation3 + $0x48] sm:$0xff]  ;;  %v2692_v40 = vpack.c.bf16 %v2644_v28, %v2643_v13 }
 0x28f   : > { %2889 = vst.msk [vmem:[#allocation3 + $0x50] sm:$0xff] %vm406_vm0, %v2857_v56  ;;  %v3154_v59 = vadd.f32 %v4779_v43, %v2952_v58  ;;  %3750 = vmatmul.msk.bf16.gmra.mxu2 %vm406_vm0, %v2393_v51 }
 0x290   : > { %v3217_v32 = vld [vmem:[#allocation3 + $0x40] sm:$0xff]  ;;  %v2205_v15 = vpop.f32.mrf.mxu1 }
 0x291   : > { %3249 = vst.msk [vmem:[%s4717_s7 + $0x40] sm:$0xff] %vm406_vm0, %v3217_v32  ;;  %v3288_v63 = vsel %vm406_vm0, %v3217_v32, 0.0  ;;  %v3352_v50 = vmul.f32 %v3217_v32, %v3217_v32  ;;  %3778 = vmatmul.msk.bf16.gmra.mxu3 %vm406_vm0, %v2691_v57  ;;  %v2264_v1 = vadd.f32 %v2205_v15, %v2062_v4 }
 0x292   : > { %v3289_v5 = vadd.f32 %v3288_v63, %v3287_v33  ;;  %3186 = vst.msk [vmem:[#allocation3 + $0x48] sm:$0xff] %vm406_vm0, %v3154_v59  ;;  %v2499_v3 = vpop.f32.mrf.mxu2  ;;  %v4831_v6 = vpop.f32.mrf.mxu0  ;;  %v2360_v19 = vld [vmem:[#allocation3 + $0x68] sm:$0xff] }
 0x293   : > { %v3391_v43 = vsel %vm406_vm0, %v3352_v50, 0.0  ;;  %v2561_v7 = vadd.f32 %v2499_v3, %v2359_v2  ;;  %2296 = vst.msk [vmem:[#allocation3 + $0x70] sm:$0xff] %vm406_vm0, %v2264_v1  ;;  %3723 = vmatmul.msk.bf16.gmra.mxu1 %vm406_vm0, %v2095_v60  ;;  %v2065_v2 = vld [vmem:[#allocation3 + $0x88] sm:$0xff] }
 0x294   : > { %v3392_v8 = vadd.f32 %v3391_v43, %v3390_v55  ;;  %v2656_v62 = vld [vmem:[#allocation3 + $0x58] sm:$0xff]  ;;  %v2797_v10 = vpop.f32.mrf.mxu3 }
 0x295   : > { %v2858_v11 = vadd.f32 %v2794_v54, %v2656_v62  ;;  %2593 = vst.msk [vmem:[#allocation3 + $0x60] sm:$0xff] %vm406_vm0, %v2561_v7 }
 0x296   : > { %v2953_v23 = vld [vmem:[#allocation3 + $0x50] sm:$0xff] }
 0x297   : > { %2890 = vst.msk [vmem:[#allocation3 + $0x58] sm:$0xff] %vm406_vm0, %v2858_v11  ;;  %v3155_v14 = vadd.f32 %v4791_v37, %v2953_v23 }
 0x298   : > { %v2207_v22 = vpop.f32.mrf.mxu1 }
 0x299   : > { %v3218_v46 = vld [vmem:[#allocation3 + $0x48] sm:$0xff]  ;;  %3187 = vst.msk [vmem:[#allocation3 + $0x50] sm:$0xff] %vm406_vm0, %v3155_v14  ;;  %v2265_v24 = vadd.f32 %v2207_v22, %v2063_v18  ;;  %v2066_v18 = vld [vmem:[#allocation3 + $0x90] sm:$0xff] }
 0x29a   : > { %3250 = vst.msk [vmem:[%s4717_s7 + $0x48] sm:$0xff] %vm406_vm0, %v3218_v46  ;;  %v3290_v26 = vsel %vm406_vm0, %v3218_v46, 0.0  ;;  %v3353_v29 = vmul.f32 %v3218_v46, %v3218_v46  ;;  %v2501_v30 = vpop.f32.mrf.mxu2  ;;  %v4843_v17 = vpop.f32.mrf.mxu0  ;;  %v2361_v44 = vld [vmem:[#allocation3 + $0x70] sm:$0xff] }
 0x29b   : > { %v3291_v37 = vadd.f32 %v3290_v26, %v3289_v5  ;;  %v2562_v31 = vadd.f32 %v2501_v30, %v2360_v19  ;;  %2297 = vst.msk [vmem:[#allocation3 + $0x78] sm:$0xff] %vm406_vm0, %v2265_v24 }
 0x29c   : > { %v3393_v20 = vsel %vm406_vm0, %v3353_v29, 0.0  ;;  %v2657_v27 = vld [vmem:[#allocation3 + $0x60] sm:$0xff]  ;;  %v2799_v36 = vpop.f32.mrf.mxu3 }
 0x29d   : > { %v3394_v38 = vadd.f32 %v3393_v20, %v3392_v8  ;;  %v2859_v39 = vadd.f32 %v2797_v10, %v2657_v27  ;;  %2594 = vst.msk [vmem:[#allocation3 + $0x68] sm:$0xff] %vm406_vm0, %v2562_v31  ;;  %3807 = vmatmul.msk.bf16.gmra.mxu0 %vm406_vm0, %v2990_v61  ;;  %v2067_v20 = vld [vmem:[#allocation3 + $0x98] sm:$0xff] }
 0x29e   : > { %v2954_v41 = vld [vmem:[#allocation3 + $0x58] sm:$0xff] }
 0x29f   : > { %2891 = vst.msk [vmem:[#allocation3 + $0x60] sm:$0xff] %vm406_vm0, %v2859_v39  ;;  %v3156_v42 = vadd.f32 %v4805_v25, %v2954_v41  ;;  %3751 = vmatmul.msk.bf16.gmra.mxu2 %vm406_vm0, %v2394_v35 }
 0x2a0   : > { %v3219_v12 = vld [vmem:[#allocation3 + $0x50] sm:$0xff]  ;;  %v2210_v34 = vpop.f32.mrf.mxu1 }
 0x2a1   : > { %3251 = vst.msk [vmem:[%s4717_s7 + $0x50] sm:$0xff] %vm406_vm0, %v3219_v12  ;;  %v3292_v49 = vsel %vm406_vm0, %v3219_v12, 0.0  ;;  %v3354_v33 = vmul.f32 %v3219_v12, %v3219_v12  ;;  %3779 = vmatmul.msk.bf16.gmra.mxu3 %vm406_vm0, %v2692_v40  ;;  %v2266_v45 = vadd.f32 %v2210_v34, %v2064_v48 }
 0x2a2   : > { %v3293_v51 = vadd.f32 %v3292_v49, %v3291_v37  ;;  %3188 = vst.msk [vmem:[#allocation3 + $0x58] sm:$0xff] %vm406_vm0, %v3156_v42  ;;  %v2504_v60 = vpop.f32.mrf.mxu2  ;;  %v4857_v52 = vpop.f32.mrf.mxu0  ;;  %v2362_v32 = vld [vmem:[#allocation3 + $0x78] sm:$0xff] }
 0x2a3   : > { %v3395_v25 = vsel %vm406_vm0, %v3354_v33, 0.0  ;;  %v2563_v53 = vadd.f32 %v2504_v60, %v2361_v44  ;;  %2298 = vst.msk [vmem:[#allocation3 + $0x80] sm:$0xff] %vm406_vm0, %v2266_v45 }
 0x2a4   : > { %v3396_v54 = vadd.f32 %v3395_v25, %v3394_v38  ;;  %v2658_v55 = vld [vmem:[#allocation3 + $0x68] sm:$0xff]  ;;  %v2802_v56 = vpop.f32.mrf.mxu3 }
 0x2a5   : > { %v2860_v57 = vadd.f32 %v2799_v36, %v2658_v55  ;;  %2595 = vst.msk [vmem:[#allocation3 + $0x70] sm:$0xff] %vm406_vm0, %v2563_v53  ;;  %v2068_v53 = vld [vmem:[#allocation3 + $0xa0] sm:$0xff] }
 0x2a6   : > { %v2955_v58 = vld [vmem:[#allocation3 + $0x60] sm:$0xff] }
 0x2a7   : > { %2892 = vst.msk [vmem:[#allocation3 + $0x68] sm:$0xff] %vm406_vm0, %v2860_v57  ;;  %v3157_v59 = vadd.f32 %v4817_v47, %v2955_v58 }
 0x2a8   : > { %v2212_v4 = vpop.f32.mrf.mxu1 }
 0x2a9   : > { %v3220_v15 = vld [vmem:[#allocation3 + $0x58] sm:$0xff]  ;;  %3189 = vst.msk [vmem:[#allocation3 + $0x60] sm:$0xff] %vm406_vm0, %v3157_v59  ;;  %v2267_v63 = vadd.f32 %v2212_v4, %v2065_v2 }
 0x2aa   : > { %3252 = vst.msk [vmem:[%s4717_s7 + $0x58] sm:$0xff] %vm406_vm0, %v3220_v15  ;;  %v3294_v50 = vsel %vm406_vm0, %v3220_v15, 0.0  ;;  %v3355_v1 = vmul.f32 %v3220_v15, %v3220_v15  ;;  %v2506_v5 = vpop.f32.mrf.mxu2  ;;  %v4868_v3 = vpop.f32.mrf.mxu0  ;;  %v2363_v14 = vld [vmem:[#allocation3 + $0x80] sm:$0xff] }
 0x2ab   : > { %v3295_v43 = vadd.f32 %v3294_v50, %v3293_v51  ;;  %v2564_v7 = vadd.f32 %v2506_v5, %v2362_v32  ;;  %2299 = vst.msk [vmem:[#allocation3 + $0x88] sm:$0xff] %vm406_vm0, %v2267_v63 }
 0x2ac   : > { %v3397_v47 = vsel %vm406_vm0, %v3355_v1, 0.0  ;;  %v2659_v8 = vld [vmem:[#allocation3 + $0x70] sm:$0xff]  ;;  %v2804_v62 = vpop.f32.mrf.mxu3 }
 0x2ad   : > { %v3398_v10 = vadd.f32 %v3397_v47, %v3396_v54  ;;  %v2861_v11 = vadd.f32 %v2802_v56, %v2659_v8  ;;  %2596 = vst.msk [vmem:[#allocation3 + $0x78] sm:$0xff] %vm406_vm0, %v2564_v7  ;;  %v2069_v7 = vld [vmem:[#allocation3 + $0xa8] sm:$0xff] }
 0x2ae   : > { %v2956_v23 = vld [vmem:[#allocation3 + $0x68] sm:$0xff] }
 0x2af   : > { %2893 = vst.msk [vmem:[#allocation3 + $0x70] sm:$0xff] %vm406_vm0, %v2861_v11  ;;  %v3158_v16 = vadd.f32 %v4831_v6, %v2956_v23 }
 0x2b0   : > { %v3221_v0 = vld [vmem:[#allocation3 + $0x60] sm:$0xff]  ;;  %v2215_v19 = vpop.f32.mrf.mxu1 }
 0x2b1   : > { %3253 = vst.msk [vmem:[%s4717_s7 + $0x60] sm:$0xff] %vm406_vm0, %v3221_v0  ;;  %v3296_v9 = vsel %vm406_vm0, %v3221_v0, 0.0  ;;  %v3356_v21 = vmul.f32 %v3221_v0, %v3221_v0  ;;  %v2268_v22 = vadd.f32 %v2215_v19, %v2066_v18 }
 0x2b2   : > { %v3297_v46 = vadd.f32 %v3296_v9, %v3295_v43  ;;  %3190 = vst.msk [vmem:[#allocation3 + $0x68] sm:$0xff] %vm406_vm0, %v3158_v16  ;;  %v2509_v24 = vpop.f32.mrf.mxu2  ;;  %v4879_v61 = vpop.f32.mrf.mxu0  ;;  %v2364_v35 = vld [vmem:[#allocation3 + $0x88] sm:$0xff] }
 0x2b3   : > { %v3399_v26 = vsel %vm406_vm0, %v3356_v21, 0.0  ;;  %v2565_v29 = vadd.f32 %v2509_v24, %v2363_v14  ;;  %2300 = vst.msk [vmem:[#allocation3 + $0x90] sm:$0xff] %vm406_vm0, %v2268_v22 }
 0x2b4   : > { %v3400_v6 = vadd.f32 %v3399_v26, %v3398_v10  ;;  %v2660_v30 = vld [vmem:[#allocation3 + $0x78] sm:$0xff]  ;;  %v2807_v13 = vpop.f32.mrf.mxu3 }
 0x2b5   : > { %v2862_v28 = vadd.f32 %v2804_v62, %v2660_v30  ;;  %2597 = vst.msk [vmem:[#allocation3 + $0x80] sm:$0xff] %vm406_vm0, %v2565_v29  ;;  %v2070_v29 = vld [vmem:[#allocation3 + $0xb0] sm:$0xff] }
 0x2b6   : > { %v2957_v37 = vld [vmem:[#allocation3 + $0x70] sm:$0xff] }
 0x2b7   : > { %2894 = vst.msk [vmem:[#allocation3 + $0x78] sm:$0xff] %vm406_vm0, %v2862_v28  ;;  %v3159_v31 = vadd.f32 %v4843_v17, %v2957_v37 }
 0x2b8   : > { %v2217_v27 = vpop.f32.mrf.mxu1 }
 0x2b9   : > { %v3222_v36 = vld [vmem:[#allocation3 + $0x68] sm:$0xff]  ;;  %3191 = vst.msk [vmem:[#allocation3 + $0x70] sm:$0xff] %vm406_vm0, %v3159_v31  ;;  %v2269_v38 = vadd.f32 %v2217_v27, %v2067_v20 }
 0x2ba   : > { %3254 = vst.msk [vmem:[%s4717_s7 + $0x68] sm:$0xff] %vm406_vm0, %v3222_v36  ;;  %v3298_v39 = vsel %vm406_vm0, %v3222_v36, 0.0  ;;  %v3357_v40 = vmul.f32 %v3222_v36, %v3222_v36  ;;  %v2511_v41 = vpop.f32.mrf.mxu2  ;;  %v4891_v44 = vpop.f32.mrf.mxu0  ;;  %v2365_v25 = vld [vmem:[#allocation3 + $0x90] sm:$0xff] }
 0x2bb   : > { %v3299_v42 = vadd.f32 %v3298_v39, %v3297_v46  ;;  %v2566_v12 = vadd.f32 %v2511_v41, %v2364_v35  ;;  %2301 = vst.msk [vmem:[#allocation3 + $0x98] sm:$0xff] %vm406_vm0, %v2269_v38 }
 0x2bc   : > { %v3401_v17 = vsel %vm406_vm0, %v3357_v40, 0.0  ;;  %v2661_v48 = vld [vmem:[#allocation3 + $0x80] sm:$0xff]  ;;  %v2809_v34 = vpop.f32.mrf.mxu3 }
 0x2bd   : > { %v3402_v49 = vadd.f32 %v3401_v17, %v3400_v6  ;;  %v2863_v33 = vadd.f32 %v2807_v13, %v2661_v48  ;;  %2598 = vst.msk [vmem:[#allocation3 + $0x88] sm:$0xff] %vm406_vm0, %v2566_v12 }
 0x2be   : > { %v2958_v45 = vld [vmem:[#allocation3 + $0x78] sm:$0xff] }
 0x2bf   : > { %2895 = vst.msk [vmem:[#allocation3 + $0x80] sm:$0xff] %vm406_vm0, %v2863_v33  ;;  %v3160_v51 = vadd.f32 %v4857_v52, %v2958_v45 }
 0x2c0   : > { %v3223_v60 = vld [vmem:[#allocation3 + $0x70] sm:$0xff]  ;;  %v2220_v54 = vpop.f32.mrf.mxu1 }
 0x2c1   : > { %3255 = vst.msk [vmem:[%s4717_s7 + $0x70] sm:$0xff] %vm406_vm0, %v3223_v60  ;;  %v3300_v55 = vsel %vm406_vm0, %v3223_v60, 0.0  ;;  %v3358_v56 = vmul.f32 %v3223_v60, %v3223_v60  ;;  %v2270_v57 = vadd.f32 %v2220_v54, %v2068_v53 }
 0x2c2   : > { %v3301_v58 = vadd.f32 %v3300_v55, %v3299_v42  ;;  %3192 = vst.msk [vmem:[#allocation3 + $0x78] sm:$0xff] %vm406_vm0, %v3160_v51  ;;  %v2514_v59 = vpop.f32.mrf.mxu2  ;;  %v4904_v50 = vpop.f32.mrf.mxu0  ;;  %v2366_v43 = vld [vmem:[#allocation3 + $0x98] sm:$0xff] }
 0x2c3   : > { %v3403_v32 = vsel %vm406_vm0, %v3358_v56, 0.0  ;;  %v2567_v2 = vadd.f32 %v2514_v59, %v2365_v25  ;;  %2302 = vst.msk [vmem:[#allocation3 + $0xa0] sm:$0xff] %vm406_vm0, %v2270_v57  ;;  %v2071_v42 = vld [vmem:[#allocation3 + $0xb8] sm:$0xff] }
 0x2c4   : > { %v3404_v52 = vadd.f32 %v3403_v32, %v3402_v49  ;;  %v2662_v4 = vld [vmem:[#allocation3 + $0x88] sm:$0xff]  ;;  %v2812_v15 = vpop.f32.mrf.mxu3  ;;  %v2072_v32 = vld [vmem:[#allocation3 + $0xc0] sm:$0xff] }
 0x2c5   : > { %v2864_v63 = vadd.f32 %v2809_v34, %v2662_v4  ;;  %2599 = vst.msk [vmem:[#allocation3 + $0x90] sm:$0xff] %vm406_vm0, %v2567_v2 }
 0x2c6   : > { %v2959_v1 = vld [vmem:[#allocation3 + $0x80] sm:$0xff] }
 0x2c7   : > { %2896 = vst.msk [vmem:[#allocation3 + $0x88] sm:$0xff] %vm406_vm0, %v2864_v63  ;;  %v3161_v5 = vadd.f32 %v4868_v3, %v2959_v1 }
 0x2c8   : > { %v2222_v47 = vpop.f32.mrf.mxu1 }
 0x2c9   : > { %v3224_v8 = vld [vmem:[#allocation3 + $0x78] sm:$0xff]  ;;  %3193 = vst.msk [vmem:[#allocation3 + $0x80] sm:$0xff] %vm406_vm0, %v3161_v5  ;;  %v2271_v62 = vadd.f32 %v2222_v47, %v2069_v7 }
 0x2ca   : > { %3256 = vst.msk [vmem:[%s4717_s7 + $0x78] sm:$0xff] %vm406_vm0, %v3224_v8  ;;  %v3302_v10 = vsel %vm406_vm0, %v3224_v8, 0.0  ;;  %v3359_v11 = vmul.f32 %v3224_v8, %v3224_v8  ;;  %v2516_v23 = vpop.f32.mrf.mxu2  ;;  %v4917_v46 = vpop.f32.mrf.mxu0  ;;  %v2367_v26 = vld [vmem:[#allocation3 + $0xa0] sm:$0xff] }
 0x2cb   : > { %v3303_v16 = vadd.f32 %v3302_v10, %v3301_v58  ;;  %v2568_v0 = vadd.f32 %v2516_v23, %v2366_v43  ;;  %2303 = vst.msk [vmem:[#allocation3 + $0xa8] sm:$0xff] %vm406_vm0, %v2271_v62 }
 0x2cc   : > { %v3405_v3 = vsel %vm406_vm0, %v3359_v11, 0.0  ;;  %v2663_v14 = vld [vmem:[#allocation3 + $0x90] sm:$0xff]  ;;  %v2814_v18 = vpop.f32.mrf.mxu3 }
 0x2cd   : > { %v3406_v19 = vadd.f32 %v3405_v3, %v3404_v52  ;;  %v2865_v9 = vadd.f32 %v2812_v15, %v2663_v14  ;;  %2600 = vst.msk [vmem:[#allocation3 + $0x98] sm:$0xff] %vm406_vm0, %v2568_v0 }
 0x2ce   : > { %v2960_v21 = vld [vmem:[#allocation3 + $0x88] sm:$0xff] }
 0x2cf   : > { %2897 = vst.msk [vmem:[#allocation3 + $0x90] sm:$0xff] %vm406_vm0, %v2865_v9  ;;  %v3162_v22 = vadd.f32 %v4879_v61, %v2960_v21 }
 0x2d0   : > { %v3225_v24 = vld [vmem:[#allocation3 + $0x80] sm:$0xff]  ;;  %v2225_v6 = vpop.f32.mrf.mxu1 }
 0x2d1   : > { %3257 = vst.msk [vmem:[%s4717_s7 + $0x80] sm:$0xff] %vm406_vm0, %v3225_v24  ;;  %v3304_v30 = vsel %vm406_vm0, %v3225_v24, 0.0  ;;  %v3360_v13 = vmul.f32 %v3225_v24, %v3225_v24  ;;  %v2272_v28 = vadd.f32 %v2225_v6, %v2070_v29 }
 0x2d2   : > { %v3305_v37 = vadd.f32 %v3304_v30, %v3303_v16  ;;  %3194 = vst.msk [vmem:[#allocation3 + $0x88] sm:$0xff] %vm406_vm0, %v3162_v22  ;;  %v2519_v31 = vpop.f32.mrf.mxu2  ;;  %v2368_v41 = vld [vmem:[#allocation3 + $0xa8] sm:$0xff]  ;;  %v3117_v34 = vpop.f32.mrf.mxu0 }
 0x2d3   : > { %v3407_v35 = vsel %vm406_vm0, %v3360_v13, 0.0  ;;  %v2569_v20 = vadd.f32 %v2519_v31, %v2367_v26  ;;  %2304 = vst.msk [vmem:[#allocation3 + $0xb0] sm:$0xff] %vm406_vm0, %v2272_v28  ;;  %v2073_v16 = vld [vmem:[#allocation3 + $0xc8] sm:$0xff] }
 0x2d4   : > { %v3408_v61 = vadd.f32 %v3407_v35, %v3406_v19  ;;  %v2664_v27 = vld [vmem:[#allocation3 + $0x98] sm:$0xff]  ;;  %v2817_v36 = vpop.f32.mrf.mxu3  ;;  %v2074_v35 = vld [vmem:[#allocation3 + $0xd0] sm:$0xff] }
 0x2d5   : > { %v2866_v38 = vadd.f32 %v2814_v18, %v2664_v27  ;;  %2601 = vst.msk [vmem:[#allocation3 + $0xa0] sm:$0xff] %vm406_vm0, %v2569_v20 }
 0x2d6   : > { %v2961_v39 = vld [vmem:[#allocation3 + $0x90] sm:$0xff] }
 0x2d7   : > { %2898 = vst.msk [vmem:[#allocation3 + $0x98] sm:$0xff] %vm406_vm0, %v2866_v38  ;;  %v3163_v40 = vadd.f32 %v4891_v44, %v2961_v39 }
 0x2d8   : > { %v2227_v12 = vpop.f32.mrf.mxu1 }
 0x2d9   : > { %v3226_v17 = vld [vmem:[#allocation3 + $0x88] sm:$0xff]  ;;  %3195 = vst.msk [vmem:[#allocation3 + $0x90] sm:$0xff] %vm406_vm0, %v3163_v40  ;;  %v2273_v48 = vadd.f32 %v2227_v12, %v2071_v42 }
 0x2da   : > { %3258 = vst.msk [vmem:[%s4717_s7 + $0x88] sm:$0xff] %vm406_vm0, %v3226_v17  ;;  %v3306_v49 = vsel %vm406_vm0, %v3226_v17, 0.0  ;;  %v3361_v33 = vmul.f32 %v3226_v17, %v3226_v17  ;;  %v2521_v45 = vpop.f32.mrf.mxu2  ;;  %v2369_v59 = vld [vmem:[#allocation3 + $0xb0] sm:$0xff] }
 0x2db   : > { %v3307_v51 = vadd.f32 %v3306_v49, %v3305_v37  ;;  %v2570_v60 = vadd.f32 %v2521_v45, %v2368_v41  ;;  %2305 = vst.msk [vmem:[#allocation3 + $0xb8] sm:$0xff] %vm406_vm0, %v2273_v48 }
 0x2dc   : > { %v3409_v44 = vsel %vm406_vm0, %v3361_v33, 0.0  ;;  %v2665_v25 = vld [vmem:[#allocation3 + $0xa0] sm:$0xff]  ;;  %v2819_v53 = vpop.f32.mrf.mxu3 }
 0x2dd   : > { %v3410_v54 = vadd.f32 %v3409_v44, %v3408_v61  ;;  %v2867_v55 = vadd.f32 %v2817_v36, %v2665_v25  ;;  %2602 = vst.msk [vmem:[#allocation3 + $0xa8] sm:$0xff] %vm406_vm0, %v2570_v60 }
 0x2de   : > { %v2962_v56 = vld [vmem:[#allocation3 + $0x98] sm:$0xff] }
 0x2df   : > { %2899 = vst.msk [vmem:[#allocation3 + $0xa0] sm:$0xff] %vm406_vm0, %v2867_v55  ;;  %v3164_v57 = vadd.f32 %v4904_v50, %v2962_v56  ;;  %v3120_v50 = vpop.f32.mrf.mxu0 }
 0x2e0   : > { %v3227_v58 = vld [vmem:[#allocation3 + $0x90] sm:$0xff]  ;;  %v2230_v2 = vpop.f32.mrf.mxu1 }
 0x2e1   : > { %3259 = vst.msk [vmem:[%s4717_s7 + $0x90] sm:$0xff] %vm406_vm0, %v3227_v58  ;;  %v3308_v52 = vsel %vm406_vm0, %v3227_v58, 0.0  ;;  %v3362_v4 = vmul.f32 %v3227_v58, %v3227_v58  ;;  %v2274_v15 = vadd.f32 %v2230_v2, %v2072_v32 }
 0x2e2   : > { %v3309_v63 = vadd.f32 %v3308_v52, %v3307_v51  ;;  %3196 = vst.msk [vmem:[#allocation3 + $0x98] sm:$0xff] %vm406_vm0, %v3164_v57  ;;  %v2524_v1 = vpop.f32.mrf.mxu2  ;;  %v2370_v23 = vld [vmem:[#allocation3 + $0xb8] sm:$0xff]  ;;  %v2076_v52 = vld [vmem:[#allocation3 + $0xe0] sm:$0xff] }
 0x2e3   : > { %v3411_v5 = vsel %vm406_vm0, %v3362_v4, 0.0  ;;  %v2571_v43 = vadd.f32 %v2524_v1, %v2369_v59  ;;  %2306 = vst.msk [vmem:[#allocation3 + $0xc0] sm:$0xff] %vm406_vm0, %v2274_v15  ;;  %v2075_v51 = vld [vmem:[#allocation3 + $0xd8] sm:$0xff] }
 0x2e4   : > { %v3412_v7 = vadd.f32 %v3411_v5, %v3410_v54  ;;  %v2666_v47 = vld [vmem:[#allocation3 + $0xa8] sm:$0xff]  ;;  %v2822_v8 = vpop.f32.mrf.mxu3 }
 0x2e5   : > { %v2868_v62 = vadd.f32 %v2819_v53, %v2666_v47  ;;  %2603 = vst.msk [vmem:[#allocation3 + $0xb0] sm:$0xff] %vm406_vm0, %v2571_v43 }
 0x2e6   : > { %v2963_v10 = vld [vmem:[#allocation3 + $0xa0] sm:$0xff] }
 0x2e7   : > { %2900 = vst.msk [vmem:[#allocation3 + $0xa8] sm:$0xff] %vm406_vm0, %v2868_v62  ;;  %v3165_v11 = vadd.f32 %v4917_v46, %v2963_v10  ;;  %v3122_v30 = vpop.f32.mrf.mxu0  ;;  %v2077_v10 = vld [vmem:[#allocation3 + $0xe8] sm:$0xff] }
 0x2e8   : > { %v2232_v0 = vpop.f32.mrf.mxu1 }
 0x2e9   : > { %v3228_v3 = vld [vmem:[#allocation3 + $0x98] sm:$0xff]  ;;  %3197 = vst.msk [vmem:[#allocation3 + $0xa0] sm:$0xff] %vm406_vm0, %v3165_v11  ;;  %v2275_v14 = vadd.f32 %v2232_v0, %v2073_v16 }
 0x2ea   : > { %3260 = vst.msk [vmem:[%s4717_s7 + $0x98] sm:$0xff] %vm406_vm0, %v3228_v3  ;;  %v3310_v18 = vsel %vm406_vm0, %v3228_v3, 0.0  ;;  %v3363_v19 = vmul.f32 %v3228_v3, %v3228_v3  ;;  %v2526_v9 = vpop.f32.mrf.mxu2  ;;  %v2371_v31 = vld [vmem:[#allocation3 + $0xc0] sm:$0xff] }
 0x2eb   : > { %v3311_v21 = vadd.f32 %v3310_v18, %v3309_v63  ;;  %v2572_v22 = vadd.f32 %v2526_v9, %v2370_v23  ;;  %2307 = vst.msk [vmem:[#allocation3 + $0xc8] sm:$0xff] %vm406_vm0, %v2275_v14 }
 0x2ec   : > { %v3413_v46 = vsel %vm406_vm0, %v3363_v19, 0.0  ;;  %v2667_v24 = vld [vmem:[#allocation3 + $0xb0] sm:$0xff]  ;;  %v2824_v26 = vpop.f32.mrf.mxu3 }
 0x2ed   : > { %v3414_v29 = vadd.f32 %v3413_v46, %v3412_v7  ;;  %v2869_v6 = vadd.f32 %v2822_v8, %v2667_v24  ;;  %2604 = vst.msk [vmem:[#allocation3 + $0xb8] sm:$0xff] %vm406_vm0, %v2572_v22 }
 0x2ee   : > { %v2964_v13 = vld [vmem:[#allocation3 + $0xa8] sm:$0xff] }
 0x2ef   : > { %2901 = vst.msk [vmem:[#allocation3 + $0xb0] sm:$0xff] %vm406_vm0, %v2869_v6  ;;  %v3166_v28 = vadd.f32 %v3117_v34, %v2964_v13  ;;  %v3125_v33 = vpop.f32.mrf.mxu0 }
 0x2f0   : > { %v3229_v37 = vld [vmem:[#allocation3 + $0xa0] sm:$0xff]  ;;  %v2235_v20 = vpop.f32.mrf.mxu1 }
 0x2f1   : > { %3261 = vst.msk [vmem:[%s4717_s7 + $0xa0] sm:$0xff] %vm406_vm0, %v3229_v37  ;;  %v3312_v61 = vsel %vm406_vm0, %v3229_v37, 0.0  ;;  %v3364_v27 = vmul.f32 %v3229_v37, %v3229_v37  ;;  %v2276_v36 = vadd.f32 %v2235_v20, %v2074_v35 }
 0x2f2   : > { %v4957_v38 = vadd.f32 %v3312_v61, %v3311_v21  ;;  %3198 = vst.msk [vmem:[#allocation3 + $0xa8] sm:$0xff] %vm406_vm0, %v3166_v28  ;;  %v2529_v39 = vpop.f32.mrf.mxu2  ;;  %v2372_v45 = vld [vmem:[#allocation3 + $0xc8] sm:$0xff] }
 0x2f3   : > { %v3415_v40 = vsel %vm406_vm0, %v3364_v27, 0.0  ;;  %v2573_v41 = vadd.f32 %v2529_v39, %v2371_v31  ;;  %2308 = vst.msk [vmem:[#allocation3 + $0xd0] sm:$0xff] %vm406_vm0, %v2276_v36  ;;  %v2079_v36 = vld [vmem:[#allocation3 + $0xf8] sm:$0xff] }
 0x2f4   : > { %v4962_v42 = vadd.f32 %v3415_v40, %v3414_v29  ;;  %v2668_v12 = vld [vmem:[#allocation3 + $0xb8] sm:$0xff]  ;;  %v2827_v17 = vpop.f32.mrf.mxu3 }
 0x2f5   : > { %v2870_v48 = vadd.f32 %v2824_v26, %v2668_v12  ;;  %2605 = vst.msk [vmem:[#allocation3 + $0xc0] sm:$0xff] %vm406_vm0, %v2573_v41  ;;  %v2078_v26 = vld [vmem:[#allocation3 + $0xf0] sm:$0xff] }
 0x2f6   : > { %v2965_v34 = vld [vmem:[#allocation3 + $0xb0] sm:$0xff] }
 0x2f7   : > { %2902 = vst.msk [vmem:[#allocation3 + $0xb8] sm:$0xff] %vm406_vm0, %v2870_v48  ;;  %v3167_v49 = vadd.f32 %v3120_v50, %v2965_v34  ;;  %v3127_v15 = vpop.f32.mrf.mxu0 }
 0x2f8   : > { %v2237_v60 = vpop.f32.mrf.mxu1 }
 0x2f9   : > { %v4966_v44 = vld [vmem:[#allocation3 + $0xa8] sm:$0xff]  ;;  %3199 = vst.msk [vmem:[#allocation3 + $0xb0] sm:$0xff] %vm406_vm0, %v3167_v49  ;;  %v2277_v25 = vadd.f32 %v2237_v60, %v2075_v51 }
 0x2fa   : > { %3262 = vst.msk [vmem:[%s4717_s7 + $0xa8] sm:$0xff] %vm406_vm0, %v4966_v44  ;;  %v2531_v53 = vpop.f32.mrf.mxu2  ;;  %v2373_v2 = vld [vmem:[#allocation3 + $0xd0] sm:$0xff] }
 0x2fb   : > { %v2574_v54 = vadd.f32 %v2531_v53, %v2372_v45  ;;  %2309 = vst.msk [vmem:[#allocation3 + $0xd8] sm:$0xff] %vm406_vm0, %v2277_v25 }
 0x2fc   : > { %v2669_v55 = vld [vmem:[#allocation3 + $0xc0] sm:$0xff]  ;;  %v2829_v56 = vpop.f32.mrf.mxu3 }
 0x2fd   : > { %v2871_v57 = vadd.f32 %v2827_v17, %v2669_v55  ;;  %2606 = vst.msk [vmem:[#allocation3 + $0xc8] sm:$0xff] %vm406_vm0, %v2574_v54 }
 0x2fe   : > { %v2966_v58 = vld [vmem:[#allocation3 + $0xb8] sm:$0xff] }
 0x2ff   : > { %2903 = vst.msk [vmem:[#allocation3 + $0xc0] sm:$0xff] %vm406_vm0, %v2871_v57  ;;  %v3168_v59 = vadd.f32 %v3122_v30, %v2966_v58  ;;  %v3130_v14 = vpop.f32.mrf.mxu0 }
 0x300   : > { %v4975_v32 = vld [vmem:[#allocation3 + $0xb0] sm:$0xff]  ;;  %v2240_v4 = vpop.f32.mrf.mxu1 }
 0x301   : > { %3263 = vst.msk [vmem:[%s4717_s7 + $0xb0] sm:$0xff] %vm406_vm0, %v4975_v32  ;;  %v2278_v63 = vadd.f32 %v2240_v4, %v2076_v52 }
 0x302   : > { %3200 = vst.msk [vmem:[#allocation3 + $0xb8] sm:$0xff] %vm406_vm0, %v3168_v59  ;;  %v2534_v1 = vpop.f32.mrf.mxu2  ;;  %v2374_v62 = vld [vmem:[#allocation3 + $0xd8] sm:$0xff] }
 0x303   : > { %v2575_v5 = vadd.f32 %v2534_v1, %v2373_v2  ;;  %2310 = vst.msk [vmem:[#allocation3 + $0xe0] sm:$0xff] %vm406_vm0, %v2278_v63 }
 0x304   : > { %v2670_v43 = vld [vmem:[#allocation3 + $0xc8] sm:$0xff]  ;;  %v2832_v50 = vpop.f32.mrf.mxu3 }
 0x305   : > { %v2872_v7 = vadd.f32 %v2829_v56, %v2670_v43  ;;  %2607 = vst.msk [vmem:[#allocation3 + $0xd0] sm:$0xff] %vm406_vm0, %v2575_v5 }
 0x306   : > { %v2967_v47 = vld [vmem:[#allocation3 + $0xc0] sm:$0xff] }
 0x307   : > { %2904 = vst.msk [vmem:[#allocation3 + $0xc8] sm:$0xff] %vm406_vm0, %v2872_v7  ;;  %v3169_v8 = vadd.f32 %v3125_v33, %v2967_v47  ;;  %v3132_v31 = vpop.f32.mrf.mxu0  ;;  %v3365_v47 = vmul.f32 %v4966_v44, %v4966_v44 }
 0x308   : > { %v2242_v11 = vpop.f32.mrf.mxu1 }
 0x309   : > { %v4984_v23 = vld [vmem:[#allocation3 + $0xb8] sm:$0xff]  ;;  %3201 = vst.msk [vmem:[#allocation3 + $0xc0] sm:$0xff] %vm406_vm0, %v3169_v8  ;;  %v2279_v16 = vadd.f32 %v2242_v11, %v2077_v10  ;;  %v3314_v8 = vsel %vm406_vm0, %v4966_v44, 0.0 }
 0x30a   : > { %3264 = vst.msk [vmem:[%s4717_s7 + $0xb8] sm:$0xff] %vm406_vm0, %v4984_v23  ;;  %v2536_v0 = vpop.f32.mrf.mxu2  ;;  %v2375_v24 = vld [vmem:[#allocation3 + $0xe0] sm:$0xff] }
 0x30b   : > { %v2576_v3 = vadd.f32 %v2536_v0, %v2374_v62  ;;  %2311 = vst.msk [vmem:[#allocation3 + $0xe8] sm:$0xff] %vm406_vm0, %v2279_v16  ;;  %v3366_v62 = vmul.f32 %v4975_v32, %v4975_v32 }
 0x30c   : > { %v2671_v18 = vld [vmem:[#allocation3 + $0xd0] sm:$0xff]  ;;  %v2834_v19 = vpop.f32.mrf.mxu3 }
 0x30d   : > { %v2873_v9 = vadd.f32 %v2832_v50, %v2671_v18  ;;  %2608 = vst.msk [vmem:[#allocation3 + $0xd8] sm:$0xff] %vm406_vm0, %v2576_v3  ;;  %v3417_v3 = vsel %vm406_vm0, %v3365_v47, 0.0  ;;  %v3367_v18 = vmul.f32 %v4984_v23, %v4984_v23 }
 0x30e   : > { %v2968_v21 = vld [vmem:[#allocation3 + $0xc8] sm:$0xff] }
 0x30f   : > { %2905 = vst.msk [vmem:[#allocation3 + $0xd0] sm:$0xff] %vm406_vm0, %v2873_v9  ;;  %v3170_v22 = vadd.f32 %v3127_v15, %v2968_v21  ;;  %v3135_v45 = vpop.f32.mrf.mxu0  ;;  %v3315_v9 = vadd.f32 %v3314_v8, %v4957_v38  ;;  %v3419_v21 = vsel %vm406_vm0, %v3366_v62, 0.0 }
 0x310   : > { %v4993_v46 = vld [vmem:[#allocation3 + $0xc0] sm:$0xff]  ;;  %v2245_v29 = vpop.f32.mrf.mxu1 }
 0x311   : > { %3265 = vst.msk [vmem:[%s4717_s7 + $0xc0] sm:$0xff] %vm406_vm0, %v4993_v46  ;;  %v2280_v6 = vadd.f32 %v2245_v29, %v2078_v26  ;;  %v3320_v38 = vsel %vm406_vm0, %v4993_v46, 0.0 }
 0x312   : > { %3202 = vst.msk [vmem:[#allocation3 + $0xc8] sm:$0xff] %vm406_vm0, %v3170_v22  ;;  %v2539_v30 = vpop.f32.mrf.mxu2  ;;  %v2376_v27 = vld [vmem:[#allocation3 + $0xe8] sm:$0xff]  ;;  %v3318_v22 = vsel %vm406_vm0, %v4984_v23, 0.0 }
 0x313   : > { %v2577_v13 = vadd.f32 %v2539_v30, %v2375_v24  ;;  %2312 = vst.msk [vmem:[#allocation3 + $0xf0] sm:$0xff] %vm406_vm0, %v2280_v6  ;;  %v3368_v24 = vmul.f32 %v4993_v46, %v4993_v46  ;;  %v3421_v6 = vsel %vm406_vm0, %v3367_v18, 0.0 }
 0x314   : > { %v2672_v28 = vld [vmem:[#allocation3 + $0xd8] sm:$0xff]  ;;  %v2837_v20 = vpop.f32.mrf.mxu3 }
 0x315   : > { %v2874_v37 = vadd.f32 %v2834_v19, %v2672_v28  ;;  %2609 = vst.msk [vmem:[#allocation3 + $0xe0] sm:$0xff] %vm406_vm0, %v2577_v13  ;;  %v3423_v28 = vsel %vm406_vm0, %v3368_v24, 0.0 }
 0x316   : > { %v2969_v35 = vld [vmem:[#allocation3 + $0xd0] sm:$0xff] }
 0x317   : > { %2906 = vst.msk [vmem:[#allocation3 + $0xd8] sm:$0xff] %vm406_vm0, %v2874_v37  ;;  %v3171_v61 = vadd.f32 %v3130_v14, %v2969_v35  ;;  %v3137_v52 = vpop.f32.mrf.mxu0  ;;  %v3316_v14 = vsel %vm406_vm0, %v4975_v32, 0.0  ;;  %v3418_v32 = vadd.f32 %v3417_v3, %v4962_v42 }
 0x318   : > { %v2247_v39 = vpop.f32.mrf.mxu1  ;;  %v3317_v26 = vadd.f32 %v3316_v14, %v3315_v9 }
 0x319   : > { %v5002_v40 = vld [vmem:[#allocation3 + $0xc8] sm:$0xff]  ;;  %3203 = vst.msk [vmem:[#allocation3 + $0xd0] sm:$0xff] %vm406_vm0, %v3171_v61  ;;  %v2281_v41 = vadd.f32 %v2247_v39, %v2079_v36  ;;  %v3420_v23 = vadd.f32 %v3419_v21, %v3418_v32 }
 0x31a   : > { %3266 = vst.msk [vmem:[%s4717_s7 + $0xc8] sm:$0xff] %vm406_vm0, %v5002_v40  ;;  %v2541_v12 = vpop.f32.mrf.mxu2  ;;  %v2377_v25 = vld [vmem:[#allocation3 + $0xf0] sm:$0xff]  ;;  %v3369_v30 = vmul.f32 %v5002_v40, %v5002_v40  ;;  %v3319_v13 = vadd.f32 %v3318_v22, %v3317_v26  ;;  %v3322_v42 = vsel %vm406_vm0, %v5002_v40, 0.0 }
 0x31b   : > { %v2578_v17 = vadd.f32 %v2541_v12, %v2376_v27  ;;  %2313 = vst.msk [vmem:[#allocation3 + $0xf8] sm:$0xff] %vm406_vm0, %v2281_v41 }
 0x31c   : > { %v2673_v48 = vld [vmem:[#allocation3 + $0xe0] sm:$0xff]  ;;  %v2839_v60 = vpop.f32.mrf.mxu3  ;;  %v3321_v35 = vadd.f32 %v3320_v38, %v3319_v13  ;;  %v3425_v46 = vsel %vm406_vm0, %v3369_v30, 0.0 }
 0x31d   : > { %v2875_v34 = vadd.f32 %v2837_v20, %v2673_v48  ;;  %2610 = vst.msk [vmem:[#allocation3 + $0xe8] sm:$0xff] %vm406_vm0, %v2578_v17 }
 0x31e   : > { %v2970_v49 = vld [vmem:[#allocation3 + $0xd8] sm:$0xff]  ;;  %v3323_v41 = vadd.f32 %v3322_v42, %v3321_v35 }
 0x31f   : > { %2907 = vst.msk [vmem:[#allocation3 + $0xe0] sm:$0xff] %vm406_vm0, %v2875_v34  ;;  %v3172_v33 = vadd.f32 %v3132_v31, %v2970_v49  ;;  %v3140_v16 = vpop.f32.mrf.mxu0  ;;  %v3422_v31 = vadd.f32 %v3421_v6, %v3420_v23 }
 0x320   : > { %v5011_v51 = vld [vmem:[#allocation3 + $0xd0] sm:$0xff] }
 0x321   : > { %3267 = vst.msk [vmem:[%s4717_s7 + $0xd0] sm:$0xff] %vm406_vm0, %v5011_v51  ;;  %v3370_v37 = vmul.f32 %v5011_v51, %v5011_v51  ;;  %v3324_v20 = vsel %vm406_vm0, %v5011_v51, 0.0  ;;  %v3424_v39 = vadd.f32 %v3423_v28, %v3422_v31 }
 0x322   : > { %3204 = vst.msk [vmem:[#allocation3 + $0xd8] sm:$0xff] %vm406_vm0, %v3172_v33  ;;  %v2544_v53 = vpop.f32.mrf.mxu2  ;;  %v2378_v59 = vld [vmem:[#allocation3 + $0xf8] sm:$0xff]  ;;  %v3325_v33 = vadd.f32 %v3324_v20, %v3323_v41 }
 0x323   : > { %v2579_v54 = vadd.f32 %v2544_v53, %v2377_v25  ;;  %v3427_v17 = vsel %vm406_vm0, %v3370_v37, 0.0  ;;  %v3426_v49 = vadd.f32 %v3425_v46, %v3424_v39 }
 0x324   : > { %v2674_v55 = vld [vmem:[#allocation3 + $0xe8] sm:$0xff]  ;;  %v2842_v4 = vpop.f32.mrf.mxu3 }
 0x325   : > { %v2876_v56 = vadd.f32 %v2839_v60, %v2674_v55  ;;  %2611 = vst.msk [vmem:[#allocation3 + $0xf0] sm:$0xff] %vm406_vm0, %v2579_v54  ;;  %v3428_v25 = vadd.f32 %v3427_v17, %v3426_v49 }
 0x326   : > { %v2971_v57 = vld [vmem:[#allocation3 + $0xe0] sm:$0xff] }
 0x327   : > { %2908 = vst.msk [vmem:[#allocation3 + $0xe8] sm:$0xff] %vm406_vm0, %v2876_v56  ;;  %v3173_v58 = vadd.f32 %v3135_v45, %v2971_v57  ;;  %v3142_v36 = vpop.f32.mrf.mxu0 }
 0x329   : > { %v3236_v2 = vld [vmem:[#allocation3 + $0xd8] sm:$0xff]  ;;  %3205 = vst.msk [vmem:[#allocation3 + $0xe0] sm:$0xff] %vm406_vm0, %v3173_v58 }
 0x32a   : > { %3268 = vst.msk [vmem:[%s4717_s7 + $0xd8] sm:$0xff] %vm406_vm0, %v3236_v2  ;;  %v2546_v15 = vpop.f32.mrf.mxu2  ;;  %v3371_v61 = vmul.f32 %v3236_v2, %v3236_v2  ;;  %v3326_v40 = vsel %vm406_vm0, %v3236_v2, 0.0 }
 0x32b   : > { %v2580_v63 = vadd.f32 %v2546_v15, %v2378_v59  ;;  %v3327_v53 = vadd.f32 %v3326_v40, %v3325_v33 }
 0x32c   : > { %v2675_v1 = vld [vmem:[#allocation3 + $0xf0] sm:$0xff]  ;;  %v2844_v11 = vpop.f32.mrf.mxu3  ;;  %v3429_v45 = vsel %vm406_vm0, %v3371_v61, 0.0 }
 0x32d   : > { %v2877_v5 = vadd.f32 %v2842_v4, %v2675_v1  ;;  %2612 = vst.msk [vmem:[#allocation3 + $0xf8] sm:$0xff] %vm406_vm0, %v2580_v63  ;;  %v3430_v57 = vadd.f32 %v3429_v45, %v3428_v25 }
 0x32e   : > { %v2972_v43 = vld [vmem:[#allocation3 + $0xe8] sm:$0xff] }
 0x32f   : > { %2909 = vst.msk [vmem:[#allocation3 + $0xf0] sm:$0xff] %vm406_vm0, %v2877_v5  ;;  %v3174_v50 = vadd.f32 %v3137_v52, %v2972_v43 }
 0x330   : > { %v3237_v7 = vld [vmem:[#allocation3 + $0xe0] sm:$0xff] }
 0x331   : > { %3269 = vst.msk [vmem:[%s4717_s7 + $0xe0] sm:$0xff] %vm406_vm0, %v3237_v7  ;;  %v3372_v48 = vmul.f32 %v3237_v7, %v3237_v7  ;;  %v3328_v51 = vsel %vm406_vm0, %v3237_v7, 0.0 }
 0x332   : > { %3206 = vst.msk [vmem:[#allocation3 + $0xe8] sm:$0xff] %vm406_vm0, %v3174_v50  ;;  %v3329_v58 = vadd.f32 %v3328_v51, %v3327_v53 }
 0x333   : > { %v3431_v54 = vsel %vm406_vm0, %v3372_v48, 0.0 }
 0x334   : > { %v2676_v10 = vld [vmem:[#allocation3 + $0xf8] sm:$0xff]  ;;  %v3432_v52 = vadd.f32 %v3431_v54, %v3430_v57 }
 0x335   : > { %v2878_v0 = vadd.f32 %v2844_v11, %v2676_v10 }
 0x336   : > { %v2973_v19 = vld [vmem:[#allocation3 + $0xf0] sm:$0xff] }
 0x337   : > { %2910 = vst.msk [vmem:[#allocation3 + $0xf8] sm:$0xff] %vm406_vm0, %v2878_v0  ;;  %v3175_v44 = vadd.f32 %v3140_v16, %v2973_v19 }
 0x339   : > { %v3238_v29 = vld [vmem:[#allocation3 + $0xe8] sm:$0xff]  ;;  %3207 = vst.msk [vmem:[#allocation3 + $0xf0] sm:$0xff] %vm406_vm0, %v3175_v44 }
 0x33a   : > { %3270 = vst.msk [vmem:[%s4717_s7 + $0xe8] sm:$0xff] %vm406_vm0, %v3238_v29  ;;  %v3373_v60 = vmul.f32 %v3238_v29, %v3238_v29  ;;  %v3330_v55 = vsel %vm406_vm0, %v3238_v29, 0.0 }
 0x33b   : > { %v3331_v4 = vadd.f32 %v3330_v55, %v3329_v58 }
 0x33c   : > { %v3433_v59 = vsel %vm406_vm0, %v3373_v60, 0.0 }
 0x33d   : > { %v3434_v63 = vadd.f32 %v3433_v59, %v3432_v52 }
 0x33e   : > { %v2974_v27 = vld [vmem:[#allocation3 + $0xf8] sm:$0xff] }
 0x33f   : > { %v3176_v12 = vadd.f32 %v3142_v36, %v2974_v27 }
 0x340   : > { %v3239_v34 = vld [vmem:[#allocation3 + $0xf0] sm:$0xff] }
 0x341   : > { %3271 = vst.msk [vmem:[%s4717_s7 + $0xf0] sm:$0xff] %vm406_vm0, %v3239_v34  ;;  %v3374_v56 = vmul.f32 %v3239_v34, %v3239_v34  ;;  %v3332_v2 = vsel %vm406_vm0, %v3239_v34, 0.0 }
 0x342   : > { %3208 = vst.msk [vmem:[#allocation3 + $0xf8] sm:$0xff] %vm406_vm0, %v3176_v12  ;;  %v3333_v1 = vadd.f32 %v3332_v2, %v3331_v4 }
 0x343   : > { %v3435_v15 = vsel %vm406_vm0, %v3374_v56, 0.0 }
 0x344   : > { %v3436_v7 = vadd.f32 %v3435_v15, %v3434_v63 }
 0x349   : > { %v3240_v5 = vld [vmem:[#allocation3 + $0xf8] sm:$0xff] }
 0x34a   : > { %3272 = vst.msk [vmem:[%s4717_s7 + $0xf8] sm:$0xff] %vm406_vm0, %v3240_v5  ;;  %v3334_v43 = vsel %vm406_vm0, %v3240_v5, 0.0  ;;  %v3375_v50 = vmul.f32 %v3240_v5, %v3240_v5 }
 0x34b   : > { %v3335_v47 = vadd.f32 %v3334_v43, %v3333_v1 }
 0x34c   : > { %v3437_v8 = vsel %vm406_vm0, %v3375_v50, 0.0 }
 0x34d   : > { %v3336_v62 = vrot.slane %v3335_v47, 4  ;;  %v3438_v10 = vadd.f32 %v3437_v8, %v3436_v7 }
 0x34f   : > { %v3337_v11 = vadd.f32 %v3336_v62, %v3335_v47  ;;  %v3439_v16 = vrot.slane %v3438_v10, 4 }
 0x351   : > { %v3338_v0 = vrot.slane %v3337_v11, 2  ;;  %v3440_v3 = vadd.f32 %v3439_v16, %v3438_v10 }
 0x353   : > { %v3339_v14 = vadd.f32 %v3338_v0, %v3337_v11  ;;  %v3441_v18 = vrot.slane %v3440_v3, 2 }
 0x355   : > { %v3340_v19 = vrot.slane %v3339_v14, 1  ;;  %v3442_v9 = vadd.f32 %v3441_v18, %v3440_v3 }
 0x357   : > { %v3341_v44 = vadd.f32 %v3340_v19, %v3339_v14  ;;  %v3443_v21 = vrot.slane %v3442_v9, 1 }
 0x359   : > { %3343 = vst.msk [vmem:[%s265_s10] sm:$0x1] %vm3342_vm2, %v3341_v44  ;;  %v3444_v22 = vadd.f32 %v3443_v21, %v3442_v9 }
 0x35b   : > { %3445 = vst.msk [vmem:[%s268_s13] sm:$0x1] %vm3342_vm2, %v3444_v22 }
 0x35c PF: > { %s17_s21 = sadd.s32 1, %s3855_s21  }
 0x35d   : > { %p14_p4 = scmp.ge.s32.totalorder %s17_s21, 4  }
 0x35f   :  { %16 = sbr.rel (!%p14_p4) target bundleno = 1 (0x1), region = 100 }

</bundles_post_ra>
